<compile_context>
chip_gen: v6e
topology: v6e:2x2x1
jax: 0.10.0
libtpu: 0.0.40
codegen_flags: <defaults>
</compile_context>

<pallas_src>
import functools
import math

import numpy as np
import jax
import jax.numpy as jnp
from jax.experimental import pallas as pl
from jax.experimental.pallas import tpu as pltpu


# ----------------------------------------------------------------------------
# Pallas kernel: one grid step = (image i, row-tile t, nearby frame ii)
#   feat_ref : (C, TH+2, W+2)  replicate-padded row tile of features[i]
#   near_ref : (C, TH+2, W+2)  replicate-padded row tile of nearby[i, ii]
#   w_ref    : (C, C)          after_fusion_layer 1x1 conv weight
#   b_ref    : (C, 1)          bias (tiny, loaded once; constant index map)
#   out_ref  : (C, TH, W)      fused + 1x1-conv output rows
# ----------------------------------------------------------------------------
def _fusion_kernel(feat_ref, near_ref, w_ref, b_ref, out_ref,
                   chsum_ref, avg_f_ref, m_ref, l_ref, acc_ref,
                   *, B, C, TH, W, K):
    ii = pl.program_id(2)
    inv_k = 1.0 / K                                    # multiply, don't divide

    def box3(ref):
        # 3x3 box sum of a (1, TH+2, W+2) map -> (1, TH, W) via 9 offset reads.
        s = ref[:, 0:TH, 0:W]
        for dh in range(3):
            for dw in range(3):
                if dh == 0 and dw == 0:
                    continue
                s = s + ref[:, dh:dh + TH, dw:dw + W]
        return s

    # ---- init per (i, t): cache avg of features[i], reset softmax state ----
    @pl.when(ii == 0)
    def _init():
        chsum_ref[...] = jnp.sum(feat_ref[...], axis=0, keepdims=True)
        avg_f_ref[...] = box3(chsum_ref) * inv_k
        m_ref[...] = jnp.full(m_ref.shape, -jnp.inf, dtype=m_ref.dtype)
        l_ref[...] = jnp.zeros(l_ref.shape, l_ref.dtype)
        acc_ref[...] = jnp.zeros(acc_ref.shape, acc_ref.dtype)

    # ---- hash similarity for this nearby frame ------------------------------
    chsum_ref[...] = jnp.sum(near_ref[...], axis=0, keepdims=True)
    avg_n = box3(chsum_ref) * inv_k                    # (1, TH, W)
    avg_f = avg_f_ref[...]                             # (1, TH, W) cached

    # sim = (# agreeing hash bits) = K - hamming distance, accumulated shift
    # by shift — never materialises a (9C, ...) stack.
    ham = jnp.zeros((1, TH, W), jnp.float32)
    for dh in range(3):
        for dw in range(3):
            hf = feat_ref[:, dh:dh + TH, dw:dw + W] >= avg_f   # (C, TH, W) bool
            hn = near_ref[:, dh:dh + TH, dw:dw + W] >= avg_n
            ham = ham + jnp.sum((hf != hn).astype(jnp.float32),
                                axis=0, keepdims=True)
    sim = K - ham                                      # (1, TH, W)

    # ---- online softmax over the nearby-frame grid axis ---------------------
    m_old = m_ref[...]
    m_new = jnp.maximum(m_old, sim)
    alpha = jnp.exp(m_old - m_new)
    p = jnp.exp(sim - m_new)
    l_ref[...] = alpha * l_ref[...] + p
    acc_ref[...] = alpha * acc_ref[...] + p * near_ref[:, 1:1 + TH, 1:1 + W]
    m_ref[...] = m_new

    # ---- finalize: normalise, add features[i], 1x1 conv on the MXU ----------
    @pl.when(ii == B - 1)
    def _finalize():
        wm = w_ref[...]                                # (C, C) VMEM-resident
        bb = b_ref[...]                                # (C, 1)
        for h in range(TH):                            # static unroll
            inv_l = pl.reciprocal(l_ref[:, h, :], approx=True)        # (1, W)
            fused = acc_ref[:, h, :] * inv_l + feat_ref[:, 1 + h, 1:1 + W]
            out_ref[:, h, :] = (
                jnp.dot(wm, fused, preferred_element_type=jnp.float32) + bb
            ).astype(out_ref.dtype)


# ----------------------------------------------------------------------------
# Wrapper: NCHW plumbing (replicate pad + row tiles with 1-row halo) + pallas_call
# ----------------------------------------------------------------------------
def _pick_tile_h(H):
    # Multiple-of-8 row tile that yields >= 2 spatial tiles (keeps per-step VMEM
    # small and gives the v7x megacore something to shard); else full height.
    for th in (64, 32, 16, 8):
        if H % th == 0 and H // th >= 2:
            return th
    return H


def attention_fusion(features, nearby_features, w, b, *, tile_h=None):
    """
    features        : (BATCH, C, H, W) f32
    nearby_features : (N, B, C, H, W) f32  — N output images (N <= BATCH),
                      B nearby frames per image
    w               : (C, C) f32   after_fusion_layer 1x1 conv weight
    b               : (C,)   f32   bias
    returns         : (N, C, H, W) f32
    """
    _, C, H, W = features.shape
    N, B = nearby_features.shape[:2]
    TH = tile_h if tile_h is not None else _pick_tile_h(H)
    assert H % TH == 0
    T = H // TH
    THp, Wp = TH + 2, W + 2

    feats = features[:N].astype(jnp.float32)
    nears = nearby_features.astype(jnp.float32)

    # Replicate pad by one pixel and cut into row tiles with a one-row halo.
    feat_p = jnp.pad(feats, ((0, 0), (0, 0), (1, 1), (1, 1)), mode='edge')
    near_p = jnp.pad(nears, ((0, 0), (0, 0), (0, 0), (1, 1), (1, 1)), mode='edge')
    feat_tiles = jnp.stack(
        [feat_p[:, :, t * TH:t * TH + THp, :] for t in range(T)], axis=1
    ).reshape(N * T, C, THp, Wp)
    near_tiles = jnp.stack(
        [near_p[:, :, :, t * TH:t * TH + THp, :] for t in range(T)], axis=2
    ).reshape(N * B * T, C, THp, Wp)

    w2 = w.astype(jnp.float32)
    b2 = b.reshape(C, 1).astype(jnp.float32)

    kernel = functools.partial(_fusion_kernel, B=B, C=C, TH=TH, W=W, K=9 * C)
    out = pl.pallas_call(
        kernel,
        out_shape=jax.ShapeDtypeStruct((N, C, H, W), jnp.float32),
        grid=(N, T, B),
        in_specs=[
            pl.BlockSpec((None, C, THp, Wp),
                         lambda i, t, ii: (i * T + t, 0, 0, 0)),
            pl.BlockSpec((None, C, THp, Wp),
                         lambda i, t, ii: ((i * B + ii) * T + t, 0, 0, 0)),
            pl.BlockSpec((C, C), lambda i, t, ii: (0, 0)),
            pl.BlockSpec((C, 1), lambda i, t, ii: (0, 0)),
        ],
        out_specs=pl.BlockSpec((None, C, TH, W), lambda i, t, ii: (i, 0, t, 0)),
        scratch_shapes=[
            pltpu.VMEM((1, THp, Wp), jnp.float32),   # channel-sum staging
            pltpu.VMEM((1, TH, W), jnp.float32),     # cached avg of features[i]
            pltpu.VMEM((1, TH, W), jnp.float32),     # online-softmax running max
            pltpu.VMEM((1, TH, W), jnp.float32),     # online-softmax exp-sum
            pltpu.VMEM((C, TH, W), jnp.float32),     # weighted-feature accumulator
        ],
        compiler_params=pltpu.CompilerParams(
            dimension_semantics=("parallel", "parallel", "arbitrary")),
    )(feat_tiles, near_tiles, w2, b2)
    return out


# ----------------------------------------------------------------------------
# Pure-JAX reference (mirrors the PyTorch forward math) for a sanity check
# ----------------------------------------------------------------------------
def _hash_sim_ref(m1, m2):
    C, H, W = m1.shape
    K = 9 * C

    def unfold(x):
        xp = jnp.pad(x, ((0, 0), (1, 1), (1, 1)), mode='edge')
        sh = [xp[:, dh:dh + H, dw:dw + W] for dh in range(3) for dw in range(3)]
        return jnp.stack(sh, axis=0).reshape(K, H, W)

    t1, t2 = unfold(m1), unfold(m2)
    a1 = jnp.sum(t1, axis=0) / K
    a2 = jnp.sum(t2, axis=0) / K
    return jnp.sum((t1 >= a1) == (t2 >= a2), axis=0).astype(jnp.float32)


def _reference(features, nearby_features, w, b):
    N = nearby_features.shape[0]
    outs = []
    for i in range(N):
        feat = features[i]
        sims = jnp.stack(
            [_hash_sim_ref(feat, nearby_features[i, ii])
             for ii in range(nearby_features.shape[1])], axis=0)      # (B, H, W)
        wts = jax.nn.softmax(sims, axis=0)[:, None]                   # (B,1,H,W)
        fused = jnp.sum(wts * nearby_features[i], axis=0) + feat      # (C,H,W)
        out = jnp.einsum('oc,chw->ohw', w, fused) + b[:, None, None]
        outs.append(out)
    return jnp.stack(outs, axis=0)


if __name__ == "__main__":
    BATCH, NNEAR, C, H, W = 2, 2, 8, 16, 16
    key = jax.random.PRNGKey(0)
    k1, k2, k3 = jax.random.split(key, 3)

    features = jax.random.normal(k1, (BATCH, C, H, W), jnp.float32)
    nearby_features = jax.random.normal(k2, (BATCH, NNEAR, C, H, W), jnp.float32)

    # after_fusion_layer params: kaiming_uniform_(a=1) weight, zero bias
    bound = math.sqrt(6.0 / (2.0 * C))  # fan_in = C * 1 * 1, a = 1
    w = jax.random.uniform(k3, (C, C), jnp.float32, -bound, bound)
    b = jnp.zeros((C,), jnp.float32)

    out = attention_fusion(features, nearby_features, w, b)
    out = jax.block_until_ready(out)
    assert out.shape == (BATCH, C, H, W)

    ref = _reference(features, nearby_features, w, b)
    # tolerance slightly loosened for the EUP approximate reciprocal
    np.testing.assert_allclose(np.asarray(out), np.asarray(ref),
                               rtol=5e-3, atol=5e-3)
    print("KERNEL_OK")
</pallas_src>

<mosaic_0001>
module attributes {stable_mosaic.version = 11 : i64} {
  func.func @_fusion_kernel(%arg0: i32, %arg1: i32, %arg2: i32, %arg3: memref<1x8x10x18xf32, #tpu.memory_space<vmem>>, %arg4: memref<1x8x10x18xf32, #tpu.memory_space<vmem>>, %arg5: memref<8x8xf32, #tpu.memory_space<vmem>>, %arg6: memref<8x1xf32, #tpu.memory_space<vmem>>, %arg7: memref<1x8x8x16xf32, #tpu.memory_space<vmem>>, %arg8: memref<1x10x18xf32, #tpu.memory_space<vmem>>, %arg9: memref<1x8x16xf32, #tpu.memory_space<vmem>>, %arg10: memref<1x8x16xf32, #tpu.memory_space<vmem>>, %arg11: memref<1x8x16xf32, #tpu.memory_space<vmem>>, %arg12: memref<8x8x16xf32, #tpu.memory_space<vmem>>) attributes {dimension_semantics = [#tpu.dimension_semantics<parallel>, #tpu.dimension_semantics<parallel>, #tpu.dimension_semantics<arbitrary>], iteration_bounds = array<i64: 2, 2, 2>, scalar_prefetch = 0 : i64, scratch_operands = 5 : i64, tpu.core_type = #tpu.core_type<tc>, window_params = [{transform_indices = @transform_0, window_bounds = array<i64: 1, 8, 10, 18>}, {transform_indices = @transform_1, window_bounds = array<i64: 1, 8, 10, 18>}, {pipeline_mode = #tpu.pipeline_mode<synchronous>, transform_indices = @transform_2, window_bounds = array<i64: 8, 8>}, {pipeline_mode = #tpu.pipeline_mode<synchronous>, transform_indices = @transform_3, window_bounds = array<i64: 8, 1>}, {transform_indices = @transform_4, window_bounds = array<i64: 1, 8, 8, 16>}]} {
    %c0_i32 = arith.constant 0 : i32
    %0 = arith.cmpi eq, %arg2, %c0_i32 : i32
    %1 = arith.extui %0 : i1 to i32
    %c0_i32_0 = arith.constant 0 : i32
    %2 = arith.cmpi ne, %1, %c0_i32_0 : i32
    scf.if %2 {
      %c0_142 = arith.constant 0 : index
      %c0_143 = arith.constant 0 : index
      %c0_144 = arith.constant 0 : index
      %c0_145 = arith.constant 0 : index
      %180 = vector.load %arg3[%c0_142, %c0_143, %c0_144, %c0_145] : memref<1x8x10x18xf32, #tpu.memory_space<vmem>>, vector<1x8x10x18xf32>
      %181 = vector.shape_cast %180 : vector<1x8x10x18xf32> to vector<8x10x18xf32>
      %cst_146 = arith.constant dense<0.000000e+00> : vector<10x18xf32>
      %182 = vector.multi_reduction <add>, %181, %cst_146 [0] : vector<8x10x18xf32> to vector<10x18xf32>
      %183 = vector.shape_cast %182 : vector<10x18xf32> to vector<1x10x18xf32>
      %c0_147 = arith.constant 0 : index
      %c0_148 = arith.constant 0 : index
      %c0_149 = arith.constant 0 : index
      %184 = vector.load %arg8[%c0_147, %c0_148, %c0_149] : memref<1x10x18xf32, #tpu.memory_space<vmem>>, vector<1x10x18xf32>
      tpu.vector_store %arg8[%c0_147, %c0_148, %c0_149], %183 {strides = array<i32>} : memref<1x10x18xf32, #tpu.memory_space<vmem>>, vector<1x10x18xf32>,
      %c0_150 = arith.constant 0 : index
      %c0_151 = arith.constant 0 : index
      %c0_152 = arith.constant 0 : index
      %185 = vector.load %arg8[%c0_150, %c0_151, %c0_152] : memref<1x10x18xf32, #tpu.memory_space<vmem>>, vector<1x8x16xf32>
      %c0_153 = arith.constant 0 : index
      %c0_154 = arith.constant 0 : index
      %c1_155 = arith.constant 1 : index
      %186 = vector.load %arg8[%c0_153, %c0_154, %c1_155] : memref<1x10x18xf32, #tpu.memory_space<vmem>>, vector<1x8x16xf32>
      %187 = arith.addf %185, %186 : vector<1x8x16xf32>
      %c0_156 = arith.constant 0 : index
      %c0_157 = arith.constant 0 : index
      %c2_158 = arith.constant 2 : index
      %188 = vector.load %arg8[%c0_156, %c0_157, %c2_158] : memref<1x10x18xf32, #tpu.memory_space<vmem>>, vector<1x8x16xf32>
      %189 = arith.addf %187, %188 : vector<1x8x16xf32>
      %c0_159 = arith.constant 0 : index
      %c1_160 = arith.constant 1 : index
      %c0_161 = arith.constant 0 : index
      %190 = vector.load %arg8[%c0_159, %c1_160, %c0_161] : memref<1x10x18xf32, #tpu.memory_space<vmem>>, vector<1x8x16xf32>
      %191 = arith.addf %189, %190 : vector<1x8x16xf32>
      %c0_162 = arith.constant 0 : index
      %c1_163 = arith.constant 1 : index
      %c1_164 = arith.constant 1 : index
      %192 = vector.load %arg8[%c0_162, %c1_163, %c1_164] : memref<1x10x18xf32, #tpu.memory_space<vmem>>, vector<1x8x16xf32>
      %193 = arith.addf %191, %192 : vector<1x8x16xf32>
      %c0_165 = arith.constant 0 : index
      %c1_166 = arith.constant 1 : index
      %c2_167 = arith.constant 2 : index
      %194 = vector.load %arg8[%c0_165, %c1_166, %c2_167] : memref<1x10x18xf32, #tpu.memory_space<vmem>>, vector<1x8x16xf32>
      %195 = arith.addf %193, %194 : vector<1x8x16xf32>
      %c0_168 = arith.constant 0 : index
      %c2_169 = arith.constant 2 : index
      %c0_170 = arith.constant 0 : index
      %196 = vector.load %arg8[%c0_168, %c2_169, %c0_170] : memref<1x10x18xf32, #tpu.memory_space<vmem>>, vector<1x8x16xf32>
      %197 = arith.addf %195, %196 : vector<1x8x16xf32>
      %c0_171 = arith.constant 0 : index
      %c2_172 = arith.constant 2 : index
      %c1_173 = arith.constant 1 : index
      %198 = vector.load %arg8[%c0_171, %c2_172, %c1_173] : memref<1x10x18xf32, #tpu.memory_space<vmem>>, vector<1x8x16xf32>
      %199 = arith.addf %197, %198 : vector<1x8x16xf32>
      %c0_174 = arith.constant 0 : index
      %c2_175 = arith.constant 2 : index
      %c2_176 = arith.constant 2 : index
      %200 = vector.load %arg8[%c0_174, %c2_175, %c2_176] : memref<1x10x18xf32, #tpu.memory_space<vmem>>, vector<1x8x16xf32>
      %201 = arith.addf %199, %200 : vector<1x8x16xf32>
      %cst_177 = arith.constant 0.013888889 : f32
      %202 = vector.broadcast %cst_177 : f32 to vector<1x8x16xf32>
      %203 = arith.mulf %201, %202 : vector<1x8x16xf32>
      %c0_178 = arith.constant 0 : index
      %c0_179 = arith.constant 0 : index
      %c0_180 = arith.constant 0 : index
      %204 = vector.load %arg9[%c0_178, %c0_179, %c0_180] : memref<1x8x16xf32, #tpu.memory_space<vmem>>, vector<1x8x16xf32>
      tpu.vector_store %arg9[%c0_178, %c0_179, %c0_180], %203 {strides = array<i32>} : memref<1x8x16xf32, #tpu.memory_space<vmem>>, vector<1x8x16xf32>,
      %cst_181 = arith.constant 0xFF800000 : f32
      %205 = vector.broadcast %cst_181 : f32 to vector<1x8x16xf32>
      %c0_182 = arith.constant 0 : index
      %c0_183 = arith.constant 0 : index
      %c0_184 = arith.constant 0 : index
      %206 = vector.load %arg10[%c0_182, %c0_183, %c0_184] : memref<1x8x16xf32, #tpu.memory_space<vmem>>, vector<1x8x16xf32>
      tpu.vector_store %arg10[%c0_182, %c0_183, %c0_184], %205 {strides = array<i32>} : memref<1x8x16xf32, #tpu.memory_space<vmem>>, vector<1x8x16xf32>,
      %cst_185 = arith.constant 0.000000e+00 : f32
      %207 = vector.broadcast %cst_185 : f32 to vector<1x8x16xf32>
      %c0_186 = arith.constant 0 : index
      %c0_187 = arith.constant 0 : index
      %c0_188 = arith.constant 0 : index
      %208 = vector.load %arg11[%c0_186, %c0_187, %c0_188] : memref<1x8x16xf32, #tpu.memory_space<vmem>>, vector<1x8x16xf32>
      tpu.vector_store %arg11[%c0_186, %c0_187, %c0_188], %207 {strides = array<i32>} : memref<1x8x16xf32, #tpu.memory_space<vmem>>, vector<1x8x16xf32>,
      %cst_189 = arith.constant 0.000000e+00 : f32
      %209 = vector.broadcast %cst_189 : f32 to vector<8x8x16xf32>
      %c0_190 = arith.constant 0 : index
      %c0_191 = arith.constant 0 : index
      %c0_192 = arith.constant 0 : index
      %210 = vector.load %arg12[%c0_190, %c0_191, %c0_192] : memref<8x8x16xf32, #tpu.memory_space<vmem>>, vector<8x8x16xf32>
      tpu.vector_store %arg12[%c0_190, %c0_191, %c0_192], %209 {strides = array<i32>} : memref<8x8x16xf32, #tpu.memory_space<vmem>>, vector<8x8x16xf32>,
    } else {
    }
    %c0 = arith.constant 0 : index
    %c0_1 = arith.constant 0 : index
    %c0_2 = arith.constant 0 : index
    %c0_3 = arith.constant 0 : index
    %3 = vector.load %arg4[%c0, %c0_1, %c0_2, %c0_3] : memref<1x8x10x18xf32, #tpu.memory_space<vmem>>, vector<1x8x10x18xf32>
    %4 = vector.shape_cast %3 : vector<1x8x10x18xf32> to vector<8x10x18xf32>
    %cst = arith.constant dense<0.000000e+00> : vector<10x18xf32>
    %5 = vector.multi_reduction <add>, %4, %cst [0] : vector<8x10x18xf32> to vector<10x18xf32>
    %6 = vector.shape_cast %5 : vector<10x18xf32> to vector<1x10x18xf32>
    %c0_4 = arith.constant 0 : index
    %c0_5 = arith.constant 0 : index
    %c0_6 = arith.constant 0 : index
    %7 = vector.load %arg8[%c0_4, %c0_5, %c0_6] : memref<1x10x18xf32, #tpu.memory_space<vmem>>, vector<1x10x18xf32>
    tpu.vector_store %arg8[%c0_4, %c0_5, %c0_6], %6 {strides = array<i32>} : memref<1x10x18xf32, #tpu.memory_space<vmem>>, vector<1x10x18xf32>,
    %c0_7 = arith.constant 0 : index
    %c0_8 = arith.constant 0 : index
    %c0_9 = arith.constant 0 : index
    %8 = vector.load %arg8[%c0_7, %c0_8, %c0_9] : memref<1x10x18xf32, #tpu.memory_space<vmem>>, vector<1x8x16xf32>
    %c0_10 = arith.constant 0 : index
    %c0_11 = arith.constant 0 : index
    %c1 = arith.constant 1 : index
    %9 = vector.load %arg8[%c0_10, %c0_11, %c1] : memref<1x10x18xf32, #tpu.memory_space<vmem>>, vector<1x8x16xf32>
    %10 = arith.addf %8, %9 : vector<1x8x16xf32>
    %c0_12 = arith.constant 0 : index
    %c0_13 = arith.constant 0 : index
    %c2 = arith.constant 2 : index
    %11 = vector.load %arg8[%c0_12, %c0_13, %c2] : memref<1x10x18xf32, #tpu.memory_space<vmem>>, vector<1x8x16xf32>
    %12 = arith.addf %10, %11 : vector<1x8x16xf32>
    %c0_14 = arith.constant 0 : index
    %c1_15 = arith.constant 1 : index
    %c0_16 = arith.constant 0 : index
    %13 = vector.load %arg8[%c0_14, %c1_15, %c0_16] : memref<1x10x18xf32, #tpu.memory_space<vmem>>, vector<1x8x16xf32>
    %14 = arith.addf %12, %13 : vector<1x8x16xf32>
    %c0_17 = arith.constant 0 : index
    %c1_18 = arith.constant 1 : index
    %c1_19 = arith.constant 1 : index
    %15 = vector.load %arg8[%c0_17, %c1_18, %c1_19] : memref<1x10x18xf32, #tpu.memory_space<vmem>>, vector<1x8x16xf32>
    %16 = arith.addf %14, %15 : vector<1x8x16xf32>
    %c0_20 = arith.constant 0 : index
    %c1_21 = arith.constant 1 : index
    %c2_22 = arith.constant 2 : index
    %17 = vector.load %arg8[%c0_20, %c1_21, %c2_22] : memref<1x10x18xf32, #tpu.memory_space<vmem>>, vector<1x8x16xf32>
    %18 = arith.addf %16, %17 : vector<1x8x16xf32>
    %c0_23 = arith.constant 0 : index
    %c2_24 = arith.constant 2 : index
    %c0_25 = arith.constant 0 : index
    %19 = vector.load %arg8[%c0_23, %c2_24, %c0_25] : memref<1x10x18xf32, #tpu.memory_space<vmem>>, vector<1x8x16xf32>
    %20 = arith.addf %18, %19 : vector<1x8x16xf32>
    %c0_26 = arith.constant 0 : index
    %c2_27 = arith.constant 2 : index
    %c1_28 = arith.constant 1 : index
    %21 = vector.load %arg8[%c0_26, %c2_27, %c1_28] : memref<1x10x18xf32, #tpu.memory_space<vmem>>, vector<1x8x16xf32>
    %22 = arith.addf %20, %21 : vector<1x8x16xf32>
    %c0_29 = arith.constant 0 : index
    %c2_30 = arith.constant 2 : index
    %c2_31 = arith.constant 2 : index
    %23 = vector.load %arg8[%c0_29, %c2_30, %c2_31] : memref<1x10x18xf32, #tpu.memory_space<vmem>>, vector<1x8x16xf32>
    %24 = arith.addf %22, %23 : vector<1x8x16xf32>
    %cst_32 = arith.constant 0.013888889 : f32
    %25 = vector.broadcast %cst_32 : f32 to vector<1x8x16xf32>
    %26 = arith.mulf %24, %25 : vector<1x8x16xf32>
    %c0_33 = arith.constant 0 : index
    %c0_34 = arith.constant 0 : index
    %c0_35 = arith.constant 0 : index
    %27 = vector.load %arg9[%c0_33, %c0_34, %c0_35] : memref<1x8x16xf32, #tpu.memory_space<vmem>>, vector<1x8x16xf32>
    %cst_36 = arith.constant 0.000000e+00 : f32
    %28 = vector.broadcast %cst_36 : f32 to vector<1x8x16xf32>
    %c0_37 = arith.constant 0 : index
    %c0_38 = arith.constant 0 : index
    %c0_39 = arith.constant 0 : index
    %c0_40 = arith.constant 0 : index
    %29 = vector.load %arg3[%c0_37, %c0_38, %c0_39, %c0_40] : memref<1x8x10x18xf32, #tpu.memory_space<vmem>>, vector<1x8x8x16xf32>
    %30 = vector.shape_cast %29 : vector<1x8x8x16xf32> to vector<8x8x16xf32>
    %31 = vector.broadcast %27 : vector<1x8x16xf32> to vector<8x8x16xf32>
    %32 = arith.cmpf oge, %30, %31 : vector<8x8x16xf32>
    %c0_41 = arith.constant 0 : index
    %c0_42 = arith.constant 0 : index
    %c0_43 = arith.constant 0 : index
    %c0_44 = arith.constant 0 : index
    %33 = vector.load %arg4[%c0_41, %c0_42, %c0_43, %c0_44] : memref<1x8x10x18xf32, #tpu.memory_space<vmem>>, vector<1x8x8x16xf32>
    %34 = vector.shape_cast %33 : vector<1x8x8x16xf32> to vector<8x8x16xf32>
    %35 = vector.broadcast %26 : vector<1x8x16xf32> to vector<8x8x16xf32>
    %36 = arith.cmpf oge, %34, %35 : vector<8x8x16xf32>
    %37 = arith.xori %32, %36 : vector<8x8x16xi1>
    %38 = arith.extui %37 : vector<8x8x16xi1> to vector<8x8x16xi32>
    %39 = arith.sitofp %38 : vector<8x8x16xi32> to vector<8x8x16xf32>
    %cst_45 = arith.constant dense<0.000000e+00> : vector<8x16xf32>
    %40 = vector.multi_reduction <add>, %39, %cst_45 [0] : vector<8x8x16xf32> to vector<8x16xf32>
    %41 = vector.shape_cast %40 : vector<8x16xf32> to vector<1x8x16xf32>
    %42 = arith.addf %28, %41 : vector<1x8x16xf32>
    %c0_46 = arith.constant 0 : index
    %c0_47 = arith.constant 0 : index
    %c0_48 = arith.constant 0 : index
    %c1_49 = arith.constant 1 : index
    %43 = vector.load %arg3[%c0_46, %c0_47, %c0_48, %c1_49] : memref<1x8x10x18xf32, #tpu.memory_space<vmem>>, vector<1x8x8x16xf32>
    %44 = vector.shape_cast %43 : vector<1x8x8x16xf32> to vector<8x8x16xf32>
    %45 = vector.broadcast %27 : vector<1x8x16xf32> to vector<8x8x16xf32>
    %46 = arith.cmpf oge, %44, %45 : vector<8x8x16xf32>
    %c0_50 = arith.constant 0 : index
    %c0_51 = arith.constant 0 : index
    %c0_52 = arith.constant 0 : index
    %c1_53 = arith.constant 1 : index
    %47 = vector.load %arg4[%c0_50, %c0_51, %c0_52, %c1_53] : memref<1x8x10x18xf32, #tpu.memory_space<vmem>>, vector<1x8x8x16xf32>
    %48 = vector.shape_cast %47 : vector<1x8x8x16xf32> to vector<8x8x16xf32>
    %49 = vector.broadcast %26 : vector<1x8x16xf32> to vector<8x8x16xf32>
    %50 = arith.cmpf oge, %48, %49 : vector<8x8x16xf32>
    %51 = arith.xori %46, %50 : vector<8x8x16xi1>
    %52 = arith.extui %51 : vector<8x8x16xi1> to vector<8x8x16xi32>
    %53 = arith.sitofp %52 : vector<8x8x16xi32> to vector<8x8x16xf32>
    %cst_54 = arith.constant dense<0.000000e+00> : vector<8x16xf32>
    %54 = vector.multi_reduction <add>, %53, %cst_54 [0] : vector<8x8x16xf32> to vector<8x16xf32>
    %55 = vector.shape_cast %54 : vector<8x16xf32> to vector<1x8x16xf32>
    %56 = arith.addf %42, %55 : vector<1x8x16xf32>
    %c0_55 = arith.constant 0 : index
    %c0_56 = arith.constant 0 : index
    %c0_57 = arith.constant 0 : index
    %c2_58 = arith.constant 2 : index
    %57 = vector.load %arg3[%c0_55, %c0_56, %c0_57, %c2_58] : memref<1x8x10x18xf32, #tpu.memory_space<vmem>>, vector<1x8x8x16xf32>
    %58 = vector.shape_cast %57 : vector<1x8x8x16xf32> to vector<8x8x16xf32>
    %59 = vector.broadcast %27 : vector<1x8x16xf32> to vector<8x8x16xf32>
    %60 = arith.cmpf oge, %58, %59 : vector<8x8x16xf32>
    %c0_59 = arith.constant 0 : index
    %c0_60 = arith.constant 0 : index
    %c0_61 = arith.constant 0 : index
    %c2_62 = arith.constant 2 : index
    %61 = vector.load %arg4[%c0_59, %c0_60, %c0_61, %c2_62] : memref<1x8x10x18xf32, #tpu.memory_space<vmem>>, vector<1x8x8x16xf32>
    %62 = vector.shape_cast %61 : vector<1x8x8x16xf32> to vector<8x8x16xf32>
    %63 = vector.broadcast %26 : vector<1x8x16xf32> to vector<8x8x16xf32>
    %64 = arith.cmpf oge, %62, %63 : vector<8x8x16xf32>
    %65 = arith.xori %60, %64 : vector<8x8x16xi1>
    %66 = arith.extui %65 : vector<8x8x16xi1> to vector<8x8x16xi32>
    %67 = arith.sitofp %66 : vector<8x8x16xi32> to vector<8x8x16xf32>
    %cst_63 = arith.constant dense<0.000000e+00> : vector<8x16xf32>
    %68 = vector.multi_reduction <add>, %67, %cst_63 [0] : vector<8x8x16xf32> to vector<8x16xf32>
    %69 = vector.shape_cast %68 : vector<8x16xf32> to vector<1x8x16xf32>
    %70 = arith.addf %56, %69 : vector<1x8x16xf32>
    %c0_64 = arith.constant 0 : index
    %c0_65 = arith.constant 0 : index
    %c1_66 = arith.constant 1 : index
    %c0_67 = arith.constant 0 : index
    %71 = vector.load %arg3[%c0_64, %c0_65, %c1_66, %c0_67] : memref<1x8x10x18xf32, #tpu.memory_space<vmem>>, vector<1x8x8x16xf32>
    %72 = vector.shape_cast %71 : vector<1x8x8x16xf32> to vector<8x8x16xf32>
    %73 = vector.broadcast %27 : vector<1x8x16xf32> to vector<8x8x16xf32>
    %74 = arith.cmpf oge, %72, %73 : vector<8x8x16xf32>
    %c0_68 = arith.constant 0 : index
    %c0_69 = arith.constant 0 : index
    %c1_70 = arith.constant 1 : index
    %c0_71 = arith.constant 0 : index
    %75 = vector.load %arg4[%c0_68, %c0_69, %c1_70, %c0_71] : memref<1x8x10x18xf32, #tpu.memory_space<vmem>>, vector<1x8x8x16xf32>
    %76 = vector.shape_cast %75 : vector<1x8x8x16xf32> to vector<8x8x16xf32>
    %77 = vector.broadcast %26 : vector<1x8x16xf32> to vector<8x8x16xf32>
    %78 = arith.cmpf oge, %76, %77 : vector<8x8x16xf32>
    %79 = arith.xori %74, %78 : vector<8x8x16xi1>
    %80 = arith.extui %79 : vector<8x8x16xi1> to vector<8x8x16xi32>
    %81 = arith.sitofp %80 : vector<8x8x16xi32> to vector<8x8x16xf32>
    %cst_72 = arith.constant dense<0.000000e+00> : vector<8x16xf32>
    %82 = vector.multi_reduction <add>, %81, %cst_72 [0] : vector<8x8x16xf32> to vector<8x16xf32>
    %83 = vector.shape_cast %82 : vector<8x16xf32> to vector<1x8x16xf32>
    %84 = arith.addf %70, %83 : vector<1x8x16xf32>
    %c0_73 = arith.constant 0 : index
    %c0_74 = arith.constant 0 : index
    %c1_75 = arith.constant 1 : index
    %c1_76 = arith.constant 1 : index
    %85 = vector.load %arg3[%c0_73, %c0_74, %c1_75, %c1_76] : memref<1x8x10x18xf32, #tpu.memory_space<vmem>>, vector<1x8x8x16xf32>
    %86 = vector.shape_cast %85 : vector<1x8x8x16xf32> to vector<8x8x16xf32>
    %87 = vector.broadcast %27 : vector<1x8x16xf32> to vector<8x8x16xf32>
    %88 = arith.cmpf oge, %86, %87 : vector<8x8x16xf32>
    %c0_77 = arith.constant 0 : index
    %c0_78 = arith.constant 0 : index
    %c1_79 = arith.constant 1 : index
    %c1_80 = arith.constant 1 : index
    %89 = vector.load %arg4[%c0_77, %c0_78, %c1_79, %c1_80] : memref<1x8x10x18xf32, #tpu.memory_space<vmem>>, vector<1x8x8x16xf32>
    %90 = vector.shape_cast %89 : vector<1x8x8x16xf32> to vector<8x8x16xf32>
    %91 = vector.broadcast %26 : vector<1x8x16xf32> to vector<8x8x16xf32>
    %92 = arith.cmpf oge, %90, %91 : vector<8x8x16xf32>
    %93 = arith.xori %88, %92 : vector<8x8x16xi1>
    %94 = arith.extui %93 : vector<8x8x16xi1> to vector<8x8x16xi32>
    %95 = arith.sitofp %94 : vector<8x8x16xi32> to vector<8x8x16xf32>
    %cst_81 = arith.constant dense<0.000000e+00> : vector<8x16xf32>
    %96 = vector.multi_reduction <add>, %95, %cst_81 [0] : vector<8x8x16xf32> to vector<8x16xf32>
    %97 = vector.shape_cast %96 : vector<8x16xf32> to vector<1x8x16xf32>
    %98 = arith.addf %84, %97 : vector<1x8x16xf32>
    %c0_82 = arith.constant 0 : index
    %c0_83 = arith.constant 0 : index
    %c1_84 = arith.constant 1 : index
    %c2_85 = arith.constant 2 : index
    %99 = vector.load %arg3[%c0_82, %c0_83, %c1_84, %c2_85] : memref<1x8x10x18xf32, #tpu.memory_space<vmem>>, vector<1x8x8x16xf32>
    %100 = vector.shape_cast %99 : vector<1x8x8x16xf32> to vector<8x8x16xf32>
    %101 = vector.broadcast %27 : vector<1x8x16xf32> to vector<8x8x16xf32>
    %102 = arith.cmpf oge, %100, %101 : vector<8x8x16xf32>
    %c0_86 = arith.constant 0 : index
    %c0_87 = arith.constant 0 : index
    %c1_88 = arith.constant 1 : index
    %c2_89 = arith.constant 2 : index
    %103 = vector.load %arg4[%c0_86, %c0_87, %c1_88, %c2_89] : memref<1x8x10x18xf32, #tpu.memory_space<vmem>>, vector<1x8x8x16xf32>
    %104 = vector.shape_cast %103 : vector<1x8x8x16xf32> to vector<8x8x16xf32>
    %105 = vector.broadcast %26 : vector<1x8x16xf32> to vector<8x8x16xf32>
    %106 = arith.cmpf oge, %104, %105 : vector<8x8x16xf32>
    %107 = arith.xori %102, %106 : vector<8x8x16xi1>
    %108 = arith.extui %107 : vector<8x8x16xi1> to vector<8x8x16xi32>
    %109 = arith.sitofp %108 : vector<8x8x16xi32> to vector<8x8x16xf32>
    %cst_90 = arith.constant dense<0.000000e+00> : vector<8x16xf32>
    %110 = vector.multi_reduction <add>, %109, %cst_90 [0] : vector<8x8x16xf32> to vector<8x16xf32>
    %111 = vector.shape_cast %110 : vector<8x16xf32> to vector<1x8x16xf32>
    %112 = arith.addf %98, %111 : vector<1x8x16xf32>
    %c0_91 = arith.constant 0 : index
    %c0_92 = arith.constant 0 : index
    %c2_93 = arith.constant 2 : index
    %c0_94 = arith.constant 0 : index
    %113 = vector.load %arg3[%c0_91, %c0_92, %c2_93, %c0_94] : memref<1x8x10x18xf32, #tpu.memory_space<vmem>>, vector<1x8x8x16xf32>
    %114 = vector.shape_cast %113 : vector<1x8x8x16xf32> to vector<8x8x16xf32>
    %115 = vector.broadcast %27 : vector<1x8x16xf32> to vector<8x8x16xf32>
    %116 = arith.cmpf oge, %114, %115 : vector<8x8x16xf32>
    %c0_95 = arith.constant 0 : index
    %c0_96 = arith.constant 0 : index
    %c2_97 = arith.constant 2 : index
    %c0_98 = arith.constant 0 : index
    %117 = vector.load %arg4[%c0_95, %c0_96, %c2_97, %c0_98] : memref<1x8x10x18xf32, #tpu.memory_space<vmem>>, vector<1x8x8x16xf32>
    %118 = vector.shape_cast %117 : vector<1x8x8x16xf32> to vector<8x8x16xf32>
    %119 = vector.broadcast %26 : vector<1x8x16xf32> to vector<8x8x16xf32>
    %120 = arith.cmpf oge, %118, %119 : vector<8x8x16xf32>
    %121 = arith.xori %116, %120 : vector<8x8x16xi1>
    %122 = arith.extui %121 : vector<8x8x16xi1> to vector<8x8x16xi32>
    %123 = arith.sitofp %122 : vector<8x8x16xi32> to vector<8x8x16xf32>
    %cst_99 = arith.constant dense<0.000000e+00> : vector<8x16xf32>
    %124 = vector.multi_reduction <add>, %123, %cst_99 [0] : vector<8x8x16xf32> to vector<8x16xf32>
    %125 = vector.shape_cast %124 : vector<8x16xf32> to vector<1x8x16xf32>
    %126 = arith.addf %112, %125 : vector<1x8x16xf32>
    %c0_100 = arith.constant 0 : index
    %c0_101 = arith.constant 0 : index
    %c2_102 = arith.constant 2 : index
    %c1_103 = arith.constant 1 : index
    %127 = vector.load %arg3[%c0_100, %c0_101, %c2_102, %c1_103] : memref<1x8x10x18xf32, #tpu.memory_space<vmem>>, vector<1x8x8x16xf32>
    %128 = vector.shape_cast %127 : vector<1x8x8x16xf32> to vector<8x8x16xf32>
    %129 = vector.broadcast %27 : vector<1x8x16xf32> to vector<8x8x16xf32>
    %130 = arith.cmpf oge, %128, %129 : vector<8x8x16xf32>
    %c0_104 = arith.constant 0 : index
    %c0_105 = arith.constant 0 : index
    %c2_106 = arith.constant 2 : index
    %c1_107 = arith.constant 1 : index
    %131 = vector.load %arg4[%c0_104, %c0_105, %c2_106, %c1_107] : memref<1x8x10x18xf32, #tpu.memory_space<vmem>>, vector<1x8x8x16xf32>
    %132 = vector.shape_cast %131 : vector<1x8x8x16xf32> to vector<8x8x16xf32>
    %133 = vector.broadcast %26 : vector<1x8x16xf32> to vector<8x8x16xf32>
    %134 = arith.cmpf oge, %132, %133 : vector<8x8x16xf32>
    %135 = arith.xori %130, %134 : vector<8x8x16xi1>
    %136 = arith.extui %135 : vector<8x8x16xi1> to vector<8x8x16xi32>
    %137 = arith.sitofp %136 : vector<8x8x16xi32> to vector<8x8x16xf32>
    %cst_108 = arith.constant dense<0.000000e+00> : vector<8x16xf32>
    %138 = vector.multi_reduction <add>, %137, %cst_108 [0] : vector<8x8x16xf32> to vector<8x16xf32>
    %139 = vector.shape_cast %138 : vector<8x16xf32> to vector<1x8x16xf32>
    %140 = arith.addf %126, %139 : vector<1x8x16xf32>
    %c0_109 = arith.constant 0 : index
    %c0_110 = arith.constant 0 : index
    %c2_111 = arith.constant 2 : index
    %c2_112 = arith.constant 2 : index
    %141 = vector.load %arg3[%c0_109, %c0_110, %c2_111, %c2_112] : memref<1x8x10x18xf32, #tpu.memory_space<vmem>>, vector<1x8x8x16xf32>
    %142 = vector.shape_cast %141 : vector<1x8x8x16xf32> to vector<8x8x16xf32>
    %143 = vector.broadcast %27 : vector<1x8x16xf32> to vector<8x8x16xf32>
    %144 = arith.cmpf oge, %142, %143 : vector<8x8x16xf32>
    %c0_113 = arith.constant 0 : index
    %c0_114 = arith.constant 0 : index
    %c2_115 = arith.constant 2 : index
    %c2_116 = arith.constant 2 : index
    %145 = vector.load %arg4[%c0_113, %c0_114, %c2_115, %c2_116] : memref<1x8x10x18xf32, #tpu.memory_space<vmem>>, vector<1x8x8x16xf32>
    %146 = vector.shape_cast %145 : vector<1x8x8x16xf32> to vector<8x8x16xf32>
    %147 = vector.broadcast %26 : vector<1x8x16xf32> to vector<8x8x16xf32>
    %148 = arith.cmpf oge, %146, %147 : vector<8x8x16xf32>
    %149 = arith.xori %144, %148 : vector<8x8x16xi1>
    %150 = arith.extui %149 : vector<8x8x16xi1> to vector<8x8x16xi32>
    %151 = arith.sitofp %150 : vector<8x8x16xi32> to vector<8x8x16xf32>
    %cst_117 = arith.constant dense<0.000000e+00> : vector<8x16xf32>
    %152 = vector.multi_reduction <add>, %151, %cst_117 [0] : vector<8x8x16xf32> to vector<8x16xf32>
    %153 = vector.shape_cast %152 : vector<8x16xf32> to vector<1x8x16xf32>
    %154 = arith.addf %140, %153 : vector<1x8x16xf32>
    %cst_118 = arith.constant 7.200000e+01 : f32
    %155 = vector.broadcast %cst_118 : f32 to vector<1x8x16xf32>
    %156 = arith.subf %155, %154 : vector<1x8x16xf32>
    %c0_119 = arith.constant 0 : index
    %c0_120 = arith.constant 0 : index
    %c0_121 = arith.constant 0 : index
    %157 = vector.load %arg10[%c0_119, %c0_120, %c0_121] : memref<1x8x16xf32, #tpu.memory_space<vmem>>, vector<1x8x16xf32>
    %158 = arith.maximumf %157, %156 : vector<1x8x16xf32>
    %159 = arith.subf %157, %158 : vector<1x8x16xf32>
    %160 = math.exp %159 : vector<1x8x16xf32>
    %161 = arith.subf %156, %158 : vector<1x8x16xf32>
    %162 = math.exp %161 : vector<1x8x16xf32>
    %c0_122 = arith.constant 0 : index
    %c0_123 = arith.constant 0 : index
    %c0_124 = arith.constant 0 : index
    %163 = vector.load %arg11[%c0_122, %c0_123, %c0_124] : memref<1x8x16xf32, #tpu.memory_space<vmem>>, vector<1x8x16xf32>
    %164 = arith.mulf %160, %163 : vector<1x8x16xf32>
    %165 = arith.addf %164, %162 : vector<1x8x16xf32>
    %c0_125 = arith.constant 0 : index
    %c0_126 = arith.constant 0 : index
    %c0_127 = arith.constant 0 : index
    %166 = vector.load %arg11[%c0_125, %c0_126, %c0_127] : memref<1x8x16xf32, #tpu.memory_space<vmem>>, vector<1x8x16xf32>
    tpu.vector_store %arg11[%c0_125, %c0_126, %c0_127], %165 {strides = array<i32>} : memref<1x8x16xf32, #tpu.memory_space<vmem>>, vector<1x8x16xf32>,
    %c0_128 = arith.constant 0 : index
    %c0_129 = arith.constant 0 : index
    %c0_130 = arith.constant 0 : index
    %167 = vector.load %arg12[%c0_128, %c0_129, %c0_130] : memref<8x8x16xf32, #tpu.memory_space<vmem>>, vector<8x8x16xf32>
    %168 = vector.broadcast %160 : vector<1x8x16xf32> to vector<8x8x16xf32>
    %169 = arith.mulf %168, %167 : vector<8x8x16xf32>
    %c0_131 = arith.constant 0 : index
    %c0_132 = arith.constant 0 : index
    %c1_133 = arith.constant 1 : index
    %c1_134 = arith.constant 1 : index
    %170 = vector.load %arg4[%c0_131, %c0_132, %c1_133, %c1_134] : memref<1x8x10x18xf32, #tpu.memory_space<vmem>>, vector<1x8x8x16xf32>
    %171 = vector.shape_cast %170 : vector<1x8x8x16xf32> to vector<8x8x16xf32>
    %172 = vector.broadcast %162 : vector<1x8x16xf32> to vector<8x8x16xf32>
    %173 = arith.mulf %172, %171 : vector<8x8x16xf32>
    %174 = arith.addf %169, %173 : vector<8x8x16xf32>
    %c0_135 = arith.constant 0 : index
    %c0_136 = arith.constant 0 : index
    %c0_137 = arith.constant 0 : index
    %175 = vector.load %arg12[%c0_135, %c0_136, %c0_137] : memref<8x8x16xf32, #tpu.memory_space<vmem>>, vector<8x8x16xf32>
    tpu.vector_store %arg12[%c0_135, %c0_136, %c0_137], %174 {strides = array<i32>} : memref<8x8x16xf32, #tpu.memory_space<vmem>>, vector<8x8x16xf32>,
    %c0_138 = arith.constant 0 : index
    %c0_139 = arith.constant 0 : index
    %c0_140 = arith.constant 0 : index
    %176 = vector.load %arg10[%c0_138, %c0_139, %c0_140] : memref<1x8x16xf32, #tpu.memory_space<vmem>>, vector<1x8x16xf32>
    tpu.vector_store %arg10[%c0_138, %c0_139, %c0_140], %158 {strides = array<i32>} : memref<1x8x16xf32, #tpu.memory_space<vmem>>, vector<1x8x16xf32>,
    %c1_i32 = arith.constant 1 : i32
    %177 = arith.cmpi eq, %arg2, %c1_i32 : i32
    %178 = arith.extui %177 : i1 to i32
    %c0_i32_141 = arith.constant 0 : i32
    %179 = arith.cmpi ne, %178, %c0_i32_141 : i32
    scf.if %179 {
      %c0_142 = arith.constant 0 : index
      %c0_143 = arith.constant 0 : index
      %180 = vector.load %arg5[%c0_142, %c0_143] : memref<8x8xf32, #tpu.memory_space<vmem>>, vector<8x8xf32>
      %c0_144 = arith.constant 0 : index
      %c0_145 = arith.constant 0 : index
      %181 = vector.load %arg6[%c0_144, %c0_145] : memref<8x1xf32, #tpu.memory_space<vmem>>, vector<8x1xf32>
      %c0_146 = arith.constant 0 : index
      %c0_147 = arith.constant 0 : index
      %c0_148 = arith.constant 0 : index
      %182 = vector.load %arg11[%c0_146, %c0_147, %c0_148] : memref<1x8x16xf32, #tpu.memory_space<vmem>>, vector<1x1x16xf32>
      %183 = vector.shape_cast %182 : vector<1x1x16xf32> to vector<1x16xf32>
      %184 = tpu.reciprocal %183 {approx = true} : vector<1x16xf32> -> vector<1x16xf32>
      %c0_149 = arith.constant 0 : index
      %c0_150 = arith.constant 0 : index
      %c0_151 = arith.constant 0 : index
      %185 = vector.load %arg12[%c0_149, %c0_150, %c0_151] : memref<8x8x16xf32, #tpu.memory_space<vmem>>, vector<8x1x16xf32>
      %186 = vector.shape_cast %185 : vector<8x1x16xf32> to vector<8x16xf32>
      %187 = vector.broadcast %184 : vector<1x16xf32> to vector<8x16xf32>
      %188 = arith.mulf %186, %187 : vector<8x16xf32>
      %c0_152 = arith.constant 0 : index
      %c0_153 = arith.constant 0 : index
      %c1_154 = arith.constant 1 : index
      %c1_155 = arith.constant 1 : index
      %189 = vector.load %arg3[%c0_152, %c0_153, %c1_154, %c1_155] : memref<1x8x10x18xf32, #tpu.memory_space<vmem>>, vector<1x8x1x16xf32>
      %190 = vector.shape_cast %189 : vector<1x8x1x16xf32> to vector<8x16xf32>
      %191 = arith.addf %188, %190 : vector<8x16xf32>
      %cst_156 = arith.constant dense<0.000000e+00> : vector<8x16xf32>
      %192 = tpu.matmul %180, %191, %cst_156 {dimension_numbers = #tpu.dot_dimension_numbers<[1], [0], [0], [1], [0, 0, 1, 1], [], []>} : vector<8x8xf32>, vector<8x16xf32>, vector<8x16xf32> -> vector<8x16xf32>
      %193 = vector.broadcast %181 : vector<8x1xf32> to vector<8x16xf32>
      %194 = arith.addf %192, %193 : vector<8x16xf32>
      %c0_157 = arith.constant 0 : index
      %c0_158 = arith.constant 0 : index
      %c0_159 = arith.constant 0 : index
      %c0_160 = arith.constant 0 : index
      %195 = vector.load %arg7[%c0_157, %c0_158, %c0_159, %c0_160] : memref<1x8x8x16xf32, #tpu.memory_space<vmem>>, vector<1x8x1x16xf32>
      %196 = vector.shape_cast %195 : vector<1x8x1x16xf32> to vector<8x16xf32>
      %197 = vector.shape_cast %194 : vector<8x16xf32> to vector<1x8x1x16xf32>
      tpu.vector_store %arg7[%c0_157, %c0_158, %c0_159, %c0_160], %197 {strides = array<i32>} : memref<1x8x8x16xf32, #tpu.memory_space<vmem>>, vector<1x8x1x16xf32>,
      %c0_161 = arith.constant 0 : index
      %c1_162 = arith.constant 1 : index
      %c0_163 = arith.constant 0 : index
      %198 = vector.load %arg11[%c0_161, %c1_162, %c0_163] : memref<1x8x16xf32, #tpu.memory_space<vmem>>, vector<1x1x16xf32>
      %199 = vector.shape_cast %198 : vector<1x1x16xf32> to vector<1x16xf32>
      %200 = tpu.reciprocal %199 {approx = true} : vector<1x16xf32> -> vector<1x16xf32>
      %c0_164 = arith.constant 0 : index
      %c1_165 = arith.constant 1 : index
      %c0_166 = arith.constant 0 : index
      %201 = vector.load %arg12[%c0_164, %c1_165, %c0_166] : memref<8x8x16xf32, #tpu.memory_space<vmem>>, vector<8x1x16xf32>
      %202 = vector.shape_cast %201 : vector<8x1x16xf32> to vector<8x16xf32>
      %203 = vector.broadcast %200 : vector<1x16xf32> to vector<8x16xf32>
      %204 = arith.mulf %202, %203 : vector<8x16xf32>
      %c0_167 = arith.constant 0 : index
      %c0_168 = arith.constant 0 : index
      %c2_169 = arith.constant 2 : index
      %c1_170 = arith.constant 1 : index
      %205 = vector.load %arg3[%c0_167, %c0_168, %c2_169, %c1_170] : memref<1x8x10x18xf32, #tpu.memory_space<vmem>>, vector<1x8x1x16xf32>
      %206 = vector.shape_cast %205 : vector<1x8x1x16xf32> to vector<8x16xf32>
      %207 = arith.addf %204, %206 : vector<8x16xf32>
      %cst_171 = arith.constant dense<0.000000e+00> : vector<8x16xf32>
      %208 = tpu.matmul %180, %207, %cst_171 {dimension_numbers = #tpu.dot_dimension_numbers<[1], [0], [0], [1], [0, 0, 1, 1], [], []>} : vector<8x8xf32>, vector<8x16xf32>, vector<8x16xf32> -> vector<8x16xf32>
      %209 = vector.broadcast %181 : vector<8x1xf32> to vector<8x16xf32>
      %210 = arith.addf %208, %209 : vector<8x16xf32>
      %c0_172 = arith.constant 0 : index
      %c0_173 = arith.constant 0 : index
      %c1_174 = arith.constant 1 : index
      %c0_175 = arith.constant 0 : index
      %211 = vector.load %arg7[%c0_172, %c0_173, %c1_174, %c0_175] : memref<1x8x8x16xf32, #tpu.memory_space<vmem>>, vector<1x8x1x16xf32>
      %212 = vector.shape_cast %211 : vector<1x8x1x16xf32> to vector<8x16xf32>
      %213 = vector.shape_cast %210 : vector<8x16xf32> to vector<1x8x1x16xf32>
      tpu.vector_store %arg7[%c0_172, %c0_173, %c1_174, %c0_175], %213 {strides = array<i32>} : memref<1x8x8x16xf32, #tpu.memory_space<vmem>>, vector<1x8x1x16xf32>,
      %c0_176 = arith.constant 0 : index
      %c2_177 = arith.constant 2 : index
      %c0_178 = arith.constant 0 : index
      %214 = vector.load %arg11[%c0_176, %c2_177, %c0_178] : memref<1x8x16xf32, #tpu.memory_space<vmem>>, vector<1x1x16xf32>
      %215 = vector.shape_cast %214 : vector<1x1x16xf32> to vector<1x16xf32>
      %216 = tpu.reciprocal %215 {approx = true} : vector<1x16xf32> -> vector<1x16xf32>
      %c0_179 = arith.constant 0 : index
      %c2_180 = arith.constant 2 : index
      %c0_181 = arith.constant 0 : index
      %217 = vector.load %arg12[%c0_179, %c2_180, %c0_181] : memref<8x8x16xf32, #tpu.memory_space<vmem>>, vector<8x1x16xf32>
      %218 = vector.shape_cast %217 : vector<8x1x16xf32> to vector<8x16xf32>
      %219 = vector.broadcast %216 : vector<1x16xf32> to vector<8x16xf32>
      %220 = arith.mulf %218, %219 : vector<8x16xf32>
      %c0_182 = arith.constant 0 : index
      %c0_183 = arith.constant 0 : index
      %c3 = arith.constant 3 : index
      %c1_184 = arith.constant 1 : index
      %221 = vector.load %arg3[%c0_182, %c0_183, %c3, %c1_184] : memref<1x8x10x18xf32, #tpu.memory_space<vmem>>, vector<1x8x1x16xf32>
      %222 = vector.shape_cast %221 : vector<1x8x1x16xf32> to vector<8x16xf32>
      %223 = arith.addf %220, %222 : vector<8x16xf32>
      %cst_185 = arith.constant dense<0.000000e+00> : vector<8x16xf32>
      %224 = tpu.matmul %180, %223, %cst_185 {dimension_numbers = #tpu.dot_dimension_numbers<[1], [0], [0], [1], [0, 0, 1, 1], [], []>} : vector<8x8xf32>, vector<8x16xf32>, vector<8x16xf32> -> vector<8x16xf32>
      %225 = vector.broadcast %181 : vector<8x1xf32> to vector<8x16xf32>
      %226 = arith.addf %224, %225 : vector<8x16xf32>
      %c0_186 = arith.constant 0 : index
      %c0_187 = arith.constant 0 : index
      %c2_188 = arith.constant 2 : index
      %c0_189 = arith.constant 0 : index
      %227 = vector.load %arg7[%c0_186, %c0_187, %c2_188, %c0_189] : memref<1x8x8x16xf32, #tpu.memory_space<vmem>>, vector<1x8x1x16xf32>
      %228 = vector.shape_cast %227 : vector<1x8x1x16xf32> to vector<8x16xf32>
      %229 = vector.shape_cast %226 : vector<8x16xf32> to vector<1x8x1x16xf32>
      tpu.vector_store %arg7[%c0_186, %c0_187, %c2_188, %c0_189], %229 {strides = array<i32>} : memref<1x8x8x16xf32, #tpu.memory_space<vmem>>, vector<1x8x1x16xf32>,
      %c0_190 = arith.constant 0 : index
      %c3_191 = arith.constant 3 : index
      %c0_192 = arith.constant 0 : index
      %230 = vector.load %arg11[%c0_190, %c3_191, %c0_192] : memref<1x8x16xf32, #tpu.memory_space<vmem>>, vector<1x1x16xf32>
      %231 = vector.shape_cast %230 : vector<1x1x16xf32> to vector<1x16xf32>
      %232 = tpu.reciprocal %231 {approx = true} : vector<1x16xf32> -> vector<1x16xf32>
      %c0_193 = arith.constant 0 : index
      %c3_194 = arith.constant 3 : index
      %c0_195 = arith.constant 0 : index
      %233 = vector.load %arg12[%c0_193, %c3_194, %c0_195] : memref<8x8x16xf32, #tpu.memory_space<vmem>>, vector<8x1x16xf32>
      %234 = vector.shape_cast %233 : vector<8x1x16xf32> to vector<8x16xf32>
      %235 = vector.broadcast %232 : vector<1x16xf32> to vector<8x16xf32>
      %236 = arith.mulf %234, %235 : vector<8x16xf32>
      %c0_196 = arith.constant 0 : index
      %c0_197 = arith.constant 0 : index
      %c4 = arith.constant 4 : index
      %c1_198 = arith.constant 1 : index
      %237 = vector.load %arg3[%c0_196, %c0_197, %c4, %c1_198] : memref<1x8x10x18xf32, #tpu.memory_space<vmem>>, vector<1x8x1x16xf32>
      %238 = vector.shape_cast %237 : vector<1x8x1x16xf32> to vector<8x16xf32>
      %239 = arith.addf %236, %238 : vector<8x16xf32>
      %cst_199 = arith.constant dense<0.000000e+00> : vector<8x16xf32>
      %240 = tpu.matmul %180, %239, %cst_199 {dimension_numbers = #tpu.dot_dimension_numbers<[1], [0], [0], [1], [0, 0, 1, 1], [], []>} : vector<8x8xf32>, vector<8x16xf32>, vector<8x16xf32> -> vector<8x16xf32>
      %241 = vector.broadcast %181 : vector<8x1xf32> to vector<8x16xf32>
      %242 = arith.addf %240, %241 : vector<8x16xf32>
      %c0_200 = arith.constant 0 : index
      %c0_201 = arith.constant 0 : index
      %c3_202 = arith.constant 3 : index
      %c0_203 = arith.constant 0 : index
      %243 = vector.load %arg7[%c0_200, %c0_201, %c3_202, %c0_203] : memref<1x8x8x16xf32, #tpu.memory_space<vmem>>, vector<1x8x1x16xf32>
      %244 = vector.shape_cast %243 : vector<1x8x1x16xf32> to vector<8x16xf32>
      %245 = vector.shape_cast %242 : vector<8x16xf32> to vector<1x8x1x16xf32>
      tpu.vector_store %arg7[%c0_200, %c0_201, %c3_202, %c0_203], %245 {strides = array<i32>} : memref<1x8x8x16xf32, #tpu.memory_space<vmem>>, vector<1x8x1x16xf32>,
      %c0_204 = arith.constant 0 : index
      %c4_205 = arith.constant 4 : index
      %c0_206 = arith.constant 0 : index
      %246 = vector.load %arg11[%c0_204, %c4_205, %c0_206] : memref<1x8x16xf32, #tpu.memory_space<vmem>>, vector<1x1x16xf32>
      %247 = vector.shape_cast %246 : vector<1x1x16xf32> to vector<1x16xf32>
      %248 = tpu.reciprocal %247 {approx = true} : vector<1x16xf32> -> vector<1x16xf32>
      %c0_207 = arith.constant 0 : index
      %c4_208 = arith.constant 4 : index
      %c0_209 = arith.constant 0 : index
      %249 = vector.load %arg12[%c0_207, %c4_208, %c0_209] : memref<8x8x16xf32, #tpu.memory_space<vmem>>, vector<8x1x16xf32>
      %250 = vector.shape_cast %249 : vector<8x1x16xf32> to vector<8x16xf32>
      %251 = vector.broadcast %248 : vector<1x16xf32> to vector<8x16xf32>
      %252 = arith.mulf %250, %251 : vector<8x16xf32>
      %c0_210 = arith.constant 0 : index
      %c0_211 = arith.constant 0 : index
      %c5 = arith.constant 5 : index
      %c1_212 = arith.constant 1 : index
      %253 = vector.load %arg3[%c0_210, %c0_211, %c5, %c1_212] : memref<1x8x10x18xf32, #tpu.memory_space<vmem>>, vector<1x8x1x16xf32>
      %254 = vector.shape_cast %253 : vector<1x8x1x16xf32> to vector<8x16xf32>
      %255 = arith.addf %252, %254 : vector<8x16xf32>
      %cst_213 = arith.constant dense<0.000000e+00> : vector<8x16xf32>
      %256 = tpu.matmul %180, %255, %cst_213 {dimension_numbers = #tpu.dot_dimension_numbers<[1], [0], [0], [1], [0, 0, 1, 1], [], []>} : vector<8x8xf32>, vector<8x16xf32>, vector<8x16xf32> -> vector<8x16xf32>
      %257 = vector.broadcast %181 : vector<8x1xf32> to vector<8x16xf32>
      %258 = arith.addf %256, %257 : vector<8x16xf32>
      %c0_214 = arith.constant 0 : index
      %c0_215 = arith.constant 0 : index
      %c4_216 = arith.constant 4 : index
      %c0_217 = arith.constant 0 : index
      %259 = vector.load %arg7[%c0_214, %c0_215, %c4_216, %c0_217] : memref<1x8x8x16xf32, #tpu.memory_space<vmem>>, vector<1x8x1x16xf32>
      %260 = vector.shape_cast %259 : vector<1x8x1x16xf32> to vector<8x16xf32>
      %261 = vector.shape_cast %258 : vector<8x16xf32> to vector<1x8x1x16xf32>
      tpu.vector_store %arg7[%c0_214, %c0_215, %c4_216, %c0_217], %261 {strides = array<i32>} : memref<1x8x8x16xf32, #tpu.memory_space<vmem>>, vector<1x8x1x16xf32>,
      %c0_218 = arith.constant 0 : index
      %c5_219 = arith.constant 5 : index
      %c0_220 = arith.constant 0 : index
      %262 = vector.load %arg11[%c0_218, %c5_219, %c0_220] : memref<1x8x16xf32, #tpu.memory_space<vmem>>, vector<1x1x16xf32>
      %263 = vector.shape_cast %262 : vector<1x1x16xf32> to vector<1x16xf32>
      %264 = tpu.reciprocal %263 {approx = true} : vector<1x16xf32> -> vector<1x16xf32>
      %c0_221 = arith.constant 0 : index
      %c5_222 = arith.constant 5 : index
      %c0_223 = arith.constant 0 : index
      %265 = vector.load %arg12[%c0_221, %c5_222, %c0_223] : memref<8x8x16xf32, #tpu.memory_space<vmem>>, vector<8x1x16xf32>
      %266 = vector.shape_cast %265 : vector<8x1x16xf32> to vector<8x16xf32>
      %267 = vector.broadcast %264 : vector<1x16xf32> to vector<8x16xf32>
      %268 = arith.mulf %266, %267 : vector<8x16xf32>
      %c0_224 = arith.constant 0 : index
      %c0_225 = arith.constant 0 : index
      %c6 = arith.constant 6 : index
      %c1_226 = arith.constant 1 : index
      %269 = vector.load %arg3[%c0_224, %c0_225, %c6, %c1_226] : memref<1x8x10x18xf32, #tpu.memory_space<vmem>>, vector<1x8x1x16xf32>
      %270 = vector.shape_cast %269 : vector<1x8x1x16xf32> to vector<8x16xf32>
      %271 = arith.addf %268, %270 : vector<8x16xf32>
      %cst_227 = arith.constant dense<0.000000e+00> : vector<8x16xf32>
      %272 = tpu.matmul %180, %271, %cst_227 {dimension_numbers = #tpu.dot_dimension_numbers<[1], [0], [0], [1], [0, 0, 1, 1], [], []>} : vector<8x8xf32>, vector<8x16xf32>, vector<8x16xf32> -> vector<8x16xf32>
      %273 = vector.broadcast %181 : vector<8x1xf32> to vector<8x16xf32>
      %274 = arith.addf %272, %273 : vector<8x16xf32>
      %c0_228 = arith.constant 0 : index
      %c0_229 = arith.constant 0 : index
      %c5_230 = arith.constant 5 : index
      %c0_231 = arith.constant 0 : index
      %275 = vector.load %arg7[%c0_228, %c0_229, %c5_230, %c0_231] : memref<1x8x8x16xf32, #tpu.memory_space<vmem>>, vector<1x8x1x16xf32>
      %276 = vector.shape_cast %275 : vector<1x8x1x16xf32> to vector<8x16xf32>
      %277 = vector.shape_cast %274 : vector<8x16xf32> to vector<1x8x1x16xf32>
      tpu.vector_store %arg7[%c0_228, %c0_229, %c5_230, %c0_231], %277 {strides = array<i32>} : memref<1x8x8x16xf32, #tpu.memory_space<vmem>>, vector<1x8x1x16xf32>,
      %c0_232 = arith.constant 0 : index
      %c6_233 = arith.constant 6 : index
      %c0_234 = arith.constant 0 : index
      %278 = vector.load %arg11[%c0_232, %c6_233, %c0_234] : memref<1x8x16xf32, #tpu.memory_space<vmem>>, vector<1x1x16xf32>
      %279 = vector.shape_cast %278 : vector<1x1x16xf32> to vector<1x16xf32>
      %280 = tpu.reciprocal %279 {approx = true} : vector<1x16xf32> -> vector<1x16xf32>
      %c0_235 = arith.constant 0 : index
      %c6_236 = arith.constant 6 : index
      %c0_237 = arith.constant 0 : index
      %281 = vector.load %arg12[%c0_235, %c6_236, %c0_237] : memref<8x8x16xf32, #tpu.memory_space<vmem>>, vector<8x1x16xf32>
      %282 = vector.shape_cast %281 : vector<8x1x16xf32> to vector<8x16xf32>
      %283 = vector.broadcast %280 : vector<1x16xf32> to vector<8x16xf32>
      %284 = arith.mulf %282, %283 : vector<8x16xf32>
      %c0_238 = arith.constant 0 : index
      %c0_239 = arith.constant 0 : index
      %c7 = arith.constant 7 : index
      %c1_240 = arith.constant 1 : index
      %285 = vector.load %arg3[%c0_238, %c0_239, %c7, %c1_240] : memref<1x8x10x18xf32, #tpu.memory_space<vmem>>, vector<1x8x1x16xf32>
      %286 = vector.shape_cast %285 : vector<1x8x1x16xf32> to vector<8x16xf32>
      %287 = arith.addf %284, %286 : vector<8x16xf32>
      %cst_241 = arith.constant dense<0.000000e+00> : vector<8x16xf32>
      %288 = tpu.matmul %180, %287, %cst_241 {dimension_numbers = #tpu.dot_dimension_numbers<[1], [0], [0], [1], [0, 0, 1, 1], [], []>} : vector<8x8xf32>, vector<8x16xf32>, vector<8x16xf32> -> vector<8x16xf32>
      %289 = vector.broadcast %181 : vector<8x1xf32> to vector<8x16xf32>
      %290 = arith.addf %288, %289 : vector<8x16xf32>
      %c0_242 = arith.constant 0 : index
      %c0_243 = arith.constant 0 : index
      %c6_244 = arith.constant 6 : index
      %c0_245 = arith.constant 0 : index
      %291 = vector.load %arg7[%c0_242, %c0_243, %c6_244, %c0_245] : memref<1x8x8x16xf32, #tpu.memory_space<vmem>>, vector<1x8x1x16xf32>
      %292 = vector.shape_cast %291 : vector<1x8x1x16xf32> to vector<8x16xf32>
      %293 = vector.shape_cast %290 : vector<8x16xf32> to vector<1x8x1x16xf32>
      tpu.vector_store %arg7[%c0_242, %c0_243, %c6_244, %c0_245], %293 {strides = array<i32>} : memref<1x8x8x16xf32, #tpu.memory_space<vmem>>, vector<1x8x1x16xf32>,
      %c0_246 = arith.constant 0 : index
      %c7_247 = arith.constant 7 : index
      %c0_248 = arith.constant 0 : index
      %294 = vector.load %arg11[%c0_246, %c7_247, %c0_248] : memref<1x8x16xf32, #tpu.memory_space<vmem>>, vector<1x1x16xf32>
      %295 = vector.shape_cast %294 : vector<1x1x16xf32> to vector<1x16xf32>
      %296 = tpu.reciprocal %295 {approx = true} : vector<1x16xf32> -> vector<1x16xf32>
      %c0_249 = arith.constant 0 : index
      %c7_250 = arith.constant 7 : index
      %c0_251 = arith.constant 0 : index
      %297 = vector.load %arg12[%c0_249, %c7_250, %c0_251] : memref<8x8x16xf32, #tpu.memory_space<vmem>>, vector<8x1x16xf32>
      %298 = vector.shape_cast %297 : vector<8x1x16xf32> to vector<8x16xf32>
      %299 = vector.broadcast %296 : vector<1x16xf32> to vector<8x16xf32>
      %300 = arith.mulf %298, %299 : vector<8x16xf32>
      %c0_252 = arith.constant 0 : index
      %c0_253 = arith.constant 0 : index
      %c8 = arith.constant 8 : index
      %c1_254 = arith.constant 1 : index
      %301 = vector.load %arg3[%c0_252, %c0_253, %c8, %c1_254] : memref<1x8x10x18xf32, #tpu.memory_space<vmem>>, vector<1x8x1x16xf32>
      %302 = vector.shape_cast %301 : vector<1x8x1x16xf32> to vector<8x16xf32>
      %303 = arith.addf %300, %302 : vector<8x16xf32>
      %cst_255 = arith.constant dense<0.000000e+00> : vector<8x16xf32>
      %304 = tpu.matmul %180, %303, %cst_255 {dimension_numbers = #tpu.dot_dimension_numbers<[1], [0], [0], [1], [0, 0, 1, 1], [], []>} : vector<8x8xf32>, vector<8x16xf32>, vector<8x16xf32> -> vector<8x16xf32>
      %305 = vector.broadcast %181 : vector<8x1xf32> to vector<8x16xf32>
      %306 = arith.addf %304, %305 : vector<8x16xf32>
      %c0_256 = arith.constant 0 : index
      %c0_257 = arith.constant 0 : index
      %c7_258 = arith.constant 7 : index
      %c0_259 = arith.constant 0 : index
      %307 = vector.load %arg7[%c0_256, %c0_257, %c7_258, %c0_259] : memref<1x8x8x16xf32, #tpu.memory_space<vmem>>, vector<1x8x1x16xf32>
      %308 = vector.shape_cast %307 : vector<1x8x1x16xf32> to vector<8x16xf32>
      %309 = vector.shape_cast %306 : vector<8x16xf32> to vector<1x8x1x16xf32>
      tpu.vector_store %arg7[%c0_256, %c0_257, %c7_258, %c0_259], %309 {strides = array<i32>} : memref<1x8x8x16xf32, #tpu.memory_space<vmem>>, vector<1x8x1x16xf32>,
    } else {
    }
    return
  }
  func.func @transform_0(%arg0: i32, %arg1: i32, %arg2: i32) -> (i32, i32, i32, i32) {
    %c2_i32 = arith.constant 2 : i32
    %0 = arith.muli %arg0, %c2_i32 : i32
    %1 = arith.addi %0, %arg1 : i32
    %c0_i32 = arith.constant 0 : i32
    %c0_i32_0 = arith.constant 0 : i32
    %c0_i32_1 = arith.constant 0 : i32
    %c0_i32_2 = arith.constant 0 : i32
    return %1, %c0_i32, %c0_i32_0, %c0_i32_1 : i32, i32, i32, i32
  }
  func.func @transform_1(%arg0: i32, %arg1: i32, %arg2: i32) -> (i32, i32, i32, i32) {
    %c2_i32 = arith.constant 2 : i32
    %0 = arith.muli %arg0, %c2_i32 : i32
    %1 = arith.addi %0, %arg2 : i32
    %c2_i32_0 = arith.constant 2 : i32
    %2 = arith.muli %1, %c2_i32_0 : i32
    %3 = arith.addi %2, %arg1 : i32
    %c0_i32 = arith.constant 0 : i32
    %c0_i32_1 = arith.constant 0 : i32
    %c0_i32_2 = arith.constant 0 : i32
    %c0_i32_3 = arith.constant 0 : i32
    return %3, %c0_i32, %c0_i32_1, %c0_i32_2 : i32, i32, i32, i32
  }
  func.func @transform_2(%arg0: i32, %arg1: i32, %arg2: i32) -> (i32, i32) {
    %c0_i32 = arith.constant 0 : i32
    %c0_i32_0 = arith.constant 0 : i32
    %c0_i32_1 = arith.constant 0 : i32
    return %c0_i32, %c0_i32_0 : i32, i32
  }
  func.func @transform_3(%arg0: i32, %arg1: i32, %arg2: i32) -> (i32, i32) {
    %c0_i32 = arith.constant 0 : i32
    %c0_i32_0 = arith.constant 0 : i32
    %c0_i32_1 = arith.constant 0 : i32
    return %c0_i32, %c0_i32_0 : i32, i32
  }
  func.func @transform_4(%arg0: i32, %arg1: i32, %arg2: i32) -> (i32, i32, i32, i32) {
    %c0_i32 = arith.constant 0 : i32
    %c0_i32_0 = arith.constant 0 : i32
    %c0_i32_1 = arith.constant 0 : i32
    return %arg0, %c0_i32, %arg1, %c0_i32_0 : i32, i32, i32, i32
  }
}

</mosaic_0001>

<bundles_post_ra>
// kernel: tpu_custom_call.1
= control target key start
LH: loop header
LB: loop body
LE: loop exit
PB: predicated region body
PF: predicated region fallthrough
CT: control target
= control target key end

     0   :  { %9 = vsyncpa [#allocation8], 0  ;;  %s5587_s0 = inlined_call_operand.vmem [shape: f32[4,8,10,18], index: 0, kind: input, shape index: {}]   ;;  %s5588_s1 = inlined_call_operand.vmem [shape: f32[8,8,10,18], index: 1, kind: input, shape index: {}]   ;;  %s5589_s2 = inlined_call_operand.vmem [shape: f32[8,8], index: 2, kind: input, shape index: {}]   ;;  %s5590_s3 = inlined_call_operand.vmem [shape: f32[8,1], index: 3, kind: input, shape index: {}]   ;;  %s5591_s4 = inlined_call_operand.hbm [shape: f32[2,8,16,16], index: 4, kind: output, shape index: {}]  }
   0x1   :  { %11 = vsyncpa [#allocation8 + $0x1], 0  ;;  %s3554_s15 = smov 0   ;;  %s3556_s16 = smov 0  }
   0x2   :  { %s3558_s17 = smov 0   ;;  %s3560_s18 = smov 0  }
   0x3   :  { %s3562_s19 = smov 0   ;;  %s3564_s20 = smov 0  }
   0x4   :  { %s3566_s21 = smov 0   ;;  %s3568_s22 = smov 0  }
   0x5   :  { %s3570_s23 = smov 0   ;;  %s3572_s24 = smov 0  }
   0x6 LB: > { %5610 = sst [smem:[#allocation10_spill]] %s3501_s22  ;;  %s3112_s25 = sadd.s32 4294967295, %s3509_s24   ;;  %s3509_s24 = sphi %s3572_s24, %s17_s24   ;;  %s3505_s23 = sphi %s3570_s23, %s5769_s23   ;;  %s3501_s22 = sphi %s3568_s22, %s5768_s22   ;;  %s3497_s21 = sphi %s3566_s21, %s5774_s21   ;;  %s3493_s20 = sphi %s3564_s20, %s5766_s20   ;;  %s3489_s19 = sphi %s3562_s19, %s5765_s19   ;;  %s3485_s18 = sphi %s3560_s18, %s5773_s18   ;;  %s3481_s17 = sphi %s3558_s17, %s5772_s17   ;;  %s3477_s16 = sphi %s3556_s16, %s5771_s16   ;;  %s3473_s15 = sphi %s3554_s15, %s5770_s15  }
   0x7   : > { %5611 = sst [smem:[#allocation11_spill]] %s3505_s23  ;;  %s3113_s26 = sadd.s32 4294967294, %s3509_s24  }
   0x8   : > { %s29_s27 = sadd.s32 1, %s3497_s21  ;;  %s32_s28 = sadd.s32 1, %s3501_s22 }
   0x9   : > { %p30_p0 = scmp.ge.s32.totalorder %s29_s27, 2  ;;  %s36_s29 = sadd.s32 1, %s3505_s23 }
   0xa   : > { %p161_p1 = scmp.ne.s32.totalorder %s3481_s17, %s3477_s16  ;;  %p162_p2 = scmp.eq.s32.totalorder %s3112_s25, 7 }
   0xb   : > { %s5776_s27 = smov (%p30_p0, %s29_s27), 0  ;;  %s5778_s28 = smov (!%p30_p0, %s32_s28), %s3501_s22 }
   0xc   : > { %5612 = sst [smem:[#allocation12_spill]] %s5776_s27  ;;  %p167_p3 = scmp.ne.s32.totalorder %s3477_s16, %s3473_s15 }
   0xd   : > { %p34_p4 = scmp.ge.s32.totalorder %s5778_s28, 2  ;;  %p168_p5 = scmp.eq.s32.totalorder %s3113_s26, 7 }
   0xe   : > { %p3616_p6 = por %p162_p2, %p161_p1  ;;  %p3122_p8 = scmp.ge.s32.totalorder %s3509_s24, 1 }
   0xf   : > { %s5780_s28 = smov (%p34_p4, %s5778_s28), 0  ;;  %s5782_s29 = smov (!%p34_p4, %s36_s29), %s3505_s23 }
  0x10   : > { %5614 = sst [smem:[#allocation13_spill]] %s5780_s28  ;;  %p3623_p7 = por %p168_p5, %p167_p3 }
  0x11   : > { %p38_p9 = scmp.ge.s32.totalorder %s5782_s29, 2  ;;  %p220_p10 = scmp.lt.s32.totalorder %s3509_s24, 9 }
  0x12   : > { %s147_s6 = ssub.s32 %s3501_s22, %s5780_s28  ;;  %s151_s9 = sadd.s32 1, %s3481_s17 }
  0x13   : > { %s5784_s29 = smov (%p38_p9, %s5782_s29), 0  ;;  %p221_p11 = pnand %p3122_p8, %p220_p10 }
  0x14   : > { %5616 = sst [smem:[#allocation14_spill]] %s5784_s29  ;;  %s146_s7 = ssub.s32 %s3505_s23, %s5784_s29 }
  0x15   : > { %s148_s8 = sor.u32 %s147_s6, %s146_s7  ;;  %224 = sbr.rel (%p221_p11) target bundleno = 1172 (0x494), region = 36 }
  0x16   : > { %p149_p12 = scmp.eq.s32.totalorder %s148_s8, 0 }
  0x18   : > { %s3637_s10 = scalar_select %p149_p12, %s3481_s17, %s151_s9  }
  0x1a   : > { %s5596_s11 = sand.u32 1, %s3477_s16   ;;  %s3124_s12 = sshll.u32 %s3493_s20, 1 }
  0x1b   : > { %s3123_s13 = sshll.u32 %s5596_s11, 6  ;;  %s258_s14 = sadd.s32 %s3489_s19, %s3124_s12 }
  0x1c   : > { %p259_p13 = scmp.lt.s32.totalorder %s258_s14, 3  ;;  %s267_s25 = sadd.s32 %s3485_s18, %s3124_s12 }
  0x1d   : > { %s3128_s26 = sshll.u32 %s267_s25, 1  ;;  %s3656_s11 = scalar_lea.vmem [#allocation7], %s3123_s13 }
  0x1e   : > { %s5786_s14 = smov (!%p259_p13, %s258_s14), 3  ;;  %s269_s7 = sadd.s32 %s3489_s19, %s3128_s26 }
  0x1f   : > { %s3218_s6 = sshll.u32 %s5786_s14, 7  ;;  %p270_p0 = scmp.lt.s32.totalorder %s269_s7, 7 }
  0x20   : > { %s3649_s29 = scalar_lea.vmem %s5587_s0, %s3218_s6  ;;  %p3131_p1 = scmp.ne.s32.totalorder %s3485_s18, 0 }
  0x21   : > { %s5788_s7 = smov (!%p270_p0, %s269_s7), 7  ;;  %s3511_s23 = smov (!%p3131_p1), 127  }
  0x22   : > { %s3219_s28 = sshll.u32 %s5788_s7, 7  ;;  %282 = sbr.rel (%p3131_p1) target bundleno = 199 (0xc7), region = 40 }
  0x23   : > { %s3654_s22 = scalar_lea.vmem %s5588_s1, %s3219_s28  ;;  %s3514_s27 = smov (!%p3131_p1), 126  }
  0x27   : > { %v283_v0 = vld [vmem:[%s3649_s29] sm:$0xff]  ;;  %v285_v1 = vld [vmem:[%s3649_s29 + $0x10] sm:$0xff]  ;;  %vm299_vm0 = vcmask 146432   ;;  %v284_v12 = vld [vmem:[%s3649_s29 + $0x8] sm:$0x3]  ;;  %vm315_vm1 = vcmask 140288  }
  0x28   : > { %v287_v2 = vld [vmem:[%s3649_s29 + $0x20] sm:$0xff]  ;;  %v289_v3 = vld [vmem:[%s3649_s29 + $0x30] sm:$0xff]  ;;  %v300_v4 = vsel %vm299_vm0, %v283_v0, 0.0  ;;  %v301_v5 = vsel %vm299_vm0, %v285_v1, 0.0  ;;  %v286_v13 = vld [vmem:[%s3649_s29 + $0x18] sm:$0x3] }
  0x29   : > { %v303_v6 = vsel %vm299_vm0, %v287_v2, 0.0  ;;  %v291_v7 = vld [vmem:[%s3649_s29 + $0x40] sm:$0xff]  ;;  %v302_v8 = vadd.f32 %v301_v5, %v300_v4  ;;  %v293_v9 = vld [vmem:[%s3649_s29 + $0x50] sm:$0xff]  ;;  %v305_v10 = vsel %vm299_vm0, %v289_v3, 0.0  ;;  %v288_v14 = vld [vmem:[%s3649_s29 + $0x28] sm:$0x3] }
  0x2a   : > { %v307_v15 = vsel %vm299_vm0, %v291_v7, 0.0  ;;  %v295_v16 = vld [vmem:[%s3649_s29 + $0x60] sm:$0xff]  ;;  %v290_v18 = vld [vmem:[%s3649_s29 + $0x38] sm:$0x3]  ;;  %v309_v19 = vsel %vm299_vm0, %v293_v9, 0.0  ;;  %v316_v20 = vsel %vm315_vm1, %v284_v12, 0.0 }
  0x2b   : > { %v304_v11 = vadd.f32 %v303_v6, %v302_v8  ;;  %v317_v21 = vsel %vm315_vm1, %v286_v13, 0.0  ;;  %v319_v22 = vsel %vm315_vm1, %v288_v14, 0.0  ;;  %v297_v23 = vld [vmem:[%s3649_s29 + $0x70] sm:$0xff]  ;;  %v292_v25 = vld [vmem:[%s3649_s29 + $0x48] sm:$0x3]  ;;  %v311_v27 = vsel %vm299_vm0, %v295_v16, 0.0 }
  0x2c   : > { %v318_v26 = vadd.f32 %v317_v21, %v316_v20  ;;  %v321_v28 = vsel %vm315_vm1, %v290_v18, 0.0  ;;  %v294_v30 = vld [vmem:[%s3649_s29 + $0x58] sm:$0x3]  ;;  %v313_v32 = vsel %vm299_vm0, %v297_v23, 0.0  ;;  %v323_v33 = vsel %vm315_vm1, %v292_v25, 0.0 }
  0x2d   : > { %v306_v17 = vadd.f32 %v305_v10, %v304_v11  ;;  %v296_v35 = vld [vmem:[%s3649_s29 + $0x68] sm:$0x3]  ;;  %v325_v37 = vsel %vm315_vm1, %v294_v30, 0.0  ;;  %v298_v39 = vld [vmem:[%s3649_s29 + $0x78] sm:$0x3]  ;;  %vm366_vm2 = vcmask 130048  }
  0x2e   : > { %v320_v31 = vadd.f32 %v319_v22, %v318_v26  ;;  %v327_v41 = vsel %vm315_vm1, %v296_v35, 0.0  ;;  %v329_v43 = vsel %vm315_vm1, %v298_v39, 0.0  ;;  %v3512_v47 = vmov -inf  }
  0x2f   : > { %v308_v24 = vadd.f32 %v307_v15, %v306_v17  ;;  %368 = vst.msk [vmem:[#allocation4] sm:$0xff] %vm366_vm2, %v3512_v47  ;;  %v3513_v48 = vmov 0.0  }
  0x30   : > { %v322_v36 = vadd.f32 %v321_v28, %v320_v31  ;;  %369 = vst.msk [vmem:[#allocation5] sm:$0xff] %vm366_vm2, %v3513_v48  ;;  %370 = vst.msk [vmem:[#allocation6] sm:$0xff] %vm366_vm2, %v3513_v48 }
  0x31   : > { %v310_v29 = vadd.f32 %v309_v19, %v308_v24  ;;  %371 = vst.msk [vmem:[#allocation6 + $0x8] sm:$0xff] %vm366_vm2, %v3513_v48  ;;  %372 = vst.msk [vmem:[#allocation6 + $0x10] sm:$0xff] %vm366_vm2, %v3513_v48 }
  0x32   : > { %v324_v40 = vadd.f32 %v323_v33, %v322_v36  ;;  %373 = vst.msk [vmem:[#allocation6 + $0x18] sm:$0xff] %vm366_vm2, %v3513_v48  ;;  %374 = vst.msk [vmem:[#allocation6 + $0x20] sm:$0xff] %vm366_vm2, %v3513_v48 }
  0x33   : > { %v312_v34 = vadd.f32 %v311_v27, %v310_v29  ;;  %375 = vst.msk [vmem:[#allocation6 + $0x28] sm:$0xff] %vm366_vm2, %v3513_v48  ;;  %376 = vst.msk [vmem:[#allocation6 + $0x30] sm:$0xff] %vm366_vm2, %v3513_v48 }
  0x34   : > { %v326_v42 = vadd.f32 %v325_v37, %v324_v40  ;;  %377 = vst.msk [vmem:[#allocation6 + $0x38] sm:$0xff] %vm366_vm2, %v3513_v48 }
  0x35   : > { %v314_v38 = vadd.f32 %v313_v32, %v312_v34 }
  0x36   : > { %v328_v44 = vadd.f32 %v327_v41, %v326_v42 }
  0x37   : > { %331 = vst.msk [vmem:[#allocation2] sm:$0xff] %vm299_vm0, %v314_v38 }
  0x38   : > { %v330_v45 = vadd.f32 %v329_v43, %v328_v44 }
  0x3a   : > { %332 = vst.msk [vmem:[#allocation2 + $0x8] sm:$0x3] %vm315_vm1, %v330_v45 }
  0x3e   : > { %v333_v46 = vld [vmem:[#allocation2] sm:$0xff] }
  0x3f   : > { %335 = vrot.lane.b32.xlu0 %v333_v46, %s3511_s23 }
  0x41   : > { %v343_v49 = vld [vmem:[#allocation2 + $0x1] sm:$0xff] }
  0x42   : > { %v354_v50 = vld [vmem:[#allocation2 + $0x2] sm:$0xff]  ;;  %346 = vrot.lane.b32.xlu1 %v343_v49, %s3511_s23 }
  0x43   : > { %339 = vrot.lane.b32.xlu0 %v333_v46, %s3514_s27 }
  0x46   : > { %350 = vrot.lane.b32.xlu1 %v343_v49, %s3514_s27 }
  0x47   : > { %357 = vrot.lane.b32.xlu0 %v354_v50, %s3511_s23 }
  0x4a   : > { %361 = vrot.lane.b32.xlu1 %v354_v50, %s3514_s27 }
  0xb1   : > { %v336_v51 = vpop.permute.xlu0 %335 }
  0xb2   : > { %v338_v52 = vadd.f32 %v336_v51, %v333_v46 }
  0xb4   : > { %v347_v55 = vpop.permute.xlu1 %346 }
  0xb5   : > { %v340_v53 = vpop.permute.xlu0 %339 }
  0xb6   : > { %v342_v54 = vadd.f32 %v340_v53, %v338_v52 }
  0xb8   : > { %v344_v56 = vadd.f32 %v343_v49, %v342_v54  ;;  %v351_v58 = vpop.permute.xlu1 %350 }
  0xb9   : > { %v358_v60 = vpop.permute.xlu0 %357 }
  0xba   : > { %v349_v57 = vadd.f32 %v347_v55, %v344_v56 }
  0xbc   : > { %v353_v59 = vadd.f32 %v351_v58, %v349_v57  ;;  %v362_v62 = vpop.permute.xlu1 %361 }
  0xbe   : > { %v355_v61 = vadd.f32 %v354_v50, %v353_v59 }
  0xc0   : > { %v360_v63 = vadd.f32 %v358_v60, %v355_v61 }
  0xc2   : > { %v364_v0 = vadd.f32 %v362_v62, %v360_v63 }
  0xc4   : > { %v365_v1 = vmul.f32 0.013888889, %v364_v0 }
  0xc6   : > { %367 = vst.msk [vmem:[#allocation3] sm:$0xff] %vm366_vm2, %v365_v1 }
  0xc7 PF: > { %v3705_v2 = vld [vmem:[%s3654_s22] sm:$0xff]  ;;  %v3708_v3 = vld [vmem:[%s3654_s22 + $0x10] sm:$0xff]  ;;  %vm394_vm3 = vcmask 146432   ;;  %v379_v14 = vld [vmem:[%s3654_s22 + $0x8] sm:$0x3]  ;;  %vm410_vm4 = vcmask 140288  }
  0xc8   : > { %v3711_v4 = vld [vmem:[%s3654_s22 + $0x20] sm:$0xff]  ;;  %v3714_v5 = vld [vmem:[%s3654_s22 + $0x30] sm:$0xff]  ;;  %v395_v6 = vsel %vm394_vm3, %v3705_v2, 0.0  ;;  %v396_v7 = vsel %vm394_vm3, %v3708_v3, 0.0  ;;  %v381_v15 = vld [vmem:[%s3654_s22 + $0x18] sm:$0x3] }
  0xc9   : > { %v398_v8 = vsel %vm394_vm3, %v3711_v4, 0.0  ;;  %v3723_v9 = vld [vmem:[%s3654_s22 + $0x40] sm:$0xff]  ;;  %v397_v10 = vadd.f32 %v396_v7, %v395_v6  ;;  %v3726_v11 = vld [vmem:[%s3654_s22 + $0x50] sm:$0xff]  ;;  %v400_v12 = vsel %vm394_vm3, %v3714_v5, 0.0  ;;  %v383_v16 = vld [vmem:[%s3654_s22 + $0x28] sm:$0x3] }
  0xca   : > { %v402_v17 = vsel %vm394_vm3, %v3723_v9, 0.0  ;;  %v3736_v18 = vld [vmem:[%s3654_s22 + $0x60] sm:$0xff]  ;;  %v385_v20 = vld [vmem:[%s3654_s22 + $0x38] sm:$0x3]  ;;  %v404_v21 = vsel %vm394_vm3, %v3726_v11, 0.0  ;;  %v411_v22 = vsel %vm410_vm4, %v379_v14, 0.0 }
  0xcb   : > { %v399_v13 = vadd.f32 %v398_v8, %v397_v10  ;;  %v412_v23 = vsel %vm410_vm4, %v381_v15, 0.0  ;;  %v414_v24 = vsel %vm410_vm4, %v383_v16, 0.0  ;;  %v3745_v25 = vld [vmem:[%s3654_s22 + $0x70] sm:$0xff]  ;;  %v387_v27 = vld [vmem:[%s3654_s22 + $0x48] sm:$0x3]  ;;  %v406_v29 = vsel %vm394_vm3, %v3736_v18, 0.0 }
  0xcc   : > { %v413_v28 = vadd.f32 %v412_v23, %v411_v22  ;;  %v416_v30 = vsel %vm410_vm4, %v385_v20, 0.0  ;;  %v389_v32 = vld [vmem:[%s3654_s22 + $0x58] sm:$0x3]  ;;  %v408_v34 = vsel %vm394_vm3, %v3745_v25, 0.0  ;;  %v418_v35 = vsel %vm410_vm4, %v387_v27, 0.0  ;;  %s3515_s28 = smov 127  }
  0xcd   : > { %v401_v19 = vadd.f32 %v400_v12, %v399_v13  ;;  %v391_v37 = vld [vmem:[%s3654_s22 + $0x68] sm:$0x3]  ;;  %v420_v39 = vsel %vm410_vm4, %v389_v32, 0.0  ;;  %v393_v41 = vld [vmem:[%s3654_s22 + $0x78] sm:$0x3]  ;;  %s3516_s12 = smov 126  }
  0xce   : > { %v415_v33 = vadd.f32 %v414_v24, %v413_v28  ;;  %v422_v43 = vsel %vm410_vm4, %v391_v37, 0.0  ;;  %v424_v45 = vsel %vm410_vm4, %v393_v41, 0.0  ;;  %v3766_v51 = vld [vmem:[#allocation3] sm:$0xff]  ;;  %s3517_s13 = smov 1   ;;  %s3518_s14 = smov 2   ;;  %v3774_v1 = vld [vmem:[%s3649_s29] sm:$0xff] }
  0xcf   : > { %v403_v26 = vadd.f32 %v402_v17, %v401_v19  ;;  %v3777_v7 = vld [vmem:[%s3649_s29 + $0x10] sm:$0xff]  ;;  %v3780_v8 = vld [vmem:[%s3649_s29 + $0x20] sm:$0xff]  ;;  %vm470_vm5 = vcmp.ge.f32.partialorder %v3774_v1, %v3766_v51  ;;  %vm5601_vm11 = vcmask 130048   ;;  %v3519_v22 = vmov 0.0   ;;  %p3204_p2 = scmp.ne.s32.totalorder %s3485_s18, 1 }
  0xd0   : > { %v417_v38 = vadd.f32 %v416_v30, %v415_v33  ;;  %v3785_v12 = vld [vmem:[%s3649_s29 + $0x30] sm:$0xff]  ;;  %v3790_v13 = vld [vmem:[%s3649_s29 + $0x40] sm:$0xff]  ;;  %vm471_vm6 = vcmp.ge.f32.partialorder %v3777_v7, %v3766_v51  ;;  %vm472_vm7 = vcmp.ge.f32.partialorder %v3780_v8, %v3766_v51 }
  0xd1   : > { %v405_v31 = vadd.f32 %v404_v21, %v403_v26  ;;  %v3798_v14 = vld [vmem:[%s3649_s29 + $0x50] sm:$0xff]  ;;  %v3801_v15 = vld [vmem:[%s3649_s29 + $0x60] sm:$0xff]  ;;  %vm473_vm12 = vcmp.ge.f32.partialorder %v3785_v12, %v3766_v51  ;;  %vm474_vm15 = vcmp.ge.f32.partialorder %v3790_v13, %v3766_v51 }
  0xd2   : > { %v419_v42 = vadd.f32 %v418_v35, %v417_v38  ;;  %v3804_v16 = vld [vmem:[%s3649_s29 + $0x70] sm:$0xff]  ;;  %v3813_v17 = vld [vmem:[%s3649_s29 + $0x1] sm:$0xff]  ;;  %vm475_vm2 = vcmp.ge.f32.partialorder %v3798_v14, %v3766_v51  ;;  %v5662_v38 = vmov 0 }
  0xd3   : > { %v407_v36 = vadd.f32 %v406_v29, %v405_v31  ;;  %v3816_v19 = vld [vmem:[%s3649_s29 + $0x11] sm:$0xff]  ;;  %v3826_v20 = vld [vmem:[%s3649_s29 + $0x21] sm:$0xff] }
  0xd4   : > { %v421_v44 = vadd.f32 %v420_v39, %v419_v42  ;;  %v3829_v21 = vld [vmem:[%s3649_s29 + $0x31] sm:$0xff]  ;;  %v3840_v24 = vld [vmem:[%s3649_s29 + $0x41] sm:$0xff] }
  0xd5   : > { %v409_v40 = vadd.f32 %v408_v34, %v407_v36  ;;  %v3843_v26 = vld [vmem:[%s3649_s29 + $0x51] sm:$0xff]  ;;  %v3846_v27 = vld [vmem:[%s3649_s29 + $0x61] sm:$0xff] }
  0xd6   : > { %v423_v46 = vadd.f32 %v422_v43, %v421_v44  ;;  %v3849_v28 = vld [vmem:[%s3654_s22 + $0x1] sm:$0xff]  ;;  %v3870_v32 = vld [vmem:[%s3649_s29 + $0x71] sm:$0xff] }
  0xd7   : > { %426 = vst.msk [vmem:[#allocation2] sm:$0xff] %vm394_vm3, %v409_v40  ;;  %v3873_v33 = vld [vmem:[%s3654_s22 + $0x11] sm:$0xff]  ;;  %v3891_v36 = vld [vmem:[%s3654_s22 + $0x21] sm:$0xff] }
  0xd8   : > { %v425_v47 = vadd.f32 %v424_v45, %v423_v46  ;;  %v3894_v37 = vld [vmem:[%s3654_s22 + $0x31] sm:$0xff]  ;;  %v3911_v40 = vld [vmem:[%s3654_s22 + $0x41] sm:$0xff] }
  0xd9   : > { %v3914_v41 = vld [vmem:[%s3649_s29 + $0x2] sm:$0xff]  ;;  %v3933_v43 = vld [vmem:[%s3649_s29 + $0x12] sm:$0xff] }
  0xda   : > { %427 = vst.msk [vmem:[#allocation2 + $0x8] sm:$0x3] %vm410_vm4, %v425_v47  ;;  %v3936_v44 = vld [vmem:[%s3649_s29 + $0x22] sm:$0xff]  ;;  %v3958_v47 = vld [vmem:[%s3654_s22 + $0x51] sm:$0xff] }
  0xdb   : > { %v4100_v45 = vld [vmem:[%s3654_s22 + $0x32] sm:$0xff] }
  0xde   : > { %v428_v48 = vld [vmem:[#allocation2] sm:$0xff] }
  0xdf   : > { %430 = vrot.lane.b32.xlu0 %v428_v48, %s3515_s28 }
  0xe1   : > { %v438_v49 = vld [vmem:[#allocation2 + $0x1] sm:$0xff] }
  0xe2   : > { %v449_v50 = vld [vmem:[#allocation2 + $0x2] sm:$0xff]  ;;  %441 = vrot.lane.b32.xlu1 %v438_v49, %s3515_s28 }
  0xe3   : > { %434 = vrot.lane.b32.xlu0 %v428_v48, %s3516_s12 }
  0xe6   : > { %445 = vrot.lane.b32.xlu1 %v438_v49, %s3516_s12 }
  0xe7   : > { %452 = vrot.lane.b32.xlu0 %v449_v50, %s3515_s28 }
  0xea   : > { %456 = vrot.lane.b32.xlu1 %v449_v50, %s3516_s12 }
  0xeb   : > { %536 = vrot.lane.b32.xlu0 %v3766_v51, %s3517_s13 }
  0xef   : > { %604 = vrot.lane.b32.xlu0 %v3766_v51, %s3518_s14 }
 0x151   : > { %v431_v52 = vpop.permute.xlu0 %430 }
 0x152   : > { %v433_v53 = vadd.f32 %v431_v52, %v428_v48  ;;  %v3961_v48 = vld [vmem:[%s3649_s29 + $0x32] sm:$0xff] }
 0x153   : > { %v3985_v52 = vld [vmem:[%s3654_s22 + $0x71] sm:$0xff] }
 0x154   : > { %v442_v56 = vpop.permute.xlu1 %441 }
 0x155   : > { %v435_v54 = vpop.permute.xlu0 %434 }
 0x156   : > { %v437_v55 = vadd.f32 %v435_v54, %v433_v53 }
 0x158   : > { %v439_v57 = vadd.f32 %v438_v49, %v437_v55  ;;  %v446_v59 = vpop.permute.xlu1 %445  ;;  %v4141_v49 = vld [vmem:[%s3654_s22 + $0x52] sm:$0xff] }
 0x159   : > { %v453_v61 = vpop.permute.xlu0 %452  ;;  %5651 = vst [vmem:[#allocation18_spill] sm:$0xff] %v4141_v49 }
 0x15a   : > { %v444_v58 = vadd.f32 %v442_v56, %v439_v57 }
 0x15c   : > { %v448_v60 = vadd.f32 %v446_v59, %v444_v58  ;;  %v457_v63 = vpop.permute.xlu1 %456  ;;  %v4037_v59 = vld [vmem:[%s3649_s29 + $0x42] sm:$0xff] }
 0x15e   : > { %v450_v62 = vadd.f32 %v449_v50, %v448_v60  ;;  %v3982_v50 = vld [vmem:[%s3654_s22 + $0x61] sm:$0xff] }
 0x160   : > { %v455_v0 = vadd.f32 %v453_v61, %v450_v62 }
 0x162   : > { %v459_v6 = vadd.f32 %v457_v63, %v455_v0  ;;  %v4058_v63 = vld [vmem:[%s3654_s22 + $0x2] sm:$0xff] }
 0x163   : > { %5637 = vst [vmem:[#allocation15_spill] sm:$0xff] %v4058_v63 }
 0x164   : > { %v3782_v10 = vmul.f32 0.013888889, %v459_v6 }
 0x166   : > { %548 = vrot.lane.b32.xlu1 %v3782_v10, %s3517_s13  ;;  %vm486_vm8 = vcmp.ge.f32.partialorder %v3705_v2, %v3782_v10  ;;  %vm487_vm9 = vcmp.ge.f32.partialorder %v3708_v3, %v3782_v10  ;;  %vm488_vm10 = vcmp.ge.f32.partialorder %v3711_v4, %v3782_v10  ;;  %vm489_vm13 = vcmp.ge.f32.partialorder %v3714_v5, %v3782_v10 }
 0x167   : > { %vm494_vm14 = vmxor %vm470_vm5, %vm486_vm8  ;;  %vm490_vm0 = vcmp.ge.f32.partialorder %v3723_v9, %v3782_v10  ;;  %vm491_vm3 = vcmp.ge.f32.partialorder %v3726_v11, %v3782_v10  ;;  %vm476_vm5 = vcmp.ge.f32.partialorder %v3801_v15, %v3766_v51  ;;  %vm477_vm8 = vcmp.ge.f32.partialorder %v3804_v16, %v3766_v51 }
 0x168   : > { %vm495_vm1 = vmxor %vm471_vm6, %vm487_vm9  ;;  %v3132_v23 = vsel %vm494_vm14, 1.0, %v3519_v22  ;;  %vm492_vm6 = vcmp.ge.f32.partialorder %v3736_v18, %v3782_v10  ;;  %vm493_vm9 = vcmp.ge.f32.partialorder %v3745_v25, %v3782_v10  ;;  %vm680_vm14 = vcmp.ge.f32.partialorder %v3816_v19, %v3766_v51 }
 0x169   : > { %vm3861_vm4 = vmxor %vm472_vm7, %vm488_vm10  ;;  %v3133_v30 = vsel %vm495_vm1, 1.0, %v3519_v22  ;;  %v519_v31 = vsel %vm5601_vm11, %v3132_v23, 0.0  ;;  %vm697_vm1 = vcmp.ge.f32.partialorder %v3891_v36, %v3782_v10  ;;  %v4168_v23 = vld [vmem:[%s3649_s29 + $0x72] sm:$0xff] }
 0x16a   : > { %615 = vrot.lane.b32.xlu1 %v3782_v10, %s3518_s14  ;;  %vm3885_vm7 = vmxor %vm473_vm12, %vm489_vm13  ;;  %v520_v35 = vsel %vm5601_vm11, %v3133_v30, 0.0  ;;  %vm679_vm13 = vcmp.ge.f32.partialorder %v3813_v17, %v3766_v51  ;;  %v3134_v46 = vsel %vm3861_vm4, 1.0, %v3519_v22 }
 0x16b   : > { %vm3906_vm10 = vmxor %vm474_vm15, %vm490_vm0  ;;  %v521_v39 = vadd.f32 %v520_v35, %v519_v31  ;;  %vm695_vm15 = vcmp.ge.f32.partialorder %v3849_v28, %v3782_v10  ;;  %v3135_v53 = vsel %vm3885_vm7, 1.0, %v3519_v22  ;;  %v522_v55 = vsel %vm5601_vm11, %v3134_v46, 0.0  ;;  %v4078_v31 = vld [vmem:[%s3654_s22 + $0x12] sm:$0xff]  ;;  %v4097_v46 = vld [vmem:[%s3654_s22 + $0x22] sm:$0xff] }
 0x16c   : > { %vm3922_vm12 = vmxor %vm475_vm2, %vm491_vm3  ;;  %vm696_vm3 = vcmp.ge.f32.partialorder %v3873_v33, %v3782_v10  ;;  %vm699_vm7 = vcmp.ge.f32.partialorder %v3911_v40, %v3782_v10  ;;  %v3136_v57 = vsel %vm3906_vm10, 1.0, %v3519_v22  ;;  %v524_v60 = vsel %vm5601_vm11, %v3135_v53, 0.0  ;;  %5643 = vst [vmem:[#allocation16_spill] sm:$0xff] %v4097_v46 }
 0x16d   : > { %vm3944_vm0 = vmxor %vm476_vm5, %vm492_vm6  ;;  %vm683_vm5 = vcmp.ge.f32.partialorder %v3840_v24, %v3766_v51  ;;  %v523_v58 = vadd.f32 %v522_v55, %v521_v39  ;;  %vm700_vm6 = vcmp.ge.f32.partialorder %v3958_v47, %v3782_v10  ;;  %vm701_vm10 = vcmp.ge.f32.partialorder %v3982_v50, %v3782_v10 }
 0x16e   : > { %vm3969_vm4 = vmxor %vm477_vm8, %vm493_vm9  ;;  %vm698_vm9 = vcmp.ge.f32.partialorder %v3894_v37, %v3782_v10  ;;  %v3137_v0 = vsel %vm3922_vm12, 1.0, %v3519_v22  ;;  %v3138_v34 = vsel %vm3944_vm0, 1.0, %v3519_v22  ;;  %v526_v35 = vsel %vm5601_vm11, %v3136_v57, 0.0  ;;  %v4118_v57 = vld [vmem:[%s3649_s29 + $0x52] sm:$0xff] }
 0x16f   : > { %vm4000_vm2 = vmxor %vm679_vm13, %vm695_vm15  ;;  %vm874_vm13 = vcmp.ge.f32.partialorder %v3961_v48, %v3766_v51  ;;  %vm702_vm15 = vcmp.ge.f32.partialorder %v3985_v52, %v3782_v10  ;;  %v525_v6 = vadd.f32 %v524_v60, %v523_v58  ;;  %vm5640_vm12 = vcmp.ge.f32.partialorder %v3843_v26, %v3766_v51  ;;  %v4121_v58 = vld [vmem:[%s3654_s22 + $0x42] sm:$0xff] }
 0x170   : > { %vm4015_vm8 = vmxor %vm680_vm14, %vm696_vm3  ;;  %vm5633_vm14 = vcmp.ge.f32.partialorder %v3826_v20, %v3766_v51  ;;  %v3156_v62 = vsel %vm4000_vm2, 1.0, %v3519_v22  ;;  %vm5644_vm0 = vcmp.ge.f32.partialorder %v3846_v27, %v3766_v51  ;;  %5647 = vst [vmem:[#allocation17_spill] sm:$0xff] %v4121_v58  ;;  %v3139_v60 = vsel %vm3969_vm4, 1.0, %v3519_v22 }
 0x171   : > { %vm705_vm3 = vmxor %vm5633_vm14, %vm697_vm1  ;;  %vm5634_vm1 = vcmp.ge.f32.partialorder %v3829_v21, %v3766_v51  ;;  %v3157_v29 = vsel %vm4015_vm8, 1.0, %v3519_v22  ;;  %v727_v39 = vsel %vm5601_vm11, %v3156_v62, 0.0  ;;  %v527_v53 = vadd.f32 %v526_v35, %v525_v6 }
 0x172   : > { %vm4050_vm14 = vmxor %vm5634_vm1, %vm698_vm9  ;;  %v3158_v30 = vsel %vm705_vm3, 1.0, %v3519_v22  ;;  %v728_v42 = vsel %vm5601_vm11, %v3157_v29, 0.0  ;;  %v528_v62 = vsel %vm5601_vm11, %v3137_v0, 0.0  ;;  %vm5648_vm8 = vcmp.ge.f32.partialorder %v3870_v32, %v3766_v51 }
 0x173   : > { %vm4069_vm9 = vmxor %vm683_vm5, %vm699_vm7  ;;  %v3159_v55 = vsel %vm4050_vm14, 1.0, %v3519_v22  ;;  %v729_v56 = vadd.f32 %v728_v42, %v727_v39  ;;  %v730_v6 = vsel %vm5601_vm11, %v3158_v30, 0.0  ;;  %vm887_vm3 = vcmp.ge.f32.partialorder %v4058_v63, %v3782_v10  ;;  %v4155_v30 = vld [vmem:[%s3649_s29 + $0x62] sm:$0xff] }
 0x174   : > { %vm4090_vm2 = vmxor %vm5640_vm12, %vm700_vm6  ;;  %vm875_vm6 = vcmp.ge.f32.partialorder %v4037_v59, %v3766_v51  ;;  %v529_v0 = vadd.f32 %v528_v62, %v527_v53  ;;  %v530_v29 = vsel %vm5601_vm11, %v3138_v34, 0.0  ;;  %v3160_v35 = vsel %vm4069_vm9, 1.0, %v3519_v22  ;;  %v4158_v63 = vld [vmem:[%s3654_s22 + $0x62] sm:$0xff]  ;;  %v4171_v34 = vld [vmem:[%s3654_s22 + $0x72] sm:$0xff]  ;;  %s3520_s22 = smov (!%p3204_p2), 127  }
 0x175   : > { %vm4108_vm5 = vmxor %vm5644_vm0, %vm701_vm10  ;;  %v731_v39 = vadd.f32 %v730_v6, %v729_v56  ;;  %vm5652_vm4 = vcmp.ge.f32.partialorder %v3914_v41, %v3766_v51  ;;  %5655 = vst [vmem:[#allocation19_spill] sm:$0xff] %v4158_v63  ;;  %v732_v53 = vsel %vm5601_vm11, %v3159_v55, 0.0  ;;  %vm888_vm10 = vcmp.ge.f32.partialorder %v4078_v31, %v3782_v10 }
 0x176   : > { %vm4133_vm7 = vmxor %vm5648_vm8, %vm702_vm15  ;;  %vm889_vm1 = vcmp.ge.f32.partialorder %v4097_v46, %v3782_v10  ;;  %vm890_vm14 = vcmp.ge.f32.partialorder %v4100_v45, %v3782_v10  ;;  %5656 = vst [vmem:[#allocation20_spill] sm:$0xff] %v4171_v34  ;;  %v531_v56 = vadd.f32 %v530_v29, %v529_v0  ;;  %vm891_vm12 = vcmp.ge.f32.partialorder %v4121_v58, %v3782_v10 }
 0x177   : > { %vm4150_vm15 = vmxor %vm5652_vm4, %vm887_vm3  ;;  %v733_v62 = vadd.f32 %v732_v53, %v731_v39  ;;  %vm5657_vm0 = vcmp.ge.f32.partialorder %v3933_v43, %v3766_v51  ;;  %v532_v55 = vsel %vm5601_vm11, %v3139_v60, 0.0  ;;  %v3161_v6 = vsel %vm4090_vm2, 1.0, %v3519_v22 }
 0x178   : > { %vm896_vm8 = vmxor %vm5657_vm0, %vm888_vm10  ;;  %v734_v46 = vsel %vm5601_vm11, %v3160_v35, 0.0  ;;  %vm892_vm3 = vcmp.ge.f32.partialorder %v4141_v49, %v3782_v10  ;;  %vm5658_vm4 = vcmp.ge.f32.partialorder %v3936_v44, %v3766_v51  ;;  %v4194_v29 = vadd.f32 %v532_v55, %v531_v56 }
 0x179   : > { %vm4190_vm9 = vmxor %vm5658_vm4, %vm889_vm1  ;;  %v735_v39 = vadd.f32 %v734_v46, %v733_v62  ;;  %vm877_vm10 = vcmp.ge.f32.partialorder %v4155_v30, %v3766_v51  ;;  %vm893_vm2 = vcmp.ge.f32.partialorder %v4158_v63, %v3782_v10  ;;  %vm878_vm1 = vcmp.ge.f32.partialorder %v4168_v23, %v3766_v51 }
 0x17a   : > { %5661 = vst [vmem:[#allocation21_spill] sm:$0xff] %v4194_v29  ;;  %vm4206_vm0 = vmxor %vm874_vm13, %vm890_vm14  ;;  %vm894_vm4 = vcmp.ge.f32.partialorder %v4171_v34, %v3782_v10  ;;  %v3180_v60 = vsel %vm4150_vm15, 1.0, %v3519_v22  ;;  %v3181_v35 = vsel %vm896_vm8, 1.0, %v3519_v22  ;;  %vm5666_vm13 = vcmask 130048  }
 0x17b   : > { %v5663_v38 = vsel %vm4206_vm0, 4294967295, %v5662_v38  ;;  %vm4217_vm11 = vmxor %vm875_vm6, %vm891_vm12  ;;  %v736_v53 = vsel %vm5666_vm13, %v3161_v6, 0.0  ;;  %vm5667_vm14 = vcmp.ge.f32.partialorder %v4118_v57, %v3766_v51  ;;  %v3162_v56 = vsel %vm4108_vm5, 1.0, %v3519_v22 }
 0x17c   : > { %vm4229_vm0 = vmxor %vm5667_vm14, %vm892_vm3  ;;  %v737_v62 = vadd.f32 %v736_v53, %v735_v39  ;;  %v3163_v29 = vsel %vm4133_vm7, 1.0, %v3519_v22  ;;  %v3182_v54 = vsel %vm4190_vm9, 1.0, %v3519_v22  ;;  %vm5677_vm3 = vnez %v5663_v38 }
 0x17d   : > { %vm4236_vm6 = vmxor %vm877_vm10, %vm893_vm2  ;;  %v3183_v34 = vsel %vm5677_vm3, 1.0, %v3519_v22  ;;  %v3184_v61 = vsel %vm4217_vm11, 1.0, %v3519_v22 }
 0x17e   : > { %vm4240_vm15 = vmxor %vm878_vm1, %vm894_vm4 }
 0x17f   : > { %vm5674_vm12 = vmmov %vm5666_vm13 }
 0x180   : > { %v919_v6 = vsel %vm5674_vm12, %v3180_v60, 0.0  ;;  %vm5675_vm8 = vmmov %vm5674_vm12 }
 0x181   : > { %v920_v51 = vsel %vm5675_vm8, %v3181_v35, 0.0  ;;  %vm5676_vm5 = vmmov %vm5675_vm8 }
 0x182   : > { %v738_v39 = vsel %vm5676_vm5, %v3162_v56, 0.0  ;;  %v921_v63 = vadd.f32 %v920_v51, %v919_v6  ;;  %vm5678_vm10 = vmmov %vm5676_vm5  ;;  %v3185_v56 = vsel %vm4229_vm0, 1.0, %v3519_v22 }
 0x183   : > { %v739_v53 = vadd.f32 %v738_v39, %v737_v62  ;;  %v740_v60 = vsel %vm5678_vm10, %v3163_v29, 0.0  ;;  %vm5679_vm2 = vmmov %vm5676_vm5  ;;  %v3186_v29 = vsel %vm4236_vm6, 1.0, %v3519_v22  ;;  %v4279_v39 = vpop.permute.xlu0 %536  ;;  %vm583_vm10 = vcmask 138248  }
 0x184   : > { %v922_v35 = vsel %vm5679_vm2, %v3182_v54, 0.0  ;;  %vm5680_vm7 = vmmov %vm5679_vm2  ;;  %vm539_vm0 = vcmp.ge.f32.partialorder %v3774_v1, %v4279_v39  ;;  %vm540_vm13 = vcmp.ge.f32.partialorder %v3777_v7, %v4279_v39  ;;  %vm541_vm14 = vcmp.ge.f32.partialorder %v3780_v8, %v4279_v39 }
 0x185   : > { %v4258_v49 = vadd.f32 %v740_v60, %v739_v53  ;;  %v923_v0 = vadd.f32 %v922_v35, %v921_v63  ;;  %v924_v58 = vsel %vm5680_vm7, %v3183_v34, 0.0  ;;  %vm5681_vm9 = vmmov %vm5679_vm2  ;;  %v3187_v63 = vsel %vm4240_vm15, 1.0, %v3519_v22 }
 0x186   : > { %v926_v62 = vsel %vm5681_vm9, %v3184_v61, 0.0  ;;  %vm5682_vm1 = vmmov %vm5679_vm2  ;;  %vm542_vm6 = vcmp.ge.f32.partialorder %v3785_v12, %v4279_v39  ;;  %vm543_vm15 = vcmp.ge.f32.partialorder %v3790_v13, %v4279_v39  ;;  %vm744_vm2 = vcmp.ge.f32.partialorder %v3816_v19, %v4279_v39 }
 0x187   : > { %v925_v38 = vadd.f32 %v924_v58, %v923_v0  ;;  %v928_v51 = vsel %vm5682_vm1, %v3185_v56, 0.0  ;;  %vm5683_vm11 = vmmov %vm5682_vm1  ;;  %vm745_vm7 = vcmp.ge.f32.partialorder %v3826_v20, %v4279_v39  ;;  %v4328_v35 = vpop.permute.xlu0 %604 }
 0x188   : > { %v930_v34 = vsel %vm5683_vm11, %v3186_v29, 0.0  ;;  %vm5684_vm4 = vmmov %vm5682_vm1  ;;  %vm743_vm11 = vcmp.ge.f32.partialorder %v3813_v17, %v4279_v39 }
 0x189   : > { %v927_v6 = vadd.f32 %v926_v62, %v925_v38  ;;  %v932_v10 = vsel %vm5684_vm4, %v3187_v63, 0.0 }
 0x18b   : > { %v929_v46 = vadd.f32 %v928_v51, %v927_v6 }
 0x18d   : > { %v931_v54 = vadd.f32 %v930_v34, %v929_v46 }
 0x18f   : > { %v4277_v58 = vadd.f32 %v932_v10, %v931_v54 }
 0x1d8   : > { %v4285_v55 = vpop.permute.xlu1 %548 }
 0x1d9   : > { %vm551_vm8 = vcmp.ge.f32.partialorder %v3705_v2, %v4285_v55  ;;  %vm552_vm5 = vcmp.ge.f32.partialorder %v3708_v3, %v4285_v55  ;;  %vm553_vm3 = vcmp.ge.f32.partialorder %v3711_v4, %v4285_v55  ;;  %vm554_vm9 = vcmp.ge.f32.partialorder %v3714_v5, %v4285_v55 }
 0x1da   : > { %vm559_vm1 = vmxor %vm539_vm0, %vm551_vm8  ;;  %vm555_vm4 = vcmp.ge.f32.partialorder %v3723_v9, %v4285_v55  ;;  %vm556_vm0 = vcmp.ge.f32.partialorder %v3726_v11, %v4285_v55 }
 0x1db   : > { %vm560_vm12 = vmxor %vm540_vm13, %vm552_vm5  ;;  %v3140_v42 = vsel %vm559_vm1, 1.0, %v3519_v22  ;;  %vm746_vm13 = vcmp.ge.f32.partialorder %v3829_v21, %v4279_v39  ;;  %vm557_vm5 = vcmp.ge.f32.partialorder %v3736_v18, %v4285_v55 }
 0x1dc   : > { %vm561_vm8 = vmxor %vm541_vm14, %vm553_vm3  ;;  %v3141_v53 = vsel %vm560_vm12, 1.0, %v3519_v22  ;;  %v584_v60 = vsel %vm583_vm10, %v3140_v42, 0.0  ;;  %vm558_vm12 = vcmp.ge.f32.partialorder %v3745_v25, %v4285_v55 }
 0x1dd   : > { %vm562_vm1 = vmxor %vm542_vm6, %vm554_vm9  ;;  %v3142_v61 = vsel %vm561_vm8, 1.0, %v3519_v22  ;;  %v585_v0 = vsel %vm583_vm10, %v3141_v53, 0.0  ;;  %vm5685_vm9 = vcmp.ge.f32.partialorder %v3798_v14, %v4279_v39  ;;  %v4425_v53 = vpop.permute.xlu1 %615 }
 0x1de   : > { %vm563_vm3 = vmxor %vm543_vm15, %vm555_vm4  ;;  %v3143_v56 = vsel %vm562_vm1, 1.0, %v3519_v22  ;;  %v586_v38 = vadd.f32 %v585_v0, %v584_v60  ;;  %v587_v62 = vsel %vm583_vm10, %v3142_v61, 0.0  ;;  %vm751_vm4 = vcmp.ge.f32.partialorder %v3849_v28, %v4285_v55 }
 0x1df   : > { %vm564_vm8 = vmxor %vm5685_vm9, %vm556_vm0  ;;  %vm5686_vm1 = vcmp.ge.f32.partialorder %v3801_v15, %v4279_v39  ;;  %v3144_v6 = vsel %vm563_vm3, 1.0, %v3519_v22  ;;  %vm752_vm0 = vcmp.ge.f32.partialorder %v3873_v33, %v4285_v55  ;;  %vm5689_vm15 = vcmp.ge.f32.partialorder %v3804_v16, %v4279_v39 }
 0x1e0   : > { %vm4372_vm6 = vmxor %vm5686_vm1, %vm557_vm5  ;;  %v588_v51 = vadd.f32 %v587_v62, %v586_v38  ;;  %v589_v46 = vsel %vm583_vm10, %v3143_v56, 0.0  ;;  %vm753_vm5 = vcmp.ge.f32.partialorder %v3891_v36, %v4285_v55  ;;  %v3145_v34 = vsel %vm564_vm8, 1.0, %v3519_v22 }
 0x1e1   : > { %vm4387_vm14 = vmxor %vm5689_vm15, %vm558_vm12  ;;  %vm754_vm12 = vcmp.ge.f32.partialorder %v3894_v37, %v4285_v55  ;;  %vm610_vm3 = vcmp.ge.f32.partialorder %v3785_v12, %v4328_v35  ;;  %v591_v10 = vsel %vm583_vm10, %v3144_v6, 0.0  ;;  %vm756_vm8 = vcmp.ge.f32.partialorder %v3958_v47, %v4285_v55 }
 0x1e2   : > { %v590_v54 = vadd.f32 %v589_v46, %v588_v51  ;;  %vm759_vm9 = vmxor %vm743_vm11, %vm751_vm4  ;;  %vm757_vm1 = vcmp.ge.f32.partialorder %v3982_v50, %v4285_v55  ;;  %v3146_v60 = vsel %vm4372_vm6, 1.0, %v3519_v22  ;;  %v593_v38 = vsel %vm583_vm10, %v3145_v34, 0.0 }
 0x1e3   : > { %vm760_vm15 = vmxor %vm744_vm2, %vm752_vm0  ;;  %v3164_v42 = vsel %vm759_vm9, 1.0, %v3519_v22  ;;  %vm758_vm6 = vcmp.ge.f32.partialorder %v3985_v52, %v4285_v55  ;;  %v3147_v6 = vsel %vm4387_vm14, 1.0, %v3519_v22  ;;  %vm5692_vm9 = vcmp.ge.f32.partialorder %v3911_v40, %v4285_v55 }
 0x1e4   : > { %v592_v61 = vadd.f32 %v591_v10, %v590_v54  ;;  %vm761_vm4 = vmxor %vm745_vm7, %vm753_vm5  ;;  %v3165_v0 = vsel %vm760_vm15, 1.0, %v3519_v22  ;;  %v783_v56 = vsel %vm583_vm10, %v3164_v42, 0.0  ;;  %vm5693_vm5 = vcmp.ge.f32.partialorder %v3840_v24, %v4279_v39 }
 0x1e5   : > { %vm762_vm0 = vmxor %vm746_vm13, %vm754_vm12  ;;  %v3166_v62 = vsel %vm761_vm4, 1.0, %v3519_v22  ;;  %v784_v29 = vsel %vm583_vm10, %v3165_v0, 0.0  ;;  %v595_v54 = vsel %vm583_vm10, %v3146_v60, 0.0  ;;  %vm5694_vm14 = vcmp.ge.f32.partialorder %v3843_v26, %v4279_v39  ;;  %v5711_v60 = vld [vmem:[#allocation15_spill] sm:$0xff] }
 0x1e6   : > { %v594_v51 = vadd.f32 %v593_v38, %v592_v61  ;;  %vm763_vm15 = vmxor %vm5693_vm5, %vm5692_vm9  ;;  %v3167_v46 = vsel %vm762_vm0, 1.0, %v3519_v22  ;;  %v785_v34 = vadd.f32 %v784_v29, %v783_v56  ;;  %v786_v10 = vsel %vm583_vm10, %v3166_v62, 0.0  ;;  %v5718_v38 = vld [vmem:[#allocation16_spill] sm:$0xff] }
 0x1e7   : > { %vm4472_vm12 = vmxor %vm5694_vm14, %vm756_vm8  ;;  %vm618_vm4 = vcmp.ge.f32.partialorder %v3705_v2, %v4425_v53  ;;  %vm650_vm0 = vcmask 146448   ;;  %vm5697_vm5 = vcmp.ge.f32.partialorder %v3846_v27, %v4279_v39  ;;  %v3168_v61 = vsel %vm763_vm15, 1.0, %v3519_v22 }
 0x1e8   : > { %v596_v42 = vadd.f32 %v595_v54, %v594_v51  ;;  %vm4487_vm8 = vmxor %vm5697_vm5, %vm757_vm1  ;;  %v787_v0 = vadd.f32 %v786_v10, %v785_v34  ;;  %vm619_vm14 = vcmp.ge.f32.partialorder %v3708_v3, %v4425_v53  ;;  %v597_v56 = vsel %vm583_vm10, %v3147_v6, 0.0 }
 0x1e9   : > { %vm5700_vm1 = vcmp.ge.f32.partialorder %v3870_v32, %v4279_v39  ;;  %v788_v62 = vsel %vm583_vm10, %v3167_v46, 0.0  ;;  %vm620_vm15 = vcmp.ge.f32.partialorder %v3711_v4, %v4425_v53  ;;  %vm621_vm9 = vcmp.ge.f32.partialorder %v3714_v5, %v4425_v53 }
 0x1ea   : > { %vm4503_vm5 = vmxor %vm5700_vm1, %vm758_vm6  ;;  %v598_v29 = vadd.f32 %v597_v56, %v596_v42  ;;  %v3169_v6 = vsel %vm4472_vm12, 1.0, %v3519_v22  ;;  %v789_v51 = vadd.f32 %v788_v62, %v787_v0  ;;  %vm5703_vm1 = vcmp.ge.f32.partialorder %v3774_v1, %v4328_v35 }
 0x1eb   : > { %vm626_vm7 = vmxor %vm5703_vm1, %vm618_vm4  ;;  %v790_v46 = vsel %vm583_vm10, %v3168_v61, 0.0  ;;  %vm623_vm13 = vcmp.ge.f32.partialorder %v3726_v11, %v4425_v53  ;;  %vm624_vm12 = vcmp.ge.f32.partialorder %v3736_v18, %v4425_v53  ;;  %vm5704_vm11 = vcmp.ge.f32.partialorder %v3777_v7, %v4328_v35 }
 0x1ec   : > { %vm627_vm6 = vmxor %vm5704_vm11, %vm619_vm14  ;;  %v3148_v2 = vsel %vm626_vm7, 1.0, %v3519_v22  ;;  %600 = vrot.lane.b32.xlu0 %v598_v29, %s3515_s28  ;;  %v3170_v1 = vsel %vm4487_vm8, 1.0, %v3519_v22  ;;  %v791_v34 = vadd.f32 %v790_v46, %v789_v51  ;;  %vm5705_vm1 = vcmp.ge.f32.partialorder %v3780_v8, %v4328_v35  ;;  %v5719_v29 = vld [vmem:[#allocation17_spill] sm:$0xff]  ;;  %v5721_v51 = vld [vmem:[#allocation18_spill] sm:$0xff] }
 0x1ed   : > { %vm628_vm2 = vmxor %vm5705_vm1, %vm620_vm15  ;;  %v3149_v3 = vsel %vm627_vm6, 1.0, %v3519_v22  ;;  %v651_v7 = vsel %vm650_vm0, %v3148_v2, 0.0  ;;  %v792_v54 = vsel %vm583_vm10, %v3169_v6, 0.0  ;;  %vm625_vm7 = vcmp.ge.f32.partialorder %v3745_v25, %v4425_v53  ;;  %v5722_v46 = vld [vmem:[#allocation19_spill] sm:$0xff] }
 0x1ee   : > { %vm629_vm8 = vmxor %vm610_vm3, %vm621_vm9  ;;  %v3150_v4 = vsel %vm628_vm2, 1.0, %v3519_v22  ;;  %v652_v8 = vsel %vm650_vm0, %v3149_v3, 0.0  ;;  %v3171_v63 = vsel %vm4503_vm5, 1.0, %v3519_v22  ;;  %v793_v10 = vadd.f32 %v792_v54, %v791_v34 }
 0x1ef   : > { %vm5706_vm15 = vcmp.ge.f32.partialorder %v3723_v9, %v4425_v53  ;;  %vm5707_vm6 = vcmp.ge.f32.partialorder %v3790_v13, %v4328_v35  ;;  %v3151_v5 = vsel %vm629_vm8, 1.0, %v3519_v22  ;;  %v653_v12 = vadd.f32 %v652_v8, %v651_v7 }
 0x1f0   : > { %vm630_vm1 = vmxor %vm5707_vm6, %vm5706_vm15  ;;  %v794_v42 = vsel %vm583_vm10, %v3170_v1, 0.0  ;;  %vm5708_vm2 = vcmp.ge.f32.partialorder %v3798_v14, %v4328_v35  ;;  %v654_v13 = vsel %vm650_vm0, %v3150_v4, 0.0  ;;  %vm943_vm5 = vcmp.ge.f32.partialorder %v5711_v60, %v4285_v55  ;;  %v5725_v4 = vld [vmem:[#allocation20_spill] sm:$0xff] }
 0x1f1   : > { %vm4587_vm9 = vmxor %vm5708_vm2, %vm623_vm13  ;;  %v795_v61 = vadd.f32 %v794_v42, %v793_v10  ;;  %vm5712_vm15 = vcmp.ge.f32.partialorder %v3801_v15, %v4328_v35  ;;  %v3152_v14 = vsel %vm630_vm1, 1.0, %v3519_v22  ;;  %v655_v0 = vadd.f32 %v654_v13, %v653_v12 }
 0x1f2   : > { %vm4602_vm6 = vmxor %vm5712_vm15, %vm624_vm12  ;;  %vm944_vm13 = vcmp.ge.f32.partialorder %v4078_v31, %v4285_v55  ;;  %v796_v56 = vsel %vm583_vm10, %v3171_v63, 0.0  ;;  %vm5715_vm12 = vcmp.ge.f32.partialorder %v3804_v16, %v4328_v35  ;;  %v656_v15 = vsel %vm650_vm0, %v3151_v5, 0.0 }
 0x1f3   : > { %vm4618_vm15 = vmxor %vm5715_vm12, %vm625_vm7  ;;  %vm945_vm1 = vcmp.ge.f32.partialorder %v5718_v38, %v4285_v55  ;;  %vm946_vm2 = vcmp.ge.f32.partialorder %v4100_v45, %v4285_v55  ;;  %v797_v62 = vadd.f32 %v796_v56, %v795_v61  ;;  %v3153_v25 = vsel %vm4587_vm9, 1.0, %v3519_v22 }
 0x1f4   : > { %v657_v16 = vadd.f32 %v656_v15, %v655_v0  ;;  %vm947_vm7 = vcmp.ge.f32.partialorder %v5719_v29, %v4285_v55  ;;  %vm5720_vm12 = vcmp.ge.f32.partialorder %v3914_v41, %v4279_v39  ;;  %v658_v6 = vsel %vm650_vm0, %v3152_v14, 0.0 }
 0x1f5   : > { %vm951_vm3 = vmxor %vm5720_vm12, %vm943_vm5  ;;  %vm948_vm8 = vcmp.ge.f32.partialorder %v5721_v51, %v4285_v55  ;;  %vm949_vm9 = vcmp.ge.f32.partialorder %v5722_v46, %v4285_v55  ;;  %vm5723_vm11 = vcmp.ge.f32.partialorder %v3933_v43, %v4279_v39  ;;  %799 = vrot.lane.b32.xlu0 %v797_v62, %s3515_s28  ;;  %v3154_v1 = vsel %vm4602_vm6, 1.0, %v3519_v22 }
 0x1f6   : > { %vm952_vm4 = vmxor %vm5723_vm11, %vm944_vm13  ;;  %v3188_v2 = vsel %vm951_vm3, 1.0, %v3519_v22  ;;  %v659_v34 = vadd.f32 %v658_v6, %v657_v16  ;;  %vm5724_vm12 = vcmp.ge.f32.partialorder %v3936_v44, %v4279_v39  ;;  %v660_v54 = vsel %vm650_vm0, %v3153_v25, 0.0 }
 0x1f7   : > { %vm953_vm14 = vmxor %vm5724_vm12, %vm945_vm1  ;;  %v3189_v3 = vsel %vm952_vm4, 1.0, %v3519_v22  ;;  %v975_v7 = vsel %vm583_vm10, %v3188_v2, 0.0  ;;  %vm950_vm3 = vcmp.ge.f32.partialorder %v5725_v4, %v4285_v55  ;;  %vm5726_vm6 = vcmp.ge.f32.partialorder %v3961_v48, %v4279_v39 }
 0x1f8   : > { %vm954_vm13 = vmxor %vm5726_vm6, %vm946_vm2  ;;  %v3190_v8 = vsel %vm953_vm14, 1.0, %v3519_v22  ;;  %v976_v63 = vsel %vm583_vm10, %v3189_v3, 0.0  ;;  %v3155_v10 = vsel %vm4618_vm15, 1.0, %v3519_v22  ;;  %v661_v5 = vadd.f32 %v660_v54, %v659_v34 }
 0x1f9   : > { %vm5727_vm1 = vcmp.ge.f32.partialorder %v4037_v59, %v4279_v39  ;;  %v3191_v12 = vsel %vm954_vm13, 1.0, %v3519_v22  ;;  %v977_v42 = vadd.f32 %v976_v63, %v975_v7  ;;  %v662_v9 = vsel %vm650_vm0, %v3154_v1, 0.0 }
 0x1fa   : > { %vm955_vm12 = vmxor %vm5727_vm1, %vm947_vm7  ;;  %vm5728_vm2 = vcmp.ge.f32.partialorder %v4118_v57, %v4279_v39  ;;  %v978_v61 = vsel %vm583_vm10, %v3190_v8, 0.0  ;;  %vm811_vm7 = vcmp.ge.f32.partialorder %v3849_v28, %v4425_v53  ;;  %v663_v11 = vadd.f32 %v662_v9, %v661_v5 }
 0x1fb   : > { %vm4702_vm15 = vmxor %vm5728_vm2, %vm948_vm8  ;;  %vm5731_vm13 = vcmp.ge.f32.partialorder %v4155_v30, %v4279_v39  ;;  %v3192_v0 = vsel %vm955_vm12, 1.0, %v3519_v22  ;;  %v979_v56 = vadd.f32 %v978_v61, %v977_v42  ;;  %vm812_vm8 = vcmp.ge.f32.partialorder %v3873_v33, %v4425_v53 }
 0x1fc   : > { %vm4717_vm1 = vmxor %vm5731_vm13, %vm949_vm9  ;;  %v664_v18 = vsel %vm650_vm0, %v3155_v10, 0.0  ;;  %vm5734_vm9 = vcmp.ge.f32.partialorder %v4168_v23, %v4279_v39  ;;  %v980_v62 = vsel %vm583_vm10, %v3191_v12, 0.0  ;;  %vm813_vm12 = vcmp.ge.f32.partialorder %v3891_v36, %v4425_v53 }
 0x1fd   : > { %vm4733_vm13 = vmxor %vm5734_vm9, %vm950_vm3  ;;  %vm814_vm2 = vcmp.ge.f32.partialorder %v3894_v37, %v4425_v53  ;;  %v665_v25 = vadd.f32 %v664_v18, %v663_v11  ;;  %v3193_v39 = vsel %vm4702_vm15, 1.0, %v3519_v22  ;;  %v981_v55 = vadd.f32 %v980_v62, %v979_v56 }
 0x1fe   : > { %vm815_vm3 = vcmp.ge.f32.partialorder %v3911_v40, %v4425_v53  ;;  %vm5737_vm9 = vcmp.ge.f32.partialorder %v3813_v17, %v4328_v35  ;;  %v982_v16 = vsel %vm583_vm10, %v3192_v0, 0.0  ;;  %vm816_vm6 = vcmp.ge.f32.partialorder %v3958_v47, %v4425_v53 }
 0x1ff   : > { %vm819_vm14 = vmxor %vm5737_vm9, %vm811_vm7  ;;  %vm817_vm15 = vcmp.ge.f32.partialorder %v3982_v50, %v4425_v53  ;;  %vm5738_vm11 = vcmp.ge.f32.partialorder %v3816_v19, %v4328_v35  ;;  %vm999_vm7 = vcmp.ge.f32.partialorder %v4037_v59, %v4328_v35  ;;  %667 = vrot.lane.b32.xlu1 %v665_v25, %s3516_s12  ;;  %v3194_v6 = vsel %vm4717_vm1, 1.0, %v3519_v22 }
 0x200   : > { %vm820_vm5 = vmxor %vm5738_vm11, %vm812_vm8  ;;  %v3172_v17 = vsel %vm819_vm14, 1.0, %v3519_v22  ;;  %v983_v2 = vadd.f32 %v982_v16, %v981_v55  ;;  %vm5739_vm9 = vcmp.ge.f32.partialorder %v3826_v20, %v4328_v35  ;;  %v984_v34 = vsel %vm583_vm10, %v3193_v39, 0.0 }
 0x201   : > { %vm821_vm4 = vmxor %vm5739_vm9, %vm813_vm12  ;;  %v3173_v19 = vsel %vm820_vm5, 1.0, %v3519_v22  ;;  %v843_v1 = vsel %vm650_vm0, %v3172_v17, 0.0  ;;  %vm818_vm11 = vcmp.ge.f32.partialorder %v3985_v52, %v4425_v53  ;;  %vm5740_vm14 = vcmp.ge.f32.partialorder %v3829_v21, %v4328_v35 }
 0x202   : > { %vm822_vm1 = vmxor %vm5740_vm14, %vm814_vm2  ;;  %v3174_v3 = vsel %vm821_vm4, 1.0, %v3519_v22  ;;  %v844_v20 = vsel %vm650_vm0, %v3173_v19, 0.0  ;;  %v3195_v7 = vsel %vm4733_vm13, 1.0, %v3519_v22  ;;  %v985_v54 = vadd.f32 %v984_v34, %v983_v2 }
 0x203   : > { %vm5741_vm5 = vcmp.ge.f32.partialorder %v3840_v24, %v4328_v35  ;;  %v3175_v8 = vsel %vm822_vm1, 1.0, %v3519_v22  ;;  %v845_v21 = vadd.f32 %v844_v20, %v843_v1  ;;  %v986_v63 = vsel %vm583_vm10, %v3194_v6, 0.0 }
 0x204   : > { %vm823_vm8 = vmxor %vm5741_vm5, %vm815_vm3  ;;  %vm5742_vm4 = vcmp.ge.f32.partialorder %v3843_v26, %v4328_v35  ;;  %v846_v10 = vsel %vm650_vm0, %v3174_v3, 0.0  ;;  %vm1000_vm13 = vcmp.ge.f32.partialorder %v4118_v57, %v4328_v35  ;;  %vm1003_vm12 = vcmp.ge.f32.partialorder %v5711_v60, %v4425_v53 }
 0x205   : > { %vm824_vm2 = vmxor %vm5742_vm4, %vm816_vm6  ;;  %v987_v24 = vadd.f32 %v986_v63, %v985_v54  ;;  %vm5743_vm3 = vcmp.ge.f32.partialorder %v3846_v27, %v4328_v35  ;;  %v3176_v26 = vsel %vm823_vm8, 1.0, %v3519_v22  ;;  %v847_v12 = vadd.f32 %v846_v10, %v845_v21  ;;  %v1056_v21 = vld [vmem:[#allocation4] sm:$0xff] }
 0x206   : > { %vm4822_vm9 = vmxor %vm5743_vm3, %vm817_vm15  ;;  %vm1004_vm6 = vcmp.ge.f32.partialorder %v4078_v31, %v4425_v53  ;;  %v988_v42 = vsel %vm583_vm10, %v3195_v7, 0.0  ;;  %vm5746_vm14 = vcmp.ge.f32.partialorder %v3870_v32, %v4328_v35  ;;  %v848_v9 = vsel %vm650_vm0, %v3175_v8, 0.0 }
 0x207   : > { %vm4836_vm1 = vmxor %vm5746_vm14, %vm818_vm11  ;;  %vm1001_vm15 = vcmp.ge.f32.partialorder %v4155_v30, %v4328_v35  ;;  %vm1005_vm5 = vcmp.ge.f32.partialorder %v5718_v38, %v4425_v53  ;;  %v989_v31 = vadd.f32 %v988_v42, %v987_v24  ;;  %v3177_v13 = vsel %vm824_vm2, 1.0, %v3519_v22 }
 0x208   : > { %v849_v61 = vadd.f32 %v848_v9, %v847_v12  ;;  %vm1006_vm10 = vcmp.ge.f32.partialorder %v4100_v45, %v4425_v53  ;;  %vm5749_vm11 = vcmp.ge.f32.partialorder %v3914_v41, %v4328_v35  ;;  %v850_v32 = vsel %vm650_vm0, %v3176_v26, 0.0 }
 0x209   : > { %vm1011_vm8 = vmxor %vm5749_vm11, %vm1003_vm12  ;;  %vm1007_vm4 = vcmp.ge.f32.partialorder %v5719_v29, %v4425_v53  ;;  %vm1008_vm3 = vcmp.ge.f32.partialorder %v5721_v51, %v4425_v53  ;;  %vm5750_vm2 = vcmp.ge.f32.partialorder %v3933_v43, %v4328_v35  ;;  %991 = vrot.lane.b32.xlu0 %v989_v31, %s3515_s28  ;;  %v3178_v41 = vsel %vm4822_vm9, 1.0, %v3519_v22 }
 0x20a   : > { %vm1012_vm14 = vmxor %vm5750_vm2, %vm1004_vm6  ;;  %v3196_v38 = vsel %vm1011_vm8, 1.0, %v3519_v22  ;;  %v851_v60 = vadd.f32 %v850_v32, %v849_v61  ;;  %vm5751_vm12 = vcmp.ge.f32.partialorder %v3936_v44, %v4328_v35  ;;  %v852_v43 = vsel %vm650_vm0, %v3177_v13, 0.0  ;;  %v1069_v13 = vld [vmem:[#allocation6 + $0x8] sm:$0xff]  ;;  %v1068_v61 = vld [vmem:[#allocation6] sm:$0xff] }
 0x20b   : > { %vm1013_vm11 = vmxor %vm5751_vm12, %vm1005_vm5  ;;  %v3197_v11 = vsel %vm1012_vm14, 1.0, %v3519_v22  ;;  %v1035_v14 = vsel %vm650_vm0, %v3196_v38, 0.0  ;;  %vm1009_vm6 = vcmp.ge.f32.partialorder %v5722_v46, %v4425_v53  ;;  %vm5752_vm9 = vcmp.ge.f32.partialorder %v3961_v48, %v4328_v35  ;;  %v1071_v32 = vld [vmem:[#allocation6 + $0x18] sm:$0xff]  ;;  %v1070_v38 = vld [vmem:[#allocation6 + $0x10] sm:$0xff] }
 0x20c   : > { %vm1014_vm8 = vmxor %vm5752_vm9, %vm1006_vm10  ;;  %v3198_v0 = vsel %vm1013_vm11, 1.0, %v3519_v22  ;;  %v1036_v44 = vsel %vm650_vm0, %v3197_v11, 0.0  ;;  %v3179_v56 = vsel %vm4836_vm1, 1.0, %v3519_v22  ;;  %v853_v18 = vadd.f32 %v852_v43, %v851_v60  ;;  %v1073_v60 = vld [vmem:[#allocation6 + $0x28] sm:$0xff] }
 0x20d   : > { %vm1015_vm5 = vmxor %vm999_vm7, %vm1007_vm4  ;;  %v3199_v45 = vsel %vm1014_vm8, 1.0, %v3519_v22  ;;  %v1037_v48 = vadd.f32 %v1036_v44, %v1035_v14  ;;  %v854_v15 = vsel %vm650_vm0, %v3178_v41, 0.0  ;;  %vm1002_vm10 = vcmp.ge.f32.partialorder %v4168_v23, %v4328_v35  ;;  %1100 = vrot.lane.b32.xlu0 %v3849_v28, %s3515_s28 }
 0x20e   : > { %vm1016_vm1 = vmxor %vm1000_vm13, %vm1008_vm3  ;;  %v1038_v29 = vsel %vm650_vm0, %v3198_v0, 0.0  ;;  %v855_v62 = vadd.f32 %v854_v15, %v853_v18  ;;  %vm1010_vm7 = vcmp.ge.f32.partialorder %v5725_v4, %v4425_v53  ;;  %v3200_v59 = vsel %vm1015_vm5, 1.0, %v3519_v22 }
 0x20f   : > { %v1039_v25 = vadd.f32 %v1038_v29, %v1037_v48  ;;  %v856_v23 = vsel %vm650_vm0, %v3179_v56, 0.0  ;;  %vm1017_vm13 = vmxor %vm1001_vm15, %vm1009_vm6  ;;  %v1040_v57 = vsel %vm650_vm0, %v3199_v45, 0.0  ;;  %v3201_v4 = vsel %vm1016_vm1, 1.0, %v3519_v22  ;;  %v1072_v56 = vld [vmem:[#allocation6 + $0x20] sm:$0xff]  ;;  %v1075_v29 = vld [vmem:[#allocation6 + $0x38] sm:$0xff] }
 0x210   : > { %v857_v51 = vadd.f32 %v856_v23, %v855_v62  ;;  %vm1018_vm4 = vmxor %vm1002_vm10, %vm1010_vm7  ;;  %v1042_v55 = vsel %vm650_vm0, %v3200_v59, 0.0  ;;  %v3202_v28 = vsel %vm1017_vm13, 1.0, %v3519_v22  ;;  %v1044_v30 = vsel %vm650_vm0, %v3201_v4, 0.0 }
 0x211   : > { %v1041_v39 = vadd.f32 %v1040_v57, %v1039_v25  ;;  %1104 = vrot.lane.b32.xlu0 %v3891_v36, %s3515_s28  ;;  %v3203_v35 = vsel %vm1018_vm4, 1.0, %v3519_v22  ;;  %v1046_v46 = vsel %vm650_vm0, %v3202_v28, 0.0  ;;  %v5753_v36 = vld [vmem:[#allocation21_spill] sm:$0xff] }
 0x212   : > { %859 = vrot.lane.b32.xlu1 %v857_v51, %s3516_s12  ;;  %v1048_v6 = vsel %vm650_vm0, %v3203_v35, 0.0  ;;  %vm5754_vm0 = vcmask 130048   ;;  %v1074_v51 = vld [vmem:[#allocation6 + $0x30] sm:$0xff] }
 0x213   : > { %v1043_v16 = vadd.f32 %v1042_v55, %v1041_v39  ;;  %vm5755_vm15 = vmmov %vm5754_vm0 }
 0x214   : > { %vm5756_vm3 = vmmov %vm5754_vm0 }
 0x215   : > { %v1045_v53 = vadd.f32 %v1044_v30, %v1043_v16  ;;  %1108 = vrot.lane.b32.xlu0 %v3911_v40, %s3515_s28  ;;  %vm5757_vm2 = vmmov %vm5754_vm0 }
 0x216   : > { %vm5758_vm14 = vmmov %vm5754_vm0 }
 0x217   : > { %v1047_v17 = vadd.f32 %v1046_v46, %v1045_v53  ;;  %vm5759_vm12 = vmmov %vm5754_vm0 }
 0x218   : > { %vm5760_vm11 = vmmov %vm5754_vm0 }
 0x219   : > { %v1049_v2 = vadd.f32 %v1048_v6, %v1047_v17  ;;  %1112 = vrot.lane.b32.xlu0 %v3982_v50, %s3515_s28  ;;  %vm5761_vm6 = vmmov %vm5754_vm0 }
 0x21a   : > { %vm5762_vm9 = vmmov %vm5754_vm0 }
 0x21b   : > { %1051 = vrot.lane.b32.xlu1 %v1049_v2, %s3516_s12  ;;  %vm5763_vm8 = vmmov %vm5754_vm0 }
 0x21f   : > { %1102 = vrot.lane.b32.xlu1 %v3873_v33, %s3515_s28 }
 0x223   : > { %1106 = vrot.lane.b32.xlu1 %v3894_v37, %s3515_s28 }
 0x227   : > { %1110 = vrot.lane.b32.xlu1 %v3958_v47, %s3515_s28 }
 0x22b   : > { %1114 = vrot.lane.b32.xlu1 %v3985_v52, %s3515_s28 }
 0x25e   : > { %v601_v22 = vpop.permute.xlu0 %600 }
 0x25f   : > { %v603_v40 = vadd.f32 %v601_v22, %v5753_v36 }
 0x267   : > { %v800_v50 = vpop.permute.xlu0 %799 }
 0x271   : > { %v668_v19 = vpop.permute.xlu1 %667 }
 0x272   : > { %v670_v1 = vadd.f32 %v668_v19, %v603_v40 }
 0x274   : > { %v742_v34 = vadd.f32 %v4258_v49, %v670_v1 }
 0x276   : > { %v802_v3 = vadd.f32 %v800_v50, %v742_v34 }
 0x27b   : > { %v992_v37 = vpop.permute.xlu0 %991 }
 0x27f   : > { %v1101_v12 = vpop.permute.xlu0 %1100 }
 0x283   : > { %v1105_v27 = vpop.permute.xlu0 %1104 }
 0x284   : > { %v860_v20 = vpop.permute.xlu1 %859 }
 0x285   : > { %v862_v33 = vadd.f32 %v860_v20, %v802_v3 }
 0x287   : > { %v934_v7 = vadd.f32 %v4277_v58, %v862_v33  ;;  %v1064_v58 = vld [vmem:[#allocation5] sm:$0xff]  ;;  %v1109_v31 = vpop.permute.xlu0 %1108 }
 0x289   : > { %v994_v54 = vadd.f32 %v992_v37, %v934_v7 }
 0x28b   : > { %v1113_v4 = vpop.permute.xlu0 %1112 }
 0x28d   : > { %v1052_v8 = vpop.permute.xlu1 %1051 }
 0x28e   : > { %v1054_v47 = vadd.f32 %v1052_v8, %v994_v54 }
 0x290   : > { %v1055_v63 = vsub.f32 72.0, %v1054_v47 }
 0x291   : > { %v1103_v49 = vpop.permute.xlu1 %1102 }
 0x292   : > { %v1057_v52 = vmax.f32 %v1056_v21, %v1055_v63 }
 0x294   : > { %v1058_v10 = vsub.f32 %v1056_v21, %v1057_v52  ;;  %v1061_v24 = vsub.f32 %v1055_v63, %v1057_v52  ;;  %1148 = vst.msk [vmem:[#allocation4] sm:$0xff] %vm5754_vm0, %v1057_v52 }
 0x295   : > { %v1107_v42 = vpop.permute.xlu1 %1106 }
 0x296   : > { %v1059_v5 = vmul.f32 1.442695, %v1058_v10  ;;  %v1062_v26 = vmul.f32 1.442695, %v1061_v24 }
 0x298   : > { %3380 = vpow2.f32 %v1059_v5 }
 0x299   : > { %3382 = vpow2.f32 %v1062_v26  ;;  %v1111_v9 = vpop.permute.xlu1 %1110 }
 0x29d   : > { %v1115_v57 = vpop.permute.xlu1 %1114 }
 0x2a5   : > { %v3381_v41 = vpop.eup %3380 }
 0x2a6   : > { %v3383_v11 = vpop.eup %3382  ;;  %v1065_v14 = vmul.f32 %v3381_v41, %v1064_v58  ;;  %v1077_v43 = vmul.f32 %v3381_v41, %v1069_v13  ;;  %v1076_v0 = vmul.f32 %v3381_v41, %v1068_v61  ;;  %v1079_v44 = vmul.f32 %v3381_v41, %v1071_v32 }
 0x2a7   : > { %v1125_v18 = vmul.f32 %v3383_v11, %v1103_v49  ;;  %v1124_v45 = vmul.f32 %v3383_v11, %v1101_v12  ;;  %v1127_v48 = vmul.f32 %v3383_v11, %v1107_v42  ;;  %v1078_v15 = vmul.f32 %v3381_v41, %v1070_v38 }
 0x2a8   : > { %v1066_v62 = vadd.f32 %v3383_v11, %v1065_v14  ;;  %v1126_v59 = vmul.f32 %v3383_v11, %v1105_v27  ;;  %v1081_v25 = vmul.f32 %v3381_v41, %v1073_v60  ;;  %v1129_v23 = vmul.f32 %v3383_v11, %v1111_v9 }
 0x2a9   : > { %v1133_v39 = vadd.f32 %v1125_v18, %v1077_v43  ;;  %v1132_v55 = vadd.f32 %v1124_v45, %v1076_v0  ;;  %v1135_v28 = vadd.f32 %v1127_v48, %v1079_v44  ;;  %v1080_v16 = vmul.f32 %v3381_v41, %v1072_v56 }
 0x2aa   : > { %1067 = vst.msk [vmem:[#allocation5] sm:$0xff] %vm5755_vm15, %v1066_v62  ;;  %v1134_v30 = vadd.f32 %v1126_v59, %v1078_v15  ;;  %v1137_v35 = vadd.f32 %v1129_v23, %v1081_v25  ;;  %v1128_v53 = vmul.f32 %v3383_v11, %v1109_v31  ;;  %v1083_v46 = vmul.f32 %v3381_v41, %v1075_v29 }
 0x2ab   : > { %1141 = vst.msk [vmem:[#allocation6 + $0x8] sm:$0xff] %vm5756_vm3, %v1133_v39  ;;  %v1131_v17 = vmul.f32 %v3383_v11, %v1115_v57  ;;  %v1082_v6 = vmul.f32 %v3381_v41, %v1074_v51  ;;  %v1130_v2 = vmul.f32 %v3383_v11, %v1113_v4 }
 0x2ac   : > { %1140 = vst.msk [vmem:[#allocation6] sm:$0xff] %vm5757_vm2, %v1132_v55  ;;  %v1136_v22 = vadd.f32 %v1128_v53, %v1080_v16 }
 0x2ad   : > { %1143 = vst.msk [vmem:[#allocation6 + $0x18] sm:$0xff] %vm5758_vm14, %v1135_v28  ;;  %v1139_v36 = vadd.f32 %v1131_v17, %v1083_v46  ;;  %v1138_v40 = vadd.f32 %v1130_v2, %v1082_v6 }
 0x2ae   : > { %1142 = vst.msk [vmem:[#allocation6 + $0x10] sm:$0xff] %vm5759_vm12, %v1134_v30  ;;  %1152 = sbr.rel (%p3204_p2) target bundleno = 1145 (0x479), region = 44 }
 0x2af   : > { %1145 = vst.msk [vmem:[#allocation6 + $0x28] sm:$0xff] %vm5760_vm11, %v1137_v35 }
 0x2b0   : > { %1144 = vst.msk [vmem:[#allocation6 + $0x20] sm:$0xff] %vm5761_vm6, %v1136_v22 }
 0x2b1   : > { %1147 = vst.msk [vmem:[#allocation6 + $0x38] sm:$0xff] %vm5762_vm9, %v1139_v36 }
 0x2b2   : > { %1146 = vst.msk [vmem:[#allocation6 + $0x30] sm:$0xff] %vm5763_vm8, %v1138_v40 }
 0x2b3   : > { %v1179_v19 = vld [vmem:[%s3649_s29 + $0x21] sm:$0x1]  ;;  %v1178_v1 = vld [vmem:[%s3649_s29 + $0x11] sm:$0x1]  ;;  %v1425_v34 = vld [vmem:[%s3649_s29 + $0x22] sm:$0x1] }
 0x2b4   : > { %1197 = vrot.lane.b32.xlu1 %v1179_v19, %s3520_s22  ;;  %1195 = vrot.lane.b32.xlu0 %v1178_v1, %s3520_s22  ;;  %v1424_v50 = vld [vmem:[%s3649_s29 + $0x12] sm:$0x1]  ;;  %v1180_v3 = vld [vmem:[%s3649_s29 + $0x31] sm:$0x1]  ;;  %v3521_v26 = vmov 0.0   ;;  %vm3522_vm5 = vmmov 0  }
 0x2b5   : > { %v1177_v20 = vld [vmem:[%s3649_s29 + $0x1] sm:$0x1]  ;;  %v1426_v33 = vld [vmem:[%s3649_s29 + $0x32] sm:$0x1]  ;;  %v1423_v7 = vld [vmem:[%s3649_s29 + $0x2] sm:$0x1]  ;;  %3236 = vmatprep.subr.mxu0 %v3521_v26  ;;  %3241 = vmatprep.subr.mxu1 %v3521_v26 }
 0x2b6   : > { %v1427_v37 = vld [vmem:[%s3649_s29 + $0x42] sm:$0x1]  ;;  %v1181_v54 = vld [vmem:[%s3649_s29 + $0x41] sm:$0x1]  ;;  %v1428_v8 = vld [vmem:[%s3649_s29 + $0x52] sm:$0x1]  ;;  %3238 = vmatprep.mubr.msk.f32.mxu0 %vm3522_vm5, %v3521_v26  ;;  %3243 = vmatprep.mubr.msk.f32.mxu1 %vm3522_vm5, %v3521_v26 }
 0x2b7   : > { %v1182_v47 = vld [vmem:[%s3649_s29 + $0x51] sm:$0x1]  ;;  %v1882_v21 = vld [vmem:[%s3649_s29 + $0x14] sm:$0x1]  ;;  %v1653_v63 = vld [vmem:[%s3649_s29 + $0x13] sm:$0x1] }
 0x2b8   : > { %1443 = vrot.lane.b32.xlu1 %v1425_v34, %s3520_s22  ;;  %1441 = vrot.lane.b32.xlu0 %v1424_v50, %s3520_s22  ;;  %v1429_v52 = vld [vmem:[%s3649_s29 + $0x62] sm:$0x1]  ;;  %v1183_v10 = vld [vmem:[%s3649_s29 + $0x61] sm:$0x1]  ;;  %v1155_v6 = vld [vmem:[#allocation5] sm:$0x1] }
 0x2b9   : > { %v1883_v24 = vld [vmem:[%s3649_s29 + $0x24] sm:$0x1]  ;;  %v1654_v5 = vld [vmem:[%s3649_s29 + $0x23] sm:$0x1]  ;;  %v1430_v49 = vld [vmem:[%s3649_s29 + $0x72] sm:$0x1]  ;;  %3385 = vrcp.f32 %v1155_v6 }
 0x2ba   : > { %v1184_v12 = vld [vmem:[%s3649_s29 + $0x71] sm:$0x1]  ;;  %v1655_v42 = vld [vmem:[%s3649_s29 + $0x33] sm:$0x1]  ;;  %v1652_v27 = vld [vmem:[%s3649_s29 + $0x3] sm:$0x1] }
 0x2bb   : > { %v1884_v58 = vld [vmem:[%s3649_s29 + $0x34] sm:$0x1]  ;;  %v1881_v9 = vld [vmem:[%s3649_s29 + $0x4] sm:$0x1]  ;;  %v1656_v13 = vld [vmem:[%s3649_s29 + $0x43] sm:$0x1] }
 0x2bc   : > { %1199 = vrot.lane.b32.xlu1 %v1180_v3, %s3520_s22  ;;  %1193 = vrot.lane.b32.xlu0 %v1177_v20, %s3520_s22  ;;  %v1885_v31 = vld [vmem:[%s3649_s29 + $0x44] sm:$0x1]  ;;  %v1886_v61 = vld [vmem:[%s3649_s29 + $0x54] sm:$0x1]  ;;  %v1401_v2 = vld [vmem:[#allocation5 + $0x1] sm:$0x1] }
 0x2bd   : > { %v1657_v32 = vld [vmem:[%s3649_s29 + $0x53] sm:$0x1]  ;;  %v2340_v38 = vld [vmem:[%s3649_s29 + $0x16] sm:$0x1]  ;;  %v2111_v41 = vld [vmem:[%s3649_s29 + $0x15] sm:$0x1]  ;;  %3387 = vrcp.f32 %v1401_v2 }
 0x2be   : > { %v1887_v60 = vld [vmem:[%s3649_s29 + $0x64] sm:$0x1]  ;;  %v1658_v11 = vld [vmem:[%s3649_s29 + $0x63] sm:$0x1]  ;;  %v2341_v14 = vld [vmem:[%s3649_s29 + $0x26] sm:$0x1] }
 0x2bf   : > { %v2112_v43 = vld [vmem:[%s3649_s29 + $0x25] sm:$0x1]  ;;  %v1888_v0 = vld [vmem:[%s3649_s29 + $0x74] sm:$0x1]  ;;  %v1659_v44 = vld [vmem:[%s3649_s29 + $0x73] sm:$0x1] }
 0x2c0   : > { %1445 = vrot.lane.b32.xlu1 %v1426_v33, %s3520_s22  ;;  %1439 = vrot.lane.b32.xlu0 %v1423_v7, %s3520_s22  ;;  %v2113_v56 = vld [vmem:[%s3649_s29 + $0x35] sm:$0x1]  ;;  %v2110_v18 = vld [vmem:[%s3649_s29 + $0x5] sm:$0x1]  ;;  %v3523_v20 = vmov 0   ;;  %v1165_v33 = vlaneseq  ;;  %vm1239_vm10 = vcmask 1041409  }
 0x2c1   : > { %v2342_v45 = vld [vmem:[%s3649_s29 + $0x36] sm:$0x1]  ;;  %v2339_v48 = vld [vmem:[%s3649_s29 + $0x6] sm:$0x1]  ;;  %v2114_v29 = vld [vmem:[%s3649_s29 + $0x45] sm:$0x1]  ;;  %3384 = vset.pattern.permute.xlu0 %v3523_v20 }
 0x2c2   : > { %v2343_v15 = vld [vmem:[%s3649_s29 + $0x46] sm:$0x1]  ;;  %v2344_v62 = vld [vmem:[%s3649_s29 + $0x56] sm:$0x1]  ;;  %v2115_v59 = vld [vmem:[%s3649_s29 + $0x55] sm:$0x1] }
 0x2c3   : > { %v2798_v25 = vld [vmem:[%s3649_s29 + $0x18] sm:$0x1]  ;;  %v2569_v23 = vld [vmem:[%s3649_s29 + $0x17] sm:$0x1]  ;;  %v2345_v57 = vld [vmem:[%s3649_s29 + $0x66] sm:$0x1] }
 0x2c4   : > { %1447 = vrot.lane.b32.xlu1 %v1427_v37, %s3520_s22  ;;  %1201 = vrot.lane.b32.xlu0 %v1181_v54, %s3520_s22  ;;  %v2116_v51 = vld [vmem:[%s3649_s29 + $0x65] sm:$0x1]  ;;  %v2799_v4 = vld [vmem:[%s3649_s29 + $0x28] sm:$0x1]  ;;  %vm1242_vm1 = vcmask 1042434   ;;  %vm1245_vm7 = vcmask 1043459  }
 0x2c5   : > { %v2570_v39 = vld [vmem:[%s3649_s29 + $0x27] sm:$0x1]  ;;  %v2346_v55 = vld [vmem:[%s3649_s29 + $0x76] sm:$0x1]  ;;  %v2117_v28 = vld [vmem:[%s3649_s29 + $0x75] sm:$0x1] }
 0x2c6   : > { %v2571_v16 = vld [vmem:[%s3649_s29 + $0x37] sm:$0x1]  ;;  %v2568_v30 = vld [vmem:[%s3649_s29 + $0x7] sm:$0x1]  ;;  %v2800_v35 = vld [vmem:[%s3649_s29 + $0x38] sm:$0x1] }
 0x2c7   : > { %v2797_v53 = vld [vmem:[%s3649_s29 + $0x8] sm:$0x1]  ;;  %v2572_v17 = vld [vmem:[%s3649_s29 + $0x47] sm:$0x1]  ;;  %v2802_v22 = vld [vmem:[%s3649_s29 + $0x58] sm:$0x1] }
 0x2c8   : > { %1449 = vrot.lane.b32.xlu1 %v1428_v8, %s3520_s22  ;;  %1203 = vrot.lane.b32.xlu0 %v1182_v47, %s3520_s22  ;;  %v2801_v46 = vld [vmem:[%s3649_s29 + $0x48] sm:$0x1]  ;;  %v2573_v36 = vld [vmem:[%s3649_s29 + $0x57] sm:$0x1]  ;;  %v5091_v47 = vshrl.u32 %v1165_v33, 7  ;;  %vm1248_vm13 = vcmask 1044484  }
 0x2c9   : > { %v2803_v1 = vld [vmem:[%s3649_s29 + $0x68] sm:$0x1]  ;;  %v2574_v34 = vld [vmem:[%s3649_s29 + $0x67] sm:$0x1]  ;;  %v2804_v7 = vld [vmem:[%s3649_s29 + $0x78] sm:$0x1] }
 0x2ca   : > { %v2575_v37 = vld [vmem:[%s3649_s29 + $0x77] sm:$0x1]  ;;  %vm1251_vm4 = vcmask 1045509   ;;  %vm1254_vm0 = vcmask 1046534   ;;  %vm1257_vm15 = vcmask 1047559   ;;  %vm1260_vm3 = vcmask 64512  }
 0x2cb   : > { %vm1392_vm2 = vcmask 122880  }
 0x2cc   : > { %1899 = vrot.lane.b32.xlu1 %v1882_v21, %s3520_s22  ;;  %1670 = vrot.lane.b32.xlu0 %v1653_v63, %s3520_s22  ;;  %v1154_v21 = vld [vmem:[%s5590_s3] sm:$0xff] }
 0x2d0   : > { %1451 = vrot.lane.b32.xlu1 %v1429_v52, %s3520_s22  ;;  %1205 = vrot.lane.b32.xlu0 %v1183_v10, %s3520_s22  ;;  %v3386_v10 = vpop.eup %3385 }
 0x2d4   : > { %1901 = vrot.lane.b32.xlu1 %v1883_v24, %s3520_s22  ;;  %1672 = vrot.lane.b32.xlu0 %v1654_v5, %s3520_s22  ;;  %v5099_v24 = vsub.s32 0, %v5091_v47  ;;  %v3388_v5 = vpop.eup %3387 }
 0x2d8   : > { %1453 = vrot.lane.b32.xlu1 %v1430_v49, %s3520_s22  ;;  %1207 = vrot.lane.b32.xlu0 %v1184_v12, %s3520_s22 }
 0x2dc   : > { %1674 = vrot.lane.b32.xlu1 %v1655_v42, %s3520_s22  ;;  %1668 = vrot.lane.b32.xlu0 %v1652_v27, %s3520_s22  ;;  %v5102_v42 = vrot.slane %v3386_v10, %v5099_v24  ;;  %v5105_v27 = vrot.slane %v3388_v5, %v5099_v24 }
 0x2e0   : > { %1903 = vrot.lane.b32.xlu1 %v1884_v58, %s3520_s22  ;;  %1897 = vrot.lane.b32.xlu0 %v1881_v9, %s3520_s22  ;;  %v1158_v58 = vld [vmem:[#allocation6 + $0x8] sm:$0x1]  ;;  %v1404_v9 = vld [vmem:[#allocation6 + $0x9] sm:$0x1] }
 0x2e4   : > { %1905 = vrot.lane.b32.xlu1 %v1885_v31, %s3520_s22  ;;  %1676 = vrot.lane.b32.xlu0 %v1656_v13, %s3520_s22  ;;  %v1157_v31 = vld [vmem:[#allocation6] sm:$0x1]  ;;  %v1403_v13 = vld [vmem:[#allocation6 + $0x1] sm:$0x1] }
 0x2e8   : > { %1907 = vrot.lane.b32.xlu1 %v1886_v61, %s3520_s22  ;;  %1678 = vrot.lane.b32.xlu0 %v1657_v32, %s3520_s22 }
 0x2ec   : > { %2357 = vrot.lane.b32.xlu1 %v2340_v38, %s3520_s22  ;;  %2128 = vrot.lane.b32.xlu0 %v2111_v41, %s3520_s22  ;;  %v1159_v38 = vld [vmem:[#allocation6 + $0x10] sm:$0x1]  ;;  %v1170_v41 = vmul.f32 %v5102_v42, %v1158_v58 }
 0x2f0   : > { %1909 = vrot.lane.b32.xlu1 %v1887_v60, %s3520_s22  ;;  %1680 = vrot.lane.b32.xlu0 %v1658_v11, %s3520_s22  ;;  %v1405_v60 = vld [vmem:[#allocation6 + $0x11] sm:$0x1]  ;;  %v1416_v11 = vmul.f32 %v5105_v27, %v1404_v9 }
 0x2f4   : > { %2359 = vrot.lane.b32.xlu1 %v2341_v14, %s3520_s22  ;;  %2130 = vrot.lane.b32.xlu0 %v2112_v43, %s3520_s22  ;;  %v1160_v14 = vld [vmem:[#allocation6 + $0x18] sm:$0x1]  ;;  %v1406_v43 = vld [vmem:[#allocation6 + $0x19] sm:$0x1] }
 0x2f8   : > { %1911 = vrot.lane.b32.xlu1 %v1888_v0, %s3520_s22  ;;  %1682 = vrot.lane.b32.xlu0 %v1659_v44, %s3520_s22  ;;  %v1169_v0 = vmul.f32 %v5102_v42, %v1157_v31  ;;  %v1415_v44 = vmul.f32 %v5105_v27, %v1403_v13 }
 0x2fc   : > { %2132 = vrot.lane.b32.xlu1 %v2113_v56, %s3520_s22  ;;  %2126 = vrot.lane.b32.xlu0 %v2110_v18, %s3520_s22  ;;  %v1407_v56 = vld [vmem:[#allocation6 + $0x21] sm:$0x1]  ;;  %v1161_v18 = vld [vmem:[#allocation6 + $0x20] sm:$0x1] }
 0x300   : > { %2361 = vrot.lane.b32.xlu1 %v2342_v45, %s3520_s22  ;;  %2355 = vrot.lane.b32.xlu0 %v2339_v48, %s3520_s22  ;;  %v1162_v45 = vld [vmem:[#allocation6 + $0x28] sm:$0x1]  ;;  %v1171_v48 = vmul.f32 %v5102_v42, %v1159_v38 }
 0x304   : > { %2363 = vrot.lane.b32.xlu1 %v2343_v15, %s3520_s22  ;;  %2134 = vrot.lane.b32.xlu0 %v2114_v29, %s3520_s22  ;;  %v1417_v15 = vmul.f32 %v5105_v27, %v1405_v60  ;;  %v1408_v29 = vld [vmem:[#allocation6 + $0x29] sm:$0x1] }
 0x308   : > { %2365 = vrot.lane.b32.xlu1 %v2344_v62, %s3520_s22  ;;  %2136 = vrot.lane.b32.xlu0 %v2115_v59, %s3520_s22  ;;  %v1859_v62 = vld [vmem:[#allocation5 + $0x3] sm:$0x1] }
 0x309   : > { %3389 = vrcp.f32 %v1859_v62 }
 0x30c   : > { %2815 = vrot.lane.b32.xlu1 %v2798_v25, %s3520_s22  ;;  %2586 = vrot.lane.b32.xlu0 %v2569_v23, %s3520_s22 }
 0x310   : > { %2367 = vrot.lane.b32.xlu1 %v2345_v57, %s3520_s22  ;;  %2138 = vrot.lane.b32.xlu0 %v2116_v51, %s3520_s22  ;;  %v1172_v51 = vmul.f32 %v5102_v42, %v1160_v14 }
 0x314   : > { %2817 = vrot.lane.b32.xlu1 %v2799_v4, %s3520_s22  ;;  %2588 = vrot.lane.b32.xlu0 %v2570_v39, %s3520_s22  ;;  %v1418_v4 = vmul.f32 %v5105_v27, %v1406_v43  ;;  %v1409_v39 = vld [vmem:[#allocation6 + $0x31] sm:$0x1] }
 0x318   : > { %2369 = vrot.lane.b32.xlu1 %v2346_v55, %s3520_s22  ;;  %2140 = vrot.lane.b32.xlu0 %v2117_v28, %s3520_s22  ;;  %v1163_v55 = vld [vmem:[#allocation6 + $0x30] sm:$0x1]  ;;  %v1419_v28 = vmul.f32 %v5105_v27, %v1407_v56 }
 0x31c   : > { %2590 = vrot.lane.b32.xlu1 %v2571_v16, %s3520_s22  ;;  %2584 = vrot.lane.b32.xlu0 %v2568_v30, %s3520_s22  ;;  %v1173_v16 = vmul.f32 %v5102_v42, %v1161_v18  ;;  %v1174_v30 = vmul.f32 %v5102_v42, %v1162_v45 }
 0x320   : > { %2819 = vrot.lane.b32.xlu1 %v2800_v35, %s3520_s22  ;;  %2813 = vrot.lane.b32.xlu0 %v2797_v53, %s3520_s22 }
 0x324   : > { %2821 = vrot.lane.b32.xlu1 %v2801_v46, %s3520_s22  ;;  %2592 = vrot.lane.b32.xlu0 %v2572_v17, %s3520_s22  ;;  %v1420_v46 = vmul.f32 %v5105_v27, %v1408_v29  ;;  %v1630_v17 = vld [vmem:[#allocation5 + $0x2] sm:$0x1] }
 0x325   : > { %3391 = vrcp.f32 %v1630_v17 }
 0x326   : > { %v5077_v40 = vpop.permute.xlu1 %1197  ;;  %v1196_v19 = vpop.permute.xlu0 %1195 }
 0x327   : > { %v1218_v23 = vadd.f32 %v1196_v19, %v1170_v41  ;;  %v1219_v6 = vadd.f32 %v5077_v40, %v1171_v48 }
 0x328   : > { %2823 = vrot.lane.b32.xlu1 %v2802_v22, %s3520_s22  ;;  %2594 = vrot.lane.b32.xlu0 %v2573_v36, %s3520_s22  ;;  %v1421_v36 = vmul.f32 %v5105_v27, %v1409_v39 }
 0x329   : > { %v1241_v5 = vrot.slane %v1219_v6, 6 }
 0x32a   : > { %v5083_v50 = vpop.permute.xlu1 %1443  ;;  %v1442_v3 = vpop.permute.xlu0 %1441 }
 0x32b   : > { %v1464_v57 = vadd.f32 %v1442_v3, %v1416_v11  ;;  %v1465_v2 = vadd.f32 %v5083_v50, %v1417_v15 }
 0x32c   : > { %2825 = vrot.lane.b32.xlu1 %v2803_v1, %s3520_s22  ;;  %2596 = vrot.lane.b32.xlu0 %v2574_v34, %s3520_s22  ;;  %v1175_v1 = vmul.f32 %v5102_v42, %v1163_v55  ;;  %v1238_v34 = vrot.slane %v1218_v23, 7 }
 0x32d   : > { %v1479_v3 = vrot.slane %v1464_v57, 7  ;;  %v1481_v58 = vrot.slane %v1465_v2, 6 }
 0x32e   : > { %v5089_v54 = vpop.permute.xlu1 %1199  ;;  %v1194_v8 = vpop.permute.xlu0 %1193 }
 0x32f   : > { %v1217_v35 = vadd.f32 %v1194_v8, %v1169_v0  ;;  %v1220_v20 = vadd.f32 %v5089_v54, %v1172_v51  ;;  %v1410_v8 = vld [vmem:[#allocation6 + $0x39] sm:$0x1]  ;;  %v3390_v51 = vpop.eup %3389 }
 0x330   : > { %2827 = vrot.lane.b32.xlu1 %v2804_v7, %s3520_s22  ;;  %2598 = vrot.lane.b32.xlu0 %v2575_v37, %s3520_s22 }
 0x331   : > { %v1240_v40 = vsel %vm1239_vm10, %v1238_v34, %v1217_v35  ;;  %v5153_v35 = vld [vmem:[%s5589_s2] sm:$0xff]  ;;  %v1632_v34 = vld [vmem:[#allocation6 + $0x2] sm:$0x1] }
 0x332   : > { %v1446_v63 = vpop.permute.xlu1 %1445  ;;  %v1440_v52 = vpop.permute.xlu0 %1439  ;;  %v1243_v41 = vsel %vm1242_vm1, %v1241_v5, %v1240_v40  ;;  %v1635_v40 = vld [vmem:[#allocation6 + $0x1a] sm:$0x1]  ;;  %v1865_v5 = vld [vmem:[#allocation6 + $0x23] sm:$0x1] }
 0x333   : > { %v1463_v53 = vadd.f32 %v1440_v52, %v1415_v44  ;;  %v1466_v33 = vadd.f32 %v1446_v63, %v1418_v4  ;;  %v1244_v63 = vrot.slane %v1220_v20, 5 }
 0x334   : > { %1227 = vperm.xlu0 %3384, %v1154_v21   ;;  %v1164_v21 = vld [vmem:[#allocation6 + $0x38] sm:$0x1] }
 0x335   : > { %v1480_v50 = vsel %vm1239_vm10, %v1479_v3, %v1463_v53  ;;  %v1176_v38 = vmul.f32 %v5102_v42, %v1164_v21  ;;  %v3392_v53 = vpop.eup %3391  ;;  %v1861_v3 = vld [vmem:[#allocation6 + $0x3] sm:$0x1]  ;;  %v1634_v21 = vld [vmem:[#allocation6 + $0x12] sm:$0x1] }
 0x336   : > { %v1448_v49 = vpop.permute.xlu1 %1447  ;;  %v1202_v12 = vpop.permute.xlu0 %1201  ;;  %v1482_v60 = vsel %vm1242_vm1, %v1481_v58, %v1480_v50  ;;  %v1864_v50 = vld [vmem:[#allocation6 + $0x1b] sm:$0x1]  ;;  %v1636_v58 = vld [vmem:[#allocation6 + $0x22] sm:$0x1] }
 0x337   : > { %v1467_v7 = vadd.f32 %v1448_v49, %v1419_v28  ;;  %v1221_v37 = vadd.f32 %v1202_v12, %v1173_v16  ;;  %v1483_v49 = vrot.slane %v1466_v33, 5  ;;  %v1422_v12 = vmul.f32 %v5105_v27, %v1410_v8  ;;  %v1863_v8 = vld [vmem:[#allocation6 + $0x13] sm:$0x1] }
 0x338   : > { %v1246_v27 = vsel %vm1245_vm7, %v1244_v63, %v1243_v41 }
 0x339   : > { %v1484_v18 = vsel %vm1245_vm7, %v1483_v49, %v1482_v60  ;;  %v1866_v49 = vld [vmem:[#allocation6 + $0x2b] sm:$0x1] }
 0x33a   : > { %v1450_v61 = vpop.permute.xlu1 %1449  ;;  %v1204_v32 = vpop.permute.xlu0 %1203 }
 0x33b   : > { %v1468_v52 = vadd.f32 %v1450_v61, %v1420_v46  ;;  %v1222_v10 = vadd.f32 %v1204_v32, %v1174_v30  ;;  %v1485_v61 = vrot.slane %v1467_v7, 4  ;;  %v1247_v32 = vrot.slane %v1221_v37, 4 }
 0x33d   : > { %v1487_v11 = vrot.slane %v1468_v52, 3  ;;  %v1250_v14 = vrot.slane %v1222_v10, 3  ;;  %v1486_v48 = vsel %vm1248_vm13, %v1485_v61, %v1484_v18  ;;  %v1249_v15 = vsel %vm1248_vm13, %v1247_v32, %v1246_v27 }
 0x33e   : > { %v5113_v59 = vpop.permute.xlu1 %1899  ;;  %v5115_v25 = vpop.permute.xlu0 %1670 }
 0x33f   : > { %v1252_v23 = vsel %vm1251_vm4, %v1250_v14, %v1249_v15  ;;  %v1488_v57 = vsel %vm1251_vm4, %v1487_v11, %v1486_v48  ;;  %v1867_v14 = vld [vmem:[#allocation6 + $0x33] sm:$0x1] }
 0x342   : > { %v1452_v22 = vpop.permute.xlu1 %1451  ;;  %v1206_v19 = vpop.permute.xlu0 %1205 }
 0x343   : > { %v1469_v9 = vadd.f32 %v1452_v22, %v1421_v36  ;;  %v1223_v31 = vadd.f32 %v1206_v19, %v1175_v1  ;;  %v5166_v22 = vrot.slane %v3390_v51, %v5099_v24  ;;  %v5169_v36 = vrot.slane %v3392_v53, %v5099_v24  ;;  %v1862_v19 = vld [vmem:[#allocation6 + $0xb] sm:$0x1]  ;;  %v1633_v1 = vld [vmem:[#allocation6 + $0xa] sm:$0x1] }
 0x345   : > { %v1489_v43 = vrot.slane %v1469_v9, 2  ;;  %v1253_v0 = vrot.slane %v1223_v31, 2  ;;  %v1874_v7 = vmul.f32 %v5166_v22, %v1862_v19  ;;  %v1645_v37 = vmul.f32 %v5169_v36, %v1633_v1  ;;  %v2317_v9 = vld [vmem:[#allocation5 + $0x5] sm:$0x1] }
 0x346   : > { %v5130_v13 = vpop.permute.xlu1 %1901  ;;  %v5132_v54 = vpop.permute.xlu0 %1672  ;;  %v1644_v52 = vmul.f32 %v5169_v36, %v1632_v34  ;;  %v1873_v10 = vmul.f32 %v5166_v22, %v1861_v3  ;;  %v1875_v31 = vmul.f32 %v5166_v22, %v1863_v8  ;;  %v1646_v63 = vmul.f32 %v5169_v36, %v1634_v21 }
 0x347   : > { %v1255_v55 = vsel %vm1254_vm0, %v1253_v0, %v1252_v23  ;;  %v1490_v28 = vsel %vm1254_vm0, %v1489_v43, %v1488_v57  ;;  %v1922_v60 = vadd.f32 %v5113_v59, %v1874_v7  ;;  %v1693_v61 = vadd.f32 %v5115_v25, %v1645_v37  ;;  %v1638_v43 = vld [vmem:[#allocation6 + $0x32] sm:$0x1]  ;;  %v2088_v59 = vld [vmem:[#allocation5 + $0x4] sm:$0x1] }
 0x348   : > { %v1647_v32 = vmul.f32 %v5169_v36, %v1635_v40  ;;  %v1876_v11 = vmul.f32 %v5166_v22, %v1864_v50  ;;  %v1877_v0 = vmul.f32 %v5166_v22, %v1865_v5  ;;  %3393 = vrcp.f32 %v2317_v9 }
 0x349   : > { %v1878_v27 = vmul.f32 %v5166_v22, %v1866_v49  ;;  %v1923_v25 = vadd.f32 %v5130_v13, %v1875_v31  ;;  %v1879_v15 = vmul.f32 %v5166_v22, %v1867_v14  ;;  %v1937_v23 = vrot.slane %v1922_v60, 7 }
 0x34a   : > { %v1454_v44 = vpop.permute.xlu1 %1453  ;;  %v1208_v56 = vpop.permute.xlu0 %1207  ;;  %v1708_v57 = vrot.slane %v1693_v61, 7  ;;  %3395 = vrcp.f32 %v2088_v59 }
 0x34b   : > { %v1470_v42 = vadd.f32 %v1454_v44, %v1422_v12  ;;  %v1224_v45 = vadd.f32 %v1208_v56, %v1176_v38  ;;  %v1637_v12 = vld [vmem:[#allocation6 + $0x2a] sm:$0x1]  ;;  %v1648_v44 = vmul.f32 %v5169_v36, %v1636_v58  ;;  %v1939_v19 = vrot.slane %v1923_v25, 6 }
 0x34d   : > { %v1491_v29 = vrot.slane %v1470_v42, 1  ;;  %v1256_v62 = vrot.slane %v1224_v45, 1  ;;  %v1649_v42 = vmul.f32 %v5169_v36, %v1637_v12  ;;  %v1694_v45 = vadd.f32 %v5132_v54, %v1646_v63 }
 0x34e   : > { %v5144_v4 = vpop.permute.xlu1 %1674  ;;  %v1669_v39 = vpop.permute.xlu0 %1668 }
 0x34f   : > { %v1258_v16 = vsel %vm1257_vm15, %v1256_v62, %v1255_v55  ;;  %v1492_v30 = vsel %vm1257_vm15, %v1491_v29, %v1490_v28  ;;  %v1692_v56 = vadd.f32 %v1669_v39, %v1644_v52  ;;  %v1650_v62 = vmul.f32 %v5169_v36, %v1638_v43 }
 0x350   : > { %3237 = vmatpush3.msra.mxu0 %v1258_v16  ;;  %3242 = vmatpush3.msra.mxu1 %v1492_v30  ;;  %v1695_v51 = vadd.f32 %v5144_v4, %v1647_v32  ;;  %v1868_v16 = vld [vmem:[#allocation6 + $0x3b] sm:$0x1]  ;;  %v1639_v30 = vld [vmem:[#allocation6 + $0x3a] sm:$0x1]  ;;  %v1710_v1 = vrot.slane %v1694_v45, 6 }
 0x351   : > { %3246 = vmatprep.subr.mxu0 %v3521_v26  ;;  %3251 = vmatprep.subr.mxu1 %v3521_v26  ;;  %v1709_v13 = vsel %vm1239_vm10, %v1708_v57, %v1692_v56  ;;  %v2090_v57 = vld [vmem:[#allocation6 + $0x4] sm:$0x1] }
 0x352   : > { %v1904_v46 = vpop.permute.xlu1 %1903  ;;  %v1898_v17 = vpop.permute.xlu0 %1897  ;;  %3239 = vmatmul.mubr.msk.f32.vlgmr.msra.gmra.mxu0 %vm1260_vm3, %v5153_v35  ;;  %3244 = vmatmul.mubr.msk.f32.vlgmr.msra.gmra.mxu1 %vm1260_vm3, %v5153_v35  ;;  %v1712_v4 = vrot.slane %v1695_v51, 5  ;;  %v1711_v8 = vsel %vm1242_vm1, %v1710_v1, %v1709_v13  ;;  %v2319_v51 = vld [vmem:[#allocation6 + $0x5] sm:$0x1]  ;;  %v2093_v13 = vld [vmem:[#allocation6 + $0x1c] sm:$0x1] }
 0x353   : > { %3248 = vmatprep.mubr.msk.f32.mxu0 %vm3522_vm5, %v3521_v26  ;;  %3253 = vmatprep.mubr.msk.f32.mxu1 %vm3522_vm5, %v3521_v26  ;;  %v1921_v18 = vadd.f32 %v1898_v17, %v1873_v10  ;;  %v1924_v39 = vadd.f32 %v1904_v46, %v1876_v11 }
 0x354   : > { %v1713_v31 = vsel %vm1245_vm7, %v1712_v4, %v1711_v8  ;;  %v2095_v8 = vld [vmem:[#allocation6 + $0x2c] sm:$0x1] }
 0x355   : > { %v1938_v54 = vsel %vm1239_vm10, %v1937_v23, %v1921_v18  ;;  %v1941_v46 = vrot.slane %v1924_v39, 5  ;;  %v3394_v12 = vpop.eup %3393  ;;  %v2321_v23 = vld [vmem:[#allocation6 + $0x15] sm:$0x1] }
 0x356   : > { %v1906_v6 = vpop.permute.xlu1 %1905  ;;  %v1677_v2 = vpop.permute.xlu0 %1676  ;;  %v1940_v21 = vsel %vm1242_vm1, %v1939_v19, %v1938_v54  ;;  %v2775_v54 = vld [vmem:[#allocation5 + $0x7] sm:$0x1] }
 0x357   : > { %v1925_v55 = vadd.f32 %v1906_v6, %v1877_v0  ;;  %v1696_v28 = vadd.f32 %v1677_v2, %v1648_v44  ;;  %v1880_v6 = vmul.f32 %v5166_v22, %v1868_v16  ;;  %v1651_v2 = vmul.f32 %v5169_v36, %v1639_v30  ;;  %v2092_v30 = vld [vmem:[#allocation6 + $0x14] sm:$0x1] }
 0x358   : > { %v1942_v9 = vsel %vm1245_vm7, %v1941_v46, %v1940_v21  ;;  %3397 = vrcp.f32 %v2775_v54 }
 0x35a   : > { %v1908_v20 = vpop.permute.xlu1 %1907  ;;  %v1679_v33 = vpop.permute.xlu0 %1678 }
 0x35b   : > { %v1926_v53 = vadd.f32 %v1908_v20, %v1878_v27  ;;  %v1697_v17 = vadd.f32 %v1679_v33, %v1649_v42  ;;  %v1943_v20 = vrot.slane %v1925_v55, 4  ;;  %v1714_v33 = vrot.slane %v1696_v28, 4  ;;  %v3396_v27 = vpop.eup %3395 }
 0x35d   : > { %v1945_v40 = vrot.slane %v1926_v53, 3  ;;  %v1716_v50 = vrot.slane %v1697_v17, 3  ;;  %v1944_v36 = vsel %vm1248_vm13, %v1943_v20, %v1942_v9  ;;  %v1715_v49 = vsel %vm1248_vm13, %v1714_v33, %v1713_v31  ;;  %v2322_v53 = vld [vmem:[#allocation6 + $0x1d] sm:$0x1]  ;;  %v2546_v17 = vld [vmem:[#allocation5 + $0x6] sm:$0x1] }
 0x35e   : > { %v5177_v38 = vpop.permute.xlu1 %2357  ;;  %v5179_v41 = vpop.permute.xlu0 %2128  ;;  %3399 = vrcp.f32 %v2546_v17 }
 0x35f   : > { %v1946_v60 = vsel %vm1251_vm4, %v1945_v40, %v1944_v36  ;;  %v1717_v61 = vsel %vm1251_vm4, %v1716_v50, %v1715_v49 }
 0x362   : > { %v1910_v48 = vpop.permute.xlu1 %1909  ;;  %v1681_v29 = vpop.permute.xlu0 %1680 }
 0x363   : > { %v1927_v34 = vadd.f32 %v1910_v48, %v1879_v15  ;;  %v1698_v3 = vadd.f32 %v1681_v29, %v1650_v62  ;;  %v5227_v48 = vrot.slane %v3394_v12, %v5099_v24  ;;  %v5230_v15 = vrot.slane %v3396_v27, %v5099_v24  ;;  %v2320_v29 = vld [vmem:[#allocation6 + $0xd] sm:$0x1]  ;;  %v2091_v62 = vld [vmem:[#allocation6 + $0xc] sm:$0x1] }
 0x365   : > { %v1947_v52 = vrot.slane %v1927_v34, 2  ;;  %v1718_v10 = vrot.slane %v1698_v3, 2  ;;  %v2332_v28 = vmul.f32 %v5227_v48, %v2320_v29  ;;  %v2103_v16 = vmul.f32 %v5230_v15, %v2091_v62  ;;  %v2323_v34 = vld [vmem:[#allocation6 + $0x25] sm:$0x1]  ;;  %v2094_v3 = vld [vmem:[#allocation6 + $0x24] sm:$0x1] }
 0x366   : > { %v5196_v7 = vpop.permute.xlu1 %2359  ;;  %v5198_v37 = vpop.permute.xlu0 %2130  ;;  %v2102_v19 = vmul.f32 %v5230_v15, %v2090_v57  ;;  %v2331_v1 = vmul.f32 %v5227_v48, %v2319_v51  ;;  %v2333_v4 = vmul.f32 %v5227_v48, %v2321_v23  ;;  %v2104_v46 = vmul.f32 %v5230_v15, %v2092_v30 }
 0x367   : > { %v1948_v14 = vsel %vm1254_vm0, %v1947_v52, %v1946_v60  ;;  %v1719_v43 = vsel %vm1254_vm0, %v1718_v10, %v1717_v61  ;;  %v2380_v33 = vadd.f32 %v5177_v38, %v2332_v28  ;;  %v2151_v40 = vadd.f32 %v5179_v41, %v2103_v16  ;;  %v2325_v52 = vld [vmem:[#allocation6 + $0x35] sm:$0x1]  ;;  %v2096_v10 = vld [vmem:[#allocation6 + $0x34] sm:$0x1] }
 0x368   : > { %v2334_v50 = vmul.f32 %v5227_v48, %v2322_v53  ;;  %v2381_v36 = vadd.f32 %v5196_v7, %v2333_v4  ;;  %v2152_v38 = vadd.f32 %v5198_v37, %v2104_v46  ;;  %v2337_v49 = vmul.f32 %v5227_v48, %v2325_v52 }
 0x369   : > { %v2108_v60 = vmul.f32 %v5230_v15, %v2096_v10  ;;  %v2395_v61 = vrot.slane %v2380_v33, 7 }
 0x36a   : > { %v1912_v5 = vpop.permute.xlu1 %1911  ;;  %v1683_v58 = vpop.permute.xlu0 %1682  ;;  %v2397_v29 = vrot.slane %v2381_v36, 6  ;;  %v2168_v62 = vrot.slane %v2152_v38, 6  ;;  %v2778_v36 = vld [vmem:[#allocation6 + $0xf] sm:$0x1]  ;;  %v2549_v38 = vld [vmem:[#allocation6 + $0xe] sm:$0x1] }
 0x36b   : > { %v1928_v63 = vadd.f32 %v1912_v5, %v1880_v6  ;;  %v1699_v22 = vadd.f32 %v1683_v58, %v1651_v2  ;;  %v2105_v6 = vmul.f32 %v5230_v15, %v2093_v13  ;;  %v2324_v2 = vld [vmem:[#allocation6 + $0x2d] sm:$0x1]  ;;  %v2335_v5 = vmul.f32 %v5227_v48, %v2323_v34  ;;  %v3398_v34 = vpop.eup %3397 }
 0x36c   : > { %v2106_v58 = vmul.f32 %v5230_v15, %v2094_v3 }
 0x36d   : > { %v1949_v32 = vrot.slane %v1928_v63, 1  ;;  %v1720_v11 = vrot.slane %v1699_v22, 1  ;;  %v2336_v63 = vmul.f32 %v5227_v48, %v2324_v2  ;;  %v2107_v22 = vmul.f32 %v5230_v15, %v2095_v8 }
 0x36e   : > { %v5212_v0 = vpop.permute.xlu1 %2132  ;;  %v2127_v44 = vpop.permute.xlu0 %2126 }
 0x36f   : > { %v1721_v56 = vsel %vm1257_vm15, %v1720_v11, %v1719_v43  ;;  %v1950_v18 = vsel %vm1257_vm15, %v1949_v32, %v1948_v14  ;;  %v2150_v9 = vadd.f32 %v2127_v44, %v2102_v19  ;;  %v2166_v32 = vrot.slane %v2151_v40, 7 }
 0x370   : > { %3247 = vmatpush3.msra.mxu0 %v1721_v56  ;;  %3252 = vmatpush3.msra.mxu1 %v1950_v18  ;;  %v2153_v11 = vadd.f32 %v5212_v0, %v2105_v6  ;;  %v2326_v56 = vld [vmem:[#allocation6 + $0x3d] sm:$0x1]  ;;  %v2097_v18 = vld [vmem:[#allocation6 + $0x3c] sm:$0x1] }
 0x371   : > { %3256 = vmatprep.subr.mxu0 %v3521_v26  ;;  %3261 = vmatprep.subr.mxu1 %v3521_v26  ;;  %v2167_v27 = vsel %vm1239_vm10, %v2166_v32, %v2150_v9  ;;  %v5274_v9 = vrot.slane %v3398_v34, %v5099_v24  ;;  %v2779_v32 = vld [vmem:[#allocation6 + $0x17] sm:$0x1] }
 0x372   : > { %v2362_v42 = vpop.permute.xlu1 %2361  ;;  %v2356_v59 = vpop.permute.xlu0 %2355  ;;  %3249 = vmatmul.mubr.msk.f32.vlgmr.msra.gmra.mxu0 %vm1260_vm3, %v5153_v35  ;;  %3254 = vmatmul.mubr.msk.f32.vlgmr.msra.gmra.mxu1 %vm1260_vm3, %v5153_v35  ;;  %v2170_v0 = vrot.slane %v2153_v11, 5  ;;  %v2169_v16 = vsel %vm1242_vm1, %v2168_v62, %v2167_v27  ;;  %v2550_v11 = vld [vmem:[#allocation6 + $0x16] sm:$0x1]  ;;  %v2552_v27 = vld [vmem:[#allocation6 + $0x26] sm:$0x1] }
 0x373   : > { %3258 = vmatprep.mubr.msk.f32.mxu0 %vm3522_vm5, %v3521_v26  ;;  %3263 = vmatprep.mubr.msk.f32.mxu1 %vm3522_vm5, %v3521_v26  ;;  %v2379_v31 = vadd.f32 %v2356_v59, %v2331_v1  ;;  %v2382_v14 = vadd.f32 %v2362_v42, %v2334_v50  ;;  %v2782_v62 = vld [vmem:[#allocation6 + $0x2f] sm:$0x1] }
 0x374   : > { %v2171_v4 = vsel %vm1245_vm7, %v2170_v0, %v2169_v16 }
 0x375   : > { %v2396_v7 = vsel %vm1239_vm10, %v2395_v61, %v2379_v31  ;;  %v2399_v42 = vrot.slane %v2382_v14, 5  ;;  %v2551_v14 = vld [vmem:[#allocation6 + $0x1e] sm:$0x1] }
 0x376   : > { %v2364_v25 = vpop.permute.xlu1 %2363  ;;  %v2135_v45 = vpop.permute.xlu0 %2134  ;;  %v2398_v30 = vsel %vm1242_vm1, %v2397_v29, %v2396_v7  ;;  %v2791_v7 = vmul.f32 %v5274_v9, %v2779_v32 }
 0x377   : > { %v2383_v43 = vadd.f32 %v2364_v25, %v2335_v5  ;;  %v2154_v44 = vadd.f32 %v2135_v45, %v2106_v58  ;;  %v2338_v25 = vmul.f32 %v5227_v48, %v2326_v56  ;;  %v2109_v45 = vmul.f32 %v5230_v15, %v2097_v18  ;;  %v3400_v15 = vpop.eup %3399  ;;  %v2781_v18 = vld [vmem:[#allocation6 + $0x27] sm:$0x1] }
 0x378   : > { %v2400_v3 = vsel %vm1245_vm7, %v2399_v42, %v2398_v30  ;;  %v5277_v31 = vrot.slane %v3400_v15, %v5099_v24  ;;  %v2790_v24 = vmul.f32 %v5274_v9, %v2778_v36  ;;  %v2793_v16 = vmul.f32 %v5274_v9, %v2781_v18  ;;  %v2555_v15 = vld [vmem:[#allocation6 + $0x3e] sm:$0x1] }
 0x37a   : > { %v2366_v39 = vpop.permute.xlu1 %2365  ;;  %v2137_v55 = vpop.permute.xlu0 %2136  ;;  %v2561_v61 = vmul.f32 %v5277_v31, %v2549_v38  ;;  %v2563_v0 = vmul.f32 %v5277_v31, %v2551_v14  ;;  %v2564_v30 = vmul.f32 %v5277_v31, %v2552_v27 }
 0x37b   : > { %v2384_v37 = vadd.f32 %v2366_v39, %v2336_v63  ;;  %v2155_v59 = vadd.f32 %v2137_v55, %v2107_v22  ;;  %v2401_v39 = vrot.slane %v2383_v43, 4  ;;  %v2172_v55 = vrot.slane %v2154_v44, 4  ;;  %v2780_v43 = vld [vmem:[#allocation6 + $0x1f] sm:$0x1] }
 0x37c   : > { %v2792_v42 = vmul.f32 %v5274_v9, %v2780_v43 }
 0x37d   : > { %v2403_v13 = vrot.slane %v2384_v37, 3  ;;  %v2174_v54 = vrot.slane %v2155_v59, 3  ;;  %v2402_v6 = vsel %vm1248_vm13, %v2401_v39, %v2400_v3  ;;  %v2173_v2 = vsel %vm1248_vm13, %v2172_v55, %v2171_v4 }
 0x37e   : > { %v5239_v21 = vpop.permute.xlu1 %2815  ;;  %v5241_v20 = vpop.permute.xlu0 %2586  ;;  %v2562_v37 = vmul.f32 %v5277_v31, %v2550_v11 }
 0x37f   : > { %v2404_v8 = vsel %vm1251_vm4, %v2403_v13, %v2402_v6  ;;  %v2175_v33 = vsel %vm1251_vm4, %v2174_v54, %v2173_v2  ;;  %v2794_v13 = vmul.f32 %v5274_v9, %v2782_v62 }
 0x382   : > { %v2368_v41 = vpop.permute.xlu1 %2367  ;;  %v2139_v12 = vpop.permute.xlu0 %2138 }
 0x383   : > { %v2385_v23 = vadd.f32 %v2368_v41, %v2337_v49  ;;  %v2156_v57 = vadd.f32 %v2139_v12, %v2108_v60  ;;  %v2548_v41 = vld [vmem:[#allocation6 + $0x6] sm:$0x1]  ;;  %v2777_v12 = vld [vmem:[#allocation6 + $0x7] sm:$0x1] }
 0x384   : > { %v2560_v44 = vmul.f32 %v5277_v31, %v2548_v41  ;;  %v2789_v56 = vmul.f32 %v5274_v9, %v2777_v12 }
 0x385   : > { %v2405_v53 = vrot.slane %v2385_v23, 2  ;;  %v2176_v17 = vrot.slane %v2156_v57, 2  ;;  %v2553_v23 = vld [vmem:[#allocation6 + $0x2e] sm:$0x1]  ;;  %v2838_v57 = vadd.f32 %v5239_v21, %v2790_v24 }
 0x386   : > { %v5257_v51 = vpop.permute.xlu1 %2817  ;;  %v5259_v28 = vpop.permute.xlu0 %2588  ;;  %v2565_v54 = vmul.f32 %v5277_v31, %v2553_v23 }
 0x387   : > { %v2406_v52 = vsel %vm1254_vm0, %v2405_v53, %v2404_v8  ;;  %v2177_v10 = vsel %vm1254_vm0, %v2176_v17, %v2175_v33  ;;  %v2839_v21 = vadd.f32 %v5257_v51, %v2791_v7  ;;  %v2853_v34 = vrot.slane %v2838_v57, 7 }
 0x38a   : > { %v2370_v19 = vpop.permute.xlu1 %2369  ;;  %v2141_v1 = vpop.permute.xlu0 %2140 }
 0x38b   : > { %v2386_v48 = vadd.f32 %v2370_v19, %v2338_v25  ;;  %v2157_v46 = vadd.f32 %v2141_v1, %v2109_v45  ;;  %v2783_v25 = vld [vmem:[#allocation6 + $0x37] sm:$0x1]  ;;  %v2554_v45 = vld [vmem:[#allocation6 + $0x36] sm:$0x1] }
 0x38c   : > { %v2795_v19 = vmul.f32 %v5274_v9, %v2783_v25  ;;  %v2566_v1 = vmul.f32 %v5277_v31, %v2554_v45 }
 0x38d   : > { %v2407_v40 = vrot.slane %v2386_v48, 1  ;;  %v2178_v50 = vrot.slane %v2157_v46, 1  ;;  %v2784_v46 = vld [vmem:[#allocation6 + $0x3f] sm:$0x1] }
 0x38e   : > { %v2591_v5 = vpop.permute.xlu1 %2590  ;;  %v2585_v58 = vpop.permute.xlu0 %2584 }
 0x38f   : > { %v2179_v63 = vsel %vm1257_vm15, %v2178_v50, %v2177_v10  ;;  %v2408_v22 = vsel %vm1257_vm15, %v2407_v40, %v2406_v52  ;;  %v2608_v39 = vadd.f32 %v2585_v58, %v2560_v44  ;;  %v2611_v4 = vadd.f32 %v2591_v5, %v2563_v0 }
 0x390   : > { %3257 = vmatpush3.msra.mxu0 %v2179_v63  ;;  %3262 = vmatpush3.msra.mxu1 %v2408_v22  ;;  %v2855_v40 = vrot.slane %v2839_v21, 6  ;;  %v2796_v58 = vmul.f32 %v5274_v9, %v2784_v46  ;;  %v2567_v63 = vmul.f32 %v5277_v31, %v2555_v15  ;;  %v3524_v0 = vmov 1966171168  }
 0x391   : > { %3259 = vmatmul.mubr.msk.f32.vlgmr.msra.gmra.mxu0 %vm1260_vm3, %v5153_v35  ;;  %3264 = vmatmul.mubr.msk.f32.vlgmr.msra.gmra.mxu1 %vm1260_vm3, %v5153_v35  ;;  %v2628_v5 = vrot.slane %v2611_v4, 5 }
 0x392   : > { %v2820_v49 = vpop.permute.xlu1 %2819  ;;  %v2814_v60 = vpop.permute.xlu0 %2813  ;;  %3266 = vmatprep.subr.mxu0 %v3521_v26  ;;  %3271 = vmatprep.subr.mxu1 %v3521_v26 }
 0x393   : > { %3268 = vmatprep.mubr.msk.f32.mxu0 %vm3522_vm5, %v3521_v26  ;;  %3273 = vmatprep.mubr.msk.f32.mxu1 %vm3522_vm5, %v3521_v26  ;;  %v2609_v26 = vadd.f32 %v5241_v20, %v2561_v61  ;;  %v2837_v55 = vadd.f32 %v2814_v60, %v2789_v56  ;;  %v2610_v20 = vadd.f32 %v5259_v28, %v2562_v37 }
 0x394   : > { %v2840_v48 = vadd.f32 %v2820_v49, %v2792_v42  ;;  %v1337_v42 = vunpack.c.l.s4 %v3524_v0 }
 0x395   : > { %v2624_v3 = vrot.slane %v2609_v26, 7  ;;  %v2854_v51 = vsel %vm1239_vm10, %v2853_v34, %v2837_v55  ;;  %v2626_v50 = vrot.slane %v2610_v20, 6 }
 0x396   : > { %v2822_v59 = vpop.permute.xlu1 %2821  ;;  %v2593_v29 = vpop.permute.xlu0 %2592  ;;  %v2857_v22 = vrot.slane %v2840_v48, 5  ;;  %v2856_v49 = vsel %vm1242_vm1, %v2855_v40, %v2854_v51  ;;  %v1338_v25 = vunpack.c.0.s8 %v1337_v42 }
 0x397   : > { %v2841_v6 = vadd.f32 %v2822_v59, %v2793_v16  ;;  %v2612_v2 = vadd.f32 %v2593_v29, %v2564_v30  ;;  %v2625_v8 = vsel %vm1239_vm10, %v2624_v3, %v2608_v39 }
 0x398   : > { %v2627_v41 = vsel %vm1242_vm1, %v2626_v50, %v2625_v8  ;;  %v2858_v9 = vsel %vm1245_vm7, %v2857_v22, %v2856_v49  ;;  %v5332_v16 = vsub.s32 %v1338_v25, %v5091_v47 }
 0x399   : > { %v2859_v12 = vrot.slane %v2841_v6, 4  ;;  %v2630_v60 = vrot.slane %v2612_v2, 4  ;;  %v2629_v31 = vsel %vm1245_vm7, %v2628_v5, %v2627_v41 }
 0x39a   : > { %v2824_v53 = vpop.permute.xlu1 %2823  ;;  %v2595_v17 = vpop.permute.xlu0 %2594 }
 0x39b   : > { %v2842_v33 = vadd.f32 %v2824_v53, %v2794_v13  ;;  %v2613_v28 = vadd.f32 %v2595_v17, %v2565_v54  ;;  %v2860_v18 = vsel %vm1248_vm13, %v2859_v12, %v2858_v9  ;;  %v2631_v27 = vsel %vm1248_vm13, %v2630_v60, %v2629_v31 }
 0x39d   : > { %v2861_v24 = vrot.slane %v2842_v33, 3  ;;  %v2632_v61 = vrot.slane %v2613_v28, 3 }
 0x39e   : > { %v2826_v52 = vpop.permute.xlu1 %2825  ;;  %v2597_v10 = vpop.permute.xlu0 %2596 }
 0x39f   : > { %v2843_v36 = vadd.f32 %v2826_v52, %v2795_v19  ;;  %v2614_v38 = vadd.f32 %v2597_v10, %v2566_v1  ;;  %v2862_v7 = vsel %vm1251_vm4, %v2861_v24, %v2860_v18  ;;  %v2633_v37 = vsel %vm1251_vm4, %v2632_v61, %v2631_v27 }
 0x3a1   : > { %v2863_v32 = vrot.slane %v2843_v36, 2  ;;  %v2634_v11 = vrot.slane %v2614_v38, 2 }
 0x3a2   : > { %v2828_v14 = vpop.permute.xlu1 %2827  ;;  %v2599_v43 = vpop.permute.xlu0 %2598 }
 0x3a3   : > { %v2844_v44 = vadd.f32 %v2828_v14, %v2796_v58  ;;  %v2615_v56 = vadd.f32 %v2599_v43, %v2567_v63  ;;  %v2864_v62 = vsel %vm1254_vm0, %v2863_v32, %v2862_v7  ;;  %v2635_v23 = vsel %vm1254_vm0, %v2634_v11, %v2633_v37 }
 0x3a5   : > { %v2865_v59 = vrot.slane %v2844_v44, 1  ;;  %v2636_v29 = vrot.slane %v2615_v56, 1 }
 0x3a7   : > { %v2637_v57 = vsel %vm1257_vm15, %v2636_v29, %v2635_v23  ;;  %v2866_v26 = vsel %vm1257_vm15, %v2865_v59, %v2864_v62 }
 0x3a8   : > { %3267 = vmatpush3.msra.mxu0 %v2637_v57  ;;  %3272 = vmatpush3.msra.mxu1 %v2866_v26 }
 0x3a9   : > { %3269 = vmatmul.mubr.msk.f32.vlgmr.msra.gmra.mxu0 %vm1260_vm3, %v5153_v35  ;;  %3274 = vmatmul.mubr.msk.f32.vlgmr.msra.gmra.mxu1 %vm1260_vm3, %v5153_v35 }
 0x3af   : > { %v5329_v45 = vpop.permute.xlu0 %1227 }
 0x412   : > { %v1330_v30 = vpop.f32.mrf.mxu0  ;;  %v1560_v39 = vpop.f32.mrf.mxu1 }
 0x413   : > { %v1331_v55 = vadd.f32 %v1330_v30, %v5329_v45  ;;  %v1561_v13 = vadd.f32 %v1560_v39, %v5329_v45 }
 0x414   : > { %v3240_v54 = vpop.f32.mrf.mxu0  ;;  %v3245_v21 = vpop.f32.mrf.mxu1 }
 0x415   : > { %v1335_v20 = vcombine.high %v1331_v55, %v1331_v55  ;;  %v1342_v35 = vrot.slane %v1331_v55, %v5332_v16  ;;  %v1565_v53 = vcombine.high %v1561_v13, %v1561_v13  ;;  %v1572_v17 = vrot.slane %v1561_v13, %v5332_v16 }
 0x417   : > { %v1349_v47 = vrot.slane %v1335_v20, %v5332_v16  ;;  %v1350_v19 = vcombine.high %v1342_v35, %v1342_v35  ;;  %v1358_v1 = vrot.slane %v1342_v35, %v5332_v16  ;;  %v1579_v34 = vrot.slane %v1565_v53, %v5332_v16 }
 0x418   : > { %v1580_v3 = vcombine.high %v1572_v17, %v1572_v17  ;;  %v1588_v4 = vrot.slane %v1572_v17, %v5332_v16 }
 0x419   : > { %v1351_v48 = vcombine.high %v1349_v47, %v1349_v47  ;;  %v1365_v46 = vrot.slane %v1349_v47, %v5332_v16  ;;  %v1372_v15 = vrot.slane %v1350_v19, %v5332_v16  ;;  %v1380_v6 = vcombine.high %v1358_v1, %v1358_v1  ;;  %1393 = vst.msk [vmem:[%s3656_s11] sm:$0x1] %vm1392_vm2, %v1358_v1 }
 0x41a   : > { %v1581_v2 = vcombine.high %v1579_v34, %v1579_v34  ;;  %v1595_v8 = vrot.slane %v1579_v34, %v5332_v16  ;;  %v1602_v51 = vrot.slane %v1580_v3, %v5332_v16  ;;  %v1610_v33 = vcombine.high %v1588_v4, %v1588_v4  ;;  %1622 = vst.msk [vmem:[%s3656_s11 + $0x1] sm:$0x1] %vm1392_vm2, %v1588_v4 }
 0x41b   : > { %v1379_v28 = vrot.slane %v1351_v48, %v5332_v16  ;;  %v1381_v40 = vcombine.high %v1365_v46, %v1365_v46  ;;  %v1382_v50 = vcombine.high %v1372_v15, %v1372_v15  ;;  %1394 = vst.msk [vmem:[%s3656_s11 + $0x8] sm:$0x1] %vm1392_vm2, %v1372_v15  ;;  %1395 = vst.msk [vmem:[%s3656_s11 + $0x10] sm:$0x1] %vm1392_vm2, %v1380_v6 }
 0x41c   : > { %1397 = vst.msk [vmem:[%s3656_s11 + $0x20] sm:$0x1] %vm1392_vm2, %v1365_v46  ;;  %v1609_v52 = vrot.slane %v1581_v2, %v5332_v16  ;;  %v1611_v10 = vcombine.high %v1595_v8, %v1595_v8  ;;  %v1612_v58 = vcombine.high %v1602_v51, %v1602_v51  ;;  %1623 = vst.msk [vmem:[%s3656_s11 + $0x9] sm:$0x1] %vm1392_vm2, %v1602_v51 }
 0x41d   : > { %1624 = vst.msk [vmem:[%s3656_s11 + $0x11] sm:$0x1] %vm1392_vm2, %v1610_v33  ;;  %1626 = vst.msk [vmem:[%s3656_s11 + $0x21] sm:$0x1] %vm1392_vm2, %v1595_v8  ;;  %v1383_v63 = vcombine.high %v1379_v28, %v1379_v28 }
 0x41e   : > { %1396 = vst.msk [vmem:[%s3656_s11 + $0x18] sm:$0x1] %vm1392_vm2, %v1382_v50  ;;  %1398 = vst.msk [vmem:[%s3656_s11 + $0x28] sm:$0x1] %vm1392_vm2, %v1379_v28  ;;  %v1613_v5 = vcombine.high %v1609_v52, %v1609_v52 }
 0x41f   : > { %1399 = vst.msk [vmem:[%s3656_s11 + $0x30] sm:$0x1] %vm1392_vm2, %v1381_v40  ;;  %1625 = vst.msk [vmem:[%s3656_s11 + $0x19] sm:$0x1] %vm1392_vm2, %v1612_v58 }
 0x420   : > { %1627 = vst.msk [vmem:[%s3656_s11 + $0x29] sm:$0x1] %vm1392_vm2, %v1609_v52  ;;  %1628 = vst.msk [vmem:[%s3656_s11 + $0x31] sm:$0x1] %vm1392_vm2, %v1611_v10 }
 0x421   : > { %1400 = vst.msk [vmem:[%s3656_s11 + $0x38] sm:$0x1] %vm1392_vm2, %v1383_v63  ;;  %1629 = vst.msk [vmem:[%s3656_s11 + $0x39] sm:$0x1] %vm1392_vm2, %v1613_v5 }
 0x432   : > { %v1789_v22 = vpop.f32.mrf.mxu0  ;;  %v2018_v36 = vpop.f32.mrf.mxu1 }
 0x433   : > { %v1790_v38 = vadd.f32 %v1789_v22, %v5329_v45  ;;  %v2019_v41 = vadd.f32 %v2018_v36, %v5329_v45 }
 0x434   : > { %v3250_v49 = vpop.f32.mrf.mxu0  ;;  %v3255_v12 = vpop.f32.mrf.mxu1 }
 0x435   : > { %v1794_v60 = vcombine.high %v1790_v38, %v1790_v38  ;;  %v1801_v24 = vrot.slane %v1790_v38, %v5332_v16  ;;  %v2023_v61 = vcombine.high %v2019_v41, %v2019_v41  ;;  %v2030_v32 = vrot.slane %v2019_v41, %v5332_v16 }
 0x437   : > { %v1808_v11 = vrot.slane %v1794_v60, %v5332_v16  ;;  %v1809_v14 = vcombine.high %v1801_v24, %v1801_v24  ;;  %v1817_v43 = vrot.slane %v1801_v24, %v5332_v16  ;;  %v2037_v9 = vrot.slane %v2023_v61, %v5332_v16 }
 0x438   : > { %v2038_v31 = vcombine.high %v2030_v32, %v2030_v32  ;;  %v2046_v44 = vrot.slane %v2030_v32, %v5332_v16 }
 0x439   : > { %v1810_v56 = vcombine.high %v1808_v11, %v1808_v11  ;;  %v1824_v18 = vrot.slane %v1808_v11, %v5332_v16  ;;  %v1831_v27 = vrot.slane %v1809_v14, %v5332_v16  ;;  %v1839_v7 = vcombine.high %v1817_v43, %v1817_v43  ;;  %1851 = vst.msk [vmem:[%s3656_s11 + $0x2] sm:$0x1] %vm1392_vm2, %v1817_v43 }
 0x43a   : > { %v2039_v37 = vcombine.high %v2037_v9, %v2037_v9  ;;  %v2053_v59 = vrot.slane %v2037_v9, %v5332_v16  ;;  %v2060_v29 = vrot.slane %v2038_v31, %v5332_v16  ;;  %v2068_v62 = vcombine.high %v2046_v44, %v2046_v44  ;;  %2080 = vst.msk [vmem:[%s3656_s11 + $0x3] sm:$0x1] %vm1392_vm2, %v2046_v44 }
 0x43b   : > { %v1838_v23 = vrot.slane %v1810_v56, %v5332_v16  ;;  %v1840_v57 = vcombine.high %v1824_v18, %v1824_v18  ;;  %v1841_v26 = vcombine.high %v1831_v27, %v1831_v27  ;;  %1852 = vst.msk [vmem:[%s3656_s11 + $0xa] sm:$0x1] %vm1392_vm2, %v1831_v27  ;;  %1853 = vst.msk [vmem:[%s3656_s11 + $0x12] sm:$0x1] %vm1392_vm2, %v1839_v7 }
 0x43c   : > { %1855 = vst.msk [vmem:[%s3656_s11 + $0x22] sm:$0x1] %vm1392_vm2, %v1824_v18  ;;  %v2067_v0 = vrot.slane %v2039_v37, %v5332_v16  ;;  %v2069_v42 = vcombine.high %v2053_v59, %v2053_v59  ;;  %v2070_v25 = vcombine.high %v2060_v29, %v2060_v29  ;;  %2081 = vst.msk [vmem:[%s3656_s11 + $0xb] sm:$0x1] %vm1392_vm2, %v2060_v29 }
 0x43d   : > { %2082 = vst.msk [vmem:[%s3656_s11 + $0x13] sm:$0x1] %vm1392_vm2, %v2068_v62  ;;  %2084 = vst.msk [vmem:[%s3656_s11 + $0x23] sm:$0x1] %vm1392_vm2, %v2053_v59  ;;  %v1842_v30 = vcombine.high %v1838_v23, %v1838_v23 }
 0x43e   : > { %1854 = vst.msk [vmem:[%s3656_s11 + $0x1a] sm:$0x1] %vm1392_vm2, %v1841_v26  ;;  %1856 = vst.msk [vmem:[%s3656_s11 + $0x2a] sm:$0x1] %vm1392_vm2, %v1838_v23  ;;  %v2071_v39 = vcombine.high %v2067_v0, %v2067_v0 }
 0x43f   : > { %1857 = vst.msk [vmem:[%s3656_s11 + $0x32] sm:$0x1] %vm1392_vm2, %v1840_v57  ;;  %2083 = vst.msk [vmem:[%s3656_s11 + $0x1b] sm:$0x1] %vm1392_vm2, %v2070_v25 }
 0x440   : > { %2085 = vst.msk [vmem:[%s3656_s11 + $0x2b] sm:$0x1] %vm1392_vm2, %v2067_v0  ;;  %2086 = vst.msk [vmem:[%s3656_s11 + $0x33] sm:$0x1] %vm1392_vm2, %v2069_v42 }
 0x441   : > { %1858 = vst.msk [vmem:[%s3656_s11 + $0x3a] sm:$0x1] %vm1392_vm2, %v1842_v30  ;;  %2087 = vst.msk [vmem:[%s3656_s11 + $0x3b] sm:$0x1] %vm1392_vm2, %v2071_v39 }
 0x451   : > { %v2247_v55 = vpop.f32.mrf.mxu0  ;;  %v2476_v13 = vpop.f32.mrf.mxu1 }
 0x452   : > { %v2248_v54 = vadd.f32 %v2247_v55, %v5329_v45  ;;  %v2477_v21 = vadd.f32 %v2476_v13, %v5329_v45 }
 0x453   : > { %v3260_v20 = vpop.f32.mrf.mxu0  ;;  %v3265_v35 = vpop.f32.mrf.mxu1 }
 0x454   : > { %v2252_v53 = vcombine.high %v2248_v54, %v2248_v54  ;;  %v2259_v17 = vrot.slane %v2248_v54, %v5332_v16  ;;  %v2481_v47 = vcombine.high %v2477_v21, %v2477_v21  ;;  %v2488_v19 = vrot.slane %v2477_v21, %v5332_v16 }
 0x456   : > { %v2266_v1 = vrot.slane %v2252_v53, %v5332_v16  ;;  %v2267_v34 = vcombine.high %v2259_v17, %v2259_v17  ;;  %v2275_v3 = vrot.slane %v2259_v17, %v5332_v16  ;;  %v2495_v4 = vrot.slane %v2481_v47, %v5332_v16 }
 0x457   : > { %v2496_v48 = vcombine.high %v2488_v19, %v2488_v19  ;;  %v2504_v46 = vrot.slane %v2488_v19, %v5332_v16 }
 0x458   : > { %v2268_v15 = vcombine.high %v2266_v1, %v2266_v1  ;;  %v2282_v6 = vrot.slane %v2266_v1, %v5332_v16  ;;  %v2289_v2 = vrot.slane %v2267_v34, %v5332_v16  ;;  %v2297_v8 = vcombine.high %v2275_v3, %v2275_v3  ;;  %2309 = vst.msk [vmem:[%s3656_s11 + $0x4] sm:$0x1] %vm1392_vm2, %v2275_v3 }
 0x459   : > { %v2497_v51 = vcombine.high %v2495_v4, %v2495_v4  ;;  %v2511_v33 = vrot.slane %v2495_v4, %v5332_v16  ;;  %v2518_v28 = vrot.slane %v2496_v48, %v5332_v16  ;;  %v2526_v40 = vcombine.high %v2504_v46, %v2504_v46  ;;  %2538 = vst.msk [vmem:[%s3656_s11 + $0x5] sm:$0x1] %vm1392_vm2, %v2504_v46 }
 0x45a   : > { %v2296_v50 = vrot.slane %v2268_v15, %v5332_v16  ;;  %v2298_v52 = vcombine.high %v2282_v6, %v2282_v6  ;;  %v2299_v10 = vcombine.high %v2289_v2, %v2289_v2  ;;  %2310 = vst.msk [vmem:[%s3656_s11 + $0xc] sm:$0x1] %vm1392_vm2, %v2289_v2  ;;  %2311 = vst.msk [vmem:[%s3656_s11 + $0x14] sm:$0x1] %vm1392_vm2, %v2297_v8 }
 0x45b   : > { %2313 = vst.msk [vmem:[%s3656_s11 + $0x24] sm:$0x1] %vm1392_vm2, %v2282_v6  ;;  %v2525_v58 = vrot.slane %v2497_v51, %v5332_v16  ;;  %v2527_v63 = vcombine.high %v2511_v33, %v2511_v33  ;;  %v2528_v5 = vcombine.high %v2518_v28, %v2518_v28  ;;  %2539 = vst.msk [vmem:[%s3656_s11 + $0xd] sm:$0x1] %vm1392_vm2, %v2518_v28 }
 0x45c   : > { %2540 = vst.msk [vmem:[%s3656_s11 + $0x15] sm:$0x1] %vm1392_vm2, %v2526_v40  ;;  %2542 = vst.msk [vmem:[%s3656_s11 + $0x25] sm:$0x1] %vm1392_vm2, %v2511_v33  ;;  %v2300_v22 = vcombine.high %v2296_v50, %v2296_v50 }
 0x45d   : > { %2312 = vst.msk [vmem:[%s3656_s11 + $0x1c] sm:$0x1] %vm1392_vm2, %v2299_v10  ;;  %2314 = vst.msk [vmem:[%s3656_s11 + $0x2c] sm:$0x1] %vm1392_vm2, %v2296_v50  ;;  %v2529_v36 = vcombine.high %v2525_v58, %v2525_v58 }
 0x45e   : > { %2315 = vst.msk [vmem:[%s3656_s11 + $0x34] sm:$0x1] %vm1392_vm2, %v2298_v52  ;;  %2541 = vst.msk [vmem:[%s3656_s11 + $0x1d] sm:$0x1] %vm1392_vm2, %v2528_v5 }
 0x45f   : > { %2543 = vst.msk [vmem:[%s3656_s11 + $0x2d] sm:$0x1] %vm1392_vm2, %v2525_v58  ;;  %2544 = vst.msk [vmem:[%s3656_s11 + $0x35] sm:$0x1] %vm1392_vm2, %v2527_v63 }
 0x460   : > { %2316 = vst.msk [vmem:[%s3656_s11 + $0x3c] sm:$0x1] %vm1392_vm2, %v2300_v22  ;;  %2545 = vst.msk [vmem:[%s3656_s11 + $0x3d] sm:$0x1] %vm1392_vm2, %v2529_v36 }
 0x469   : > { %v2705_v38 = vpop.f32.mrf.mxu0  ;;  %v2934_v41 = vpop.f32.mrf.mxu1 }
 0x46a   : > { %v2706_v49 = vadd.f32 %v2705_v38, %v5329_v45  ;;  %v2935_v12 = vadd.f32 %v2934_v41, %v5329_v45 }
 0x46b   : > { %v3270_v60 = vpop.f32.mrf.mxu0  ;;  %v3275_v24 = vpop.f32.mrf.mxu1 }
 0x46c   : > { %v2710_v61 = vcombine.high %v2706_v49, %v2706_v49  ;;  %v2717_v32 = vrot.slane %v2706_v49, %v5332_v16  ;;  %v2939_v11 = vcombine.high %v2935_v12, %v2935_v12  ;;  %v2946_v14 = vrot.slane %v2935_v12, %v5332_v16 }
 0x46e   : > { %v2724_v43 = vrot.slane %v2710_v61, %v5332_v16  ;;  %v2725_v9 = vcombine.high %v2717_v32, %v2717_v32  ;;  %v2733_v31 = vrot.slane %v2717_v32, %v5332_v16  ;;  %v2953_v44 = vrot.slane %v2939_v11, %v5332_v16 }
 0x46f   : > { %v2954_v56 = vcombine.high %v2946_v14, %v2946_v14  ;;  %v2962_v45 = vrot.slane %v2946_v14, %v5332_v16 }
 0x470   : > { %v2726_v18 = vcombine.high %v2724_v43, %v2724_v43  ;;  %v2740_v27 = vrot.slane %v2724_v43, %v5332_v16  ;;  %v2747_v7 = vrot.slane %v2725_v9, %v5332_v16  ;;  %v2755_v37 = vcombine.high %v2733_v31, %v2733_v31  ;;  %2767 = vst.msk [vmem:[%s3656_s11 + $0x6] sm:$0x1] %vm1392_vm2, %v2733_v31 }
 0x471   : > { %v2955_v59 = vcombine.high %v2953_v44, %v2953_v44  ;;  %v2969_v29 = vrot.slane %v2953_v44, %v5332_v16  ;;  %v2976_v62 = vrot.slane %v2954_v56, %v5332_v16  ;;  %v2984_v23 = vcombine.high %v2962_v45, %v2962_v45  ;;  %2996 = vst.msk [vmem:[%s3656_s11 + $0x7] sm:$0x1] %vm1392_vm2, %v2962_v45 }
 0x472   : > { %v2754_v57 = vrot.slane %v2726_v18, %v5332_v16  ;;  %v2756_v26 = vcombine.high %v2740_v27, %v2740_v27  ;;  %v2757_v0 = vcombine.high %v2747_v7, %v2747_v7  ;;  %2768 = vst.msk [vmem:[%s3656_s11 + $0xe] sm:$0x1] %vm1392_vm2, %v2747_v7  ;;  %2769 = vst.msk [vmem:[%s3656_s11 + $0x16] sm:$0x1] %vm1392_vm2, %v2755_v37 }
 0x473   : > { %2771 = vst.msk [vmem:[%s3656_s11 + $0x26] sm:$0x1] %vm1392_vm2, %v2740_v27  ;;  %v2983_v42 = vrot.slane %v2955_v59, %v5332_v16  ;;  %v2985_v25 = vcombine.high %v2969_v29, %v2969_v29  ;;  %v2986_v30 = vcombine.high %v2976_v62, %v2976_v62  ;;  %2997 = vst.msk [vmem:[%s3656_s11 + $0xf] sm:$0x1] %vm1392_vm2, %v2976_v62 }
 0x474   : > { %2998 = vst.msk [vmem:[%s3656_s11 + $0x17] sm:$0x1] %vm1392_vm2, %v2984_v23  ;;  %3000 = vst.msk [vmem:[%s3656_s11 + $0x27] sm:$0x1] %vm1392_vm2, %v2969_v29  ;;  %v2758_v39 = vcombine.high %v2754_v57, %v2754_v57 }
 0x475   : > { %2770 = vst.msk [vmem:[%s3656_s11 + $0x1e] sm:$0x1] %vm1392_vm2, %v2757_v0  ;;  %2772 = vst.msk [vmem:[%s3656_s11 + $0x2e] sm:$0x1] %vm1392_vm2, %v2754_v57  ;;  %v2987_v55 = vcombine.high %v2983_v42, %v2983_v42 }
 0x476   : > { %2773 = vst.msk [vmem:[%s3656_s11 + $0x36] sm:$0x1] %vm1392_vm2, %v2756_v26  ;;  %2999 = vst.msk [vmem:[%s3656_s11 + $0x1f] sm:$0x1] %vm1392_vm2, %v2986_v30 }
 0x477   : > { %3001 = vst.msk [vmem:[%s3656_s11 + $0x2f] sm:$0x1] %vm1392_vm2, %v2983_v42  ;;  %3002 = vst.msk [vmem:[%s3656_s11 + $0x37] sm:$0x1] %vm1392_vm2, %v2985_v25 }
 0x478   : > { %2774 = vst.msk [vmem:[%s3656_s11 + $0x3e] sm:$0x1] %vm1392_vm2, %v2758_v39  ;;  %3003 = vst.msk [vmem:[%s3656_s11 + $0x3f] sm:$0x1] %vm1392_vm2, %v2987_v55 }
 0x479 PF: > { %s3214_s6 = sshll.u32 %s3493_s20, 4  ;;  %s3019_s8 = sshll.u32 %s3656_s11, 4  ;;  %s5521_s8 = int_to_ptr.vmem [resolvable:$true] %s3019_s8 }
 0x47a   : > { %s3016_s7 = sadd.s32 %s3489_s19, %s3214_s6  ;;  %s5764_s12 = sand.u32 1, %s3477_s16  }
 0x47b   : > { %s3215_s9 = sshll.u32 %s3016_s7, 7  ;;  %s5530_s13 = scalar_lea.sflag [#allocation8], %s5764_s12 }
 0x47c   : > { %s5526_s28 = scalar_lea.hbm %s5591_s4, %s3215_s9  ;;  %s3401_s14 = scalar_lea.vmem %s5521_s8, 1024 }
 0x47d   : > { %p3402_p3 = scmp.ne.s32.totalorder %s5521_s8, %s3401_s14  ;;  %s3525_s19 = smov [#allocation7]  }
 0x47e   : > { %s3405_s20 = sshll.u32 %s3525_s19, 4  ;;  %s3406_s20 = int_to_ptr.vmem [resolvable:$false] %s3405_s20 }
 0x47f   : > { %p3403_p4 = pnand %p3402_p3, %p3616_p6  ;;  %s3407_s11 = scalar_lea.vmem %s3406_s20, 2048 }
 0x480   : > { %p3408_p8 = scmp.lt.s32.totalorder %s5521_s8, %s3406_s20  ;;  %p3409_p9 = scmp.lt.s32.totalorder %s3407_s11, %s3401_s14 }
 0x481   : > { %p3404_p5 = pneg %p3403_p4 }
 0x482   : > { %p3410_p10 = por %p3409_p9, %p3408_p8 }
 0x484   : > { %p3411_p11 = pnand %p3410_p10, %p3404_p5 }
 0x486   : > { %3414 = shalt.err (!%p3411_p11)
}
 0x487   : > { %s3415_s22 = scalar_lea.hbm %s5526_s28, 1024  ;;  %s3419_s29 = scalar_lea.hbm %s5591_s4, 4096 }
 0x488   : > { %p3416_p12 = scmp.ne.s32.totalorder %s5526_s28, %s3415_s22  ;;  %p3420_p1 = scmp.lt.s32.totalorder %s5526_s28, %s5591_s4 }
 0x489   : > { %p3421_p2 = scmp.lt.s32.totalorder %s3419_s29, %s3415_s22 }
 0x48a   : > { %p3417_p13 = pnand %p3416_p12, %p3616_p6 }
 0x48b   : > { %p3422_p3 = por %p3421_p2, %p3420_p1 }
 0x48c   : > { %p3418_p0 = pneg %p3417_p13 }
 0x48e   : > { %p3423_p4 = pnand %p3422_p3, %p3418_p0 }
 0x490   : > { %3426 = shalt.err (!%p3423_p4)
}
 0x491   : > { %s3526_s7 = smov 128   ;;  %s3527_s9 = smov 256  }
 0x492   : > { %s3528_s23 = smov 8  }
 0x493   : > { %3276 = dma.vmem_to_hbm [thread:$0]  (%p3616_p6), %s5521_s8, 1024, %s5526_s28, %s5530_s13, %s3526_s7, %s3527_s9, %s3528_s23  }
 0x494 PF: > { %p3282_p5 = scmp.ge.s32.totalorder %s3509_s24, 2  ;;  %s3034_s27 = sand.u32 1, %s3473_s15  }
 0x495   : > { %s3035_s12 = scalar_lea.sflag [#allocation8], %s3034_s27 }
 0x496   : > { %p3279_p8 = pnand %p3282_p5, %p3623_p7 }
 0x498   : > { %p3280_p9 = pneg %p3279_p8 }
 0x49a   : > { %3468 = dma.done.wait (%p3280_p9), %s3035_s12, 1024  }
 0x49b   : > { %3470 = vsyncadd (%p3280_p9), %s3035_s12, 4294966272  ;;  %s17_s24 = sadd.s32 1, %s3509_s24   ;;  %s5765_s19 = sld [smem:[#allocation10_spill]] }
 0x49c   : > { %p14_p10 = scmp.ge.s32.totalorder %s17_s24, 10   ;;  %s5766_s20 = sld [smem:[#allocation11_spill]] }
 0x49d   : > { %s5767_s30 = sld [smem:[#allocation12_spill]]  ;;  %s5770_s15 = smov %s3477_s16 }
 0x49e   : > { %s5768_s22 = sld [smem:[#allocation13_spill]]  ;;  %s5771_s16 = smov %s3481_s17 }
 0x49f   : > { %s5769_s23 = sld [smem:[#allocation14_spill]]  ;;  %s5772_s17 = smov %s3637_s10 }
 0x4a0   : > { %s5773_s18 = smov %s3497_s21  ;;  %16 = sbr.rel (!%p14_p10) target bundleno = 6 (0x6), region = 82 }
 0x4a3   : > { %s5774_s21 = smov %s5767_s30 }
 0x4a5   :  { %3040 = vsyncpa [#allocation8], 1 }
 0x4a6   :  { %3042 = vsyncpa [#allocation8 + $0x1], 1 }

</bundles_post_ra>
